<compile_context>
chip_gen: v6e
topology: v6e:2x2x1
jax: 0.10.0
libtpu: 0.0.40
codegen_flags: <defaults>
</compile_context>

<pallas_src>
import math

import jax
import jax.numpy as jnp
import numpy as np
from jax.experimental import pallas as pl
from jax.experimental.pallas import tpu as pltpu

# ---- config (matches the PyTorch module) ----
HIDDEN = 128
NUM_HEADS = 16
NUM_KV_HEADS = 4
HEAD_DIM = HIDDEN // NUM_HEADS           # 8
N_REP = NUM_HEADS // NUM_KV_HEADS        # 4
KV_DIM = NUM_KV_HEADS * HEAD_DIM         # 32
BATCH = 2
SEQ = 10
MAX_POS = 256
ROPE_THETA = 10000.0
USE_QK_NORM = True
ATTENTION_BIAS = False                   # no bias terms in the projections
EPS = 1e-6
SCALE = 1.0 / math.sqrt(HEAD_DIM)


# ---------------- fused kernel: QKV proj + RoPE + QK-norm + attention + o_proj ----------------
def fused_attention_kernel(x_ref, wq_ref, wk_ref, wks_ref, wv_ref, wo_ref,
                           cos_ref, sin_ref, mq_ref, mk_ref, mask_ref,
                           out_ref, w_ref):
    f32 = jnp.float32
    x = x_ref[...]                      # (S, 128)
    cos = cos_ref[...]                  # (S, 128)  per-head tiled cos
    sin = sin_ref[...]                  # (S, 128)  per-head tiled sin * (-1,+1,...)

    # --- projections ---
    q = jnp.dot(x, wq_ref[...], preferred_element_type=f32)     # (S, 128)
    k = jnp.dot(x, wk_ref[...], preferred_element_type=f32)     # (S, 32)
    ks = jnp.dot(x, wks_ref[...], preferred_element_type=f32)   # pair-swapped k
    v = jnp.dot(x, wv_ref[...], preferred_element_type=f32)     # (S, 32)

    # --- interleaved RoPE ---
    # Q pair-swap via lane rolls (XLU) + parity select: swap[2i]=q[2i+1], swap[2i+1]=q[2i]
    col = jax.lax.broadcasted_iota(jnp.int32, q.shape, 1)
    even = (col & 1) == 0
    q_left = pltpu.roll(q, HIDDEN - 1, 1)      # value at lane i+1
    q_right = pltpu.roll(q, 1, 1)              # value at lane i-1
    q_swap = jnp.where(even, q_left, q_right)
    q_rope = q * cos + q_swap * sin

    cos_k = cos[:, :KV_DIM]
    sin_k = sin[:, :KV_DIM]
    k_rope = k * cos_k + ks * sin_k

    # --- per-head L2 norm (block-diagonal mean-of-squares matmul; 1/HEAD_DIM folded in) ---
    if USE_QK_NORM:
        q_ms = jnp.dot(q_rope * q_rope, mq_ref[...], preferred_element_type=f32)
        k_ms = jnp.dot(k_rope * k_rope, mk_ref[...], preferred_element_type=f32)
        q_rope = q_rope * jax.lax.rsqrt(q_ms + EPS)
        k_rope = k_rope * jax.lax.rsqrt(k_ms + EPS)

    qn = q_rope * SCALE                 # fold score scaling into Q (after the norm!)
    mask = mask_ref[...]                # (S, S) additive mask
    wo = wo_ref[...]                    # (128, 128)

    acc = jnp.zeros(x.shape, f32)       # (S, 128) fused o_proj accumulator
    for h in range(NUM_HEADS):          # static unroll; GQA: no repeat_kv materialized
        g = h // N_REP
        qh = qn[:, h * HEAD_DIM:(h + 1) * HEAD_DIM]          # (S, 8)
        kg = k_rope[:, g * HEAD_DIM:(g + 1) * HEAD_DIM]      # (S, 8)
        vg = v[:, g * HEAD_DIM:(g + 1) * HEAD_DIM]           # (S, 8)
        s = jax.lax.dot_general(qh, kg, (((1,), (1,)), ((), ())),
                                preferred_element_type=f32)   # (S, S)
        s = s + mask
        m = jnp.max(s, axis=-1, keepdims=True)
        e = jnp.exp(s - m)
        p = e * pl.reciprocal(jnp.sum(e, axis=-1, keepdims=True), approx=True)
        w_ref[h, :, :] = p                                    # attn_weights head plane
        o_h = jnp.dot(p, vg, preferred_element_type=f32)      # (S, 8)
        acc = acc + jnp.dot(o_h, wo[h * HEAD_DIM:(h + 1) * HEAD_DIM, :],
                            preferred_element_type=f32)       # (S, 128) lane-dense

    out_ref[...] = acc


def _bspec(shape):
    n_trailing = len(shape) - 1
    return pl.BlockSpec(shape, lambda b: (b,) + (0,) * n_trailing)


def _wspec(shape):
    n = len(shape)
    return pl.BlockSpec(shape, lambda b: (0,) * n)


def simplified_llama4_attention(hidden_states, attention_mask, position_ids, params):
    """hidden_states: (B, S, H) f32; attention_mask: (B, 1, S, S) additive;
    position_ids: (B, S) int. Returns (final_attn_output, attn_weights)."""
    B, S, H = hidden_states.shape
    wq, wk, wv, wo = params["wq"], params["wk"], params["wv"], params["wo"]  # (in, out)

    # --- glue: RoPE tables in flat interleaved-head layout (sign folded into sin) ---
    inv_freq = 1.0 / (ROPE_THETA ** (jnp.arange(0, HEAD_DIM, 2, dtype=jnp.float32)
                                     / HEAD_DIM))
    angles = position_ids.astype(jnp.float32)[..., None] * inv_freq       # (B, S, HD/2)
    cos_il = jnp.repeat(jnp.cos(angles), 2, axis=-1)                      # (B, S, HD)
    sin_il = jnp.repeat(jnp.sin(angles), 2, axis=-1)
    sign = jnp.tile(jnp.array([-1.0, 1.0], jnp.float32), HEAD_DIM // 2)   # (-s,+s,...)
    cos_full = jnp.tile(cos_il, (1, 1, NUM_HEADS))                        # (B, S, 128)
    sin_full = jnp.tile(sin_il * sign, (1, 1, NUM_HEADS))                 # (B, S, 128)

    # --- glue: pair-swap folded into the (tiny) K projection weight ---
    perm_k = np.arange(KV_DIM).reshape(-1, 2)[:, ::-1].reshape(-1)
    wk_swap = wk[:, perm_k]

    # --- glue: block-diagonal per-head mean(x^2) aggregators (1/HEAD_DIM folded in) ---
    mq = jnp.kron(jnp.eye(NUM_HEADS, dtype=jnp.float32),
                  jnp.full((HEAD_DIM, HEAD_DIM), 1.0 / HEAD_DIM, jnp.float32))
    mk = jnp.kron(jnp.eye(NUM_KV_HEADS, dtype=jnp.float32),
                  jnp.full((HEAD_DIM, HEAD_DIM), 1.0 / HEAD_DIM, jnp.float32))

    final, attn_weights = pl.pallas_call(
        fused_attention_kernel,
        out_shape=(
            jax.ShapeDtypeStruct((B, S, HIDDEN), jnp.float32),
            jax.ShapeDtypeStruct((B, NUM_HEADS, S, S), jnp.float32),
        ),
        grid=(B,),
        in_specs=[
            _bspec((None, S, HIDDEN)),          # x
            _wspec((HIDDEN, HIDDEN)),           # wq
            _wspec((HIDDEN, KV_DIM)),           # wk
            _wspec((HIDDEN, KV_DIM)),           # wk_swap
            _wspec((HIDDEN, KV_DIM)),           # wv
            _wspec((HIDDEN, HIDDEN)),           # wo
            _bspec((None, S, HIDDEN)),          # cos
            _bspec((None, S, HIDDEN)),          # sin (signed)
            _wspec((HIDDEN, HIDDEN)),           # mq
            _wspec((KV_DIM, KV_DIM)),           # mk
            _bspec((None, None, S, S)),         # attention mask
        ],
        out_specs=(
            _bspec((None, S, HIDDEN)),
            _bspec((None, NUM_HEADS, S, S)),
        ),
        compiler_params=pltpu.CompilerParams(dimension_semantics=("parallel",)),
    )(hidden_states, wq, wk, wk_swap, wv, wo, cos_full, sin_full, mq, mk,
      attention_mask)

    return final, attn_weights


# ---------------- pure-JAX reference (mirrors the PyTorch forward) ----------------
def reference_forward(x, mask, position_ids, wq, wk, wv, wo):
    B, S, H = x.shape
    hp = jax.lax.Precision.HIGHEST
    q = jnp.matmul(x, wq, precision=hp).reshape(B, S, NUM_HEADS, HEAD_DIM).transpose(0, 2, 1, 3)
    k = jnp.matmul(x, wk, precision=hp).reshape(B, S, NUM_KV_HEADS, HEAD_DIM).transpose(0, 2, 1, 3)
    v = jnp.matmul(x, wv, precision=hp).reshape(B, S, NUM_KV_HEADS, HEAD_DIM).transpose(0, 2, 1, 3)
    inv_freq = 1.0 / (ROPE_THETA ** (jnp.arange(0, HEAD_DIM, 2, dtype=jnp.float32) / HEAD_DIM))
    angles = position_ids.astype(jnp.float32)[:, :, None] * inv_freq      # (B, S, HD/2)
    cos = jnp.cos(angles)[:, None]                                        # (B, 1, S, HD/2)
    sin = jnp.sin(angles)[:, None]

    def rope(t):
        tr = t.reshape(*t.shape[:-1], HEAD_DIM // 2, 2)
        a, b = tr[..., 0], tr[..., 1]
        return jnp.stack([a * cos - b * sin, a * sin + b * cos], axis=-1).reshape(t.shape)

    q, k = rope(q), rope(k)
    if USE_QK_NORM:
        l2n = lambda t: t * jax.lax.rsqrt(jnp.mean(t * t, axis=-1, keepdims=True) + EPS)
        q, k = l2n(q), l2n(k)
    k = jnp.repeat(k, N_REP, axis=1)
    v = jnp.repeat(v, N_REP, axis=1)
    w = jnp.einsum("bhqd,bhkd->bhqk", q, k, precision=hp) * SCALE + mask
    w = jax.nn.softmax(w, axis=-1)
    out = jnp.einsum("bhqk,bhkd->bhqd", w, v, precision=hp)
    out = out.transpose(0, 2, 1, 3).reshape(B, S, HIDDEN)
    return jnp.matmul(out, wo, precision=hp), w


if __name__ == "__main__":
    key = jax.random.PRNGKey(0)
    kx, kq, kk, kv, ko = jax.random.split(key, 5)
    hidden_states = jax.random.normal(kx, (BATCH, SEQ, HIDDEN), jnp.float32)

    # deterministic parameter init (torch Linear weight is (out, in); we store (in, out))
    bound = 1.0 / math.sqrt(HIDDEN)
    wq = jax.random.uniform(kq, (HIDDEN, NUM_HEADS * HEAD_DIM), jnp.float32, -bound, bound)
    wk = jax.random.uniform(kk, (HIDDEN, NUM_KV_HEADS * HEAD_DIM), jnp.float32, -bound, bound)
    wv = jax.random.uniform(kv, (HIDDEN, NUM_KV_HEADS * HEAD_DIM), jnp.float32, -bound, bound)
    wo = jax.random.uniform(ko, (NUM_HEADS * HEAD_DIM, HIDDEN), jnp.float32, -bound, bound)
    params = dict(wq=wq, wk=wk, wv=wv, wo=wo)

    position_ids = jnp.tile(jnp.arange(SEQ, dtype=jnp.int32)[None, :], (BATCH, 1))
    causal = jnp.where(jnp.arange(SEQ)[:, None] >= jnp.arange(SEQ)[None, :],
                       0.0, -1e9).astype(jnp.float32)
    attention_mask = jnp.broadcast_to(causal[None, None], (BATCH, 1, SEQ, SEQ))

    out, attn_w = simplified_llama4_attention(hidden_states, attention_mask,
                                              position_ids, params)
    out = jax.block_until_ready(out)
    attn_w = jax.block_until_ready(attn_w)

    ref_out, ref_w = reference_forward(hidden_states, attention_mask, position_ids,
                                       wq, wk, wv, wo)
    assert out.shape == (BATCH, SEQ, HIDDEN)
    assert attn_w.shape == (BATCH, NUM_HEADS, SEQ, SEQ)
    assert jnp.allclose(out, ref_out, atol=5e-2, rtol=5e-2), \
        float(jnp.max(jnp.abs(out - ref_out)))
    assert jnp.allclose(attn_w, ref_w, atol=5e-2, rtol=5e-2), \
        float(jnp.max(jnp.abs(attn_w - ref_w)))
    print("KERNEL_OK")
</pallas_src>

<mosaic_0001>
module attributes {stable_mosaic.version = 11 : i64} {
  func.func @fused_attention_kernel(%arg0: i32, %arg1: memref<1x10x128xf32, #tpu.memory_space<vmem>>, %arg2: memref<128x128xf32, #tpu.memory_space<vmem>>, %arg3: memref<128x32xf32, #tpu.memory_space<vmem>>, %arg4: memref<128x32xf32, #tpu.memory_space<vmem>>, %arg5: memref<128x32xf32, #tpu.memory_space<vmem>>, %arg6: memref<128x128xf32, #tpu.memory_space<vmem>>, %arg7: memref<1x10x128xf32, #tpu.memory_space<vmem>>, %arg8: memref<1x10x128xf32, #tpu.memory_space<vmem>>, %arg9: memref<128x128xf32, #tpu.memory_space<vmem>>, %arg10: memref<32x32xf32, #tpu.memory_space<vmem>>, %arg11: memref<1x1x10x10xf32, #tpu.memory_space<vmem>>, %arg12: memref<1x10x128xf32, #tpu.memory_space<vmem>>, %arg13: memref<1x16x10x10xf32, #tpu.memory_space<vmem>>) attributes {dimension_semantics = [#tpu.dimension_semantics<parallel>], iteration_bounds = array<i64: 2>, scalar_prefetch = 0 : i64, scratch_operands = 0 : i64, tpu.core_type = #tpu.core_type<tc>, window_params = [{transform_indices = @transform_0, window_bounds = array<i64: 1, 10, 128>}, {pipeline_mode = #tpu.pipeline_mode<synchronous>, transform_indices = @transform_1, window_bounds = array<i64: 128, 128>}, {pipeline_mode = #tpu.pipeline_mode<synchronous>, transform_indices = @transform_2, window_bounds = array<i64: 128, 32>}, {pipeline_mode = #tpu.pipeline_mode<synchronous>, transform_indices = @transform_3, window_bounds = array<i64: 128, 32>}, {pipeline_mode = #tpu.pipeline_mode<synchronous>, transform_indices = @transform_4, window_bounds = array<i64: 128, 32>}, {pipeline_mode = #tpu.pipeline_mode<synchronous>, transform_indices = @transform_5, window_bounds = array<i64: 128, 128>}, {transform_indices = @transform_6, window_bounds = array<i64: 1, 10, 128>}, {transform_indices = @transform_7, window_bounds = array<i64: 1, 10, 128>}, {pipeline_mode = #tpu.pipeline_mode<synchronous>, transform_indices = @transform_8, window_bounds = array<i64: 128, 128>}, {pipeline_mode = #tpu.pipeline_mode<synchronous>, transform_indices = @transform_9, window_bounds = array<i64: 32, 32>}, {transform_indices = @transform_10, window_bounds = array<i64: 1, 1, 10, 10>}, {transform_indices = @transform_11, window_bounds = array<i64: 1, 10, 128>}, {transform_indices = @transform_12, window_bounds = array<i64: 1, 16, 10, 10>}]} {
    %c0 = arith.constant 0 : index
    %c0_0 = arith.constant 0 : index
    %c0_1 = arith.constant 0 : index
    %0 = vector.load %arg1[%c0, %c0_0, %c0_1] : memref<1x10x128xf32, #tpu.memory_space<vmem>>, vector<1x10x128xf32>
    %1 = vector.shape_cast %0 : vector<1x10x128xf32> to vector<10x128xf32>
    %c0_2 = arith.constant 0 : index
    %c0_3 = arith.constant 0 : index
    %c0_4 = arith.constant 0 : index
    %2 = vector.load %arg7[%c0_2, %c0_3, %c0_4] : memref<1x10x128xf32, #tpu.memory_space<vmem>>, vector<1x10x128xf32>
    %3 = vector.shape_cast %2 : vector<1x10x128xf32> to vector<10x128xf32>
    %c0_5 = arith.constant 0 : index
    %c0_6 = arith.constant 0 : index
    %c0_7 = arith.constant 0 : index
    %4 = vector.load %arg8[%c0_5, %c0_6, %c0_7] : memref<1x10x128xf32, #tpu.memory_space<vmem>>, vector<1x10x128xf32>
    %5 = vector.shape_cast %4 : vector<1x10x128xf32> to vector<10x128xf32>
    %c0_8 = arith.constant 0 : index
    %c0_9 = arith.constant 0 : index
    %6 = vector.load %arg2[%c0_8, %c0_9] : memref<128x128xf32, #tpu.memory_space<vmem>>, vector<128x128xf32>
    %cst = arith.constant dense<0.000000e+00> : vector<10x128xf32>
    %7 = tpu.matmul %1, %6, %cst {dimension_numbers = #tpu.dot_dimension_numbers<[1], [0], [0], [1], [0, 0, 1, 1], [], []>} : vector<10x128xf32>, vector<128x128xf32>, vector<10x128xf32> -> vector<10x128xf32>
    %c0_10 = arith.constant 0 : index
    %c0_11 = arith.constant 0 : index
    %8 = vector.load %arg3[%c0_10, %c0_11] : memref<128x32xf32, #tpu.memory_space<vmem>>, vector<128x32xf32>
    %cst_12 = arith.constant dense<0.000000e+00> : vector<10x32xf32>
    %9 = tpu.matmul %1, %8, %cst_12 {dimension_numbers = #tpu.dot_dimension_numbers<[1], [0], [0], [1], [0, 0, 1, 1], [], []>} : vector<10x128xf32>, vector<128x32xf32>, vector<10x32xf32> -> vector<10x32xf32>
    %c0_13 = arith.constant 0 : index
    %c0_14 = arith.constant 0 : index
    %10 = vector.load %arg4[%c0_13, %c0_14] : memref<128x32xf32, #tpu.memory_space<vmem>>, vector<128x32xf32>
    %cst_15 = arith.constant dense<0.000000e+00> : vector<10x32xf32>
    %11 = tpu.matmul %1, %10, %cst_15 {dimension_numbers = #tpu.dot_dimension_numbers<[1], [0], [0], [1], [0, 0, 1, 1], [], []>} : vector<10x128xf32>, vector<128x32xf32>, vector<10x32xf32> -> vector<10x32xf32>
    %c0_16 = arith.constant 0 : index
    %c0_17 = arith.constant 0 : index
    %12 = vector.load %arg5[%c0_16, %c0_17] : memref<128x32xf32, #tpu.memory_space<vmem>>, vector<128x32xf32>
    %cst_18 = arith.constant dense<0.000000e+00> : vector<10x32xf32>
    %13 = tpu.matmul %1, %12, %cst_18 {dimension_numbers = #tpu.dot_dimension_numbers<[1], [0], [0], [1], [0, 0, 1, 1], [], []>} : vector<10x128xf32>, vector<128x32xf32>, vector<10x32xf32> -> vector<10x32xf32>
    %14 = tpu.iota {dimensions = array<i32: 1>} : vector<10x128xi32>
    %c1_i32 = arith.constant 1 : i32
    %15 = vector.broadcast %c1_i32 : i32 to vector<10x128xi32>
    %16 = arith.andi %14, %15 : vector<10x128xi32>
    %c0_i32 = arith.constant 0 : i32
    %17 = vector.broadcast %c0_i32 : i32 to vector<10x128xi32>
    %18 = arith.cmpi eq, %16, %17 : vector<10x128xi32>
    %c127_i32 = arith.constant 127 : i32
    %19 = tpu.dynamic_rotate %7 by %c127_i32 dim 1 : vector<10x128xf32>, i32 -> vector<10x128xf32>
    %c1_i32_19 = arith.constant 1 : i32
    %20 = tpu.dynamic_rotate %7 by %c1_i32_19 dim 1 : vector<10x128xf32>, i32 -> vector<10x128xf32>
    %21 = arith.select %18, %19, %20 : vector<10x128xi1>, vector<10x128xf32>
    %22 = arith.mulf %7, %3 : vector<10x128xf32>
    %23 = arith.mulf %21, %5 : vector<10x128xf32>
    %24 = arith.addf %22, %23 : vector<10x128xf32>
    %25 = vector.extract_strided_slice %3 {offsets = [0, 0], sizes = [10, 32], strides = [1, 1]} : vector<10x128xf32> to vector<10x32xf32>
    %26 = vector.extract_strided_slice %5 {offsets = [0, 0], sizes = [10, 32], strides = [1, 1]} : vector<10x128xf32> to vector<10x32xf32>
    %27 = arith.mulf %9, %25 : vector<10x32xf32>
    %28 = arith.mulf %11, %26 : vector<10x32xf32>
    %29 = arith.addf %27, %28 : vector<10x32xf32>
    %30 = arith.mulf %24, %24 : vector<10x128xf32>
    %c0_20 = arith.constant 0 : index
    %c0_21 = arith.constant 0 : index
    %31 = vector.load %arg9[%c0_20, %c0_21] : memref<128x128xf32, #tpu.memory_space<vmem>>, vector<128x128xf32>
    %cst_22 = arith.constant dense<0.000000e+00> : vector<10x128xf32>
    %32 = tpu.matmul %30, %31, %cst_22 {dimension_numbers = #tpu.dot_dimension_numbers<[1], [0], [0], [1], [0, 0, 1, 1], [], []>} : vector<10x128xf32>, vector<128x128xf32>, vector<10x128xf32> -> vector<10x128xf32>
    %33 = arith.mulf %29, %29 : vector<10x32xf32>
    %c0_23 = arith.constant 0 : index
    %c0_24 = arith.constant 0 : index
    %34 = vector.load %arg10[%c0_23, %c0_24] : memref<32x32xf32, #tpu.memory_space<vmem>>, vector<32x32xf32>
    %cst_25 = arith.constant dense<0.000000e+00> : vector<10x32xf32>
    %35 = tpu.matmul %33, %34, %cst_25 {dimension_numbers = #tpu.dot_dimension_numbers<[1], [0], [0], [1], [0, 0, 1, 1], [], []>} : vector<10x32xf32>, vector<32x32xf32>, vector<10x32xf32> -> vector<10x32xf32>
    %cst_26 = arith.constant 9.99999997E-7 : f32
    %36 = vector.broadcast %cst_26 : f32 to vector<10x128xf32>
    %37 = arith.addf %32, %36 : vector<10x128xf32>
    %38 = math.rsqrt %37 : vector<10x128xf32>
    %39 = arith.mulf %24, %38 : vector<10x128xf32>
    %cst_27 = arith.constant 9.99999997E-7 : f32
    %40 = vector.broadcast %cst_27 : f32 to vector<10x32xf32>
    %41 = arith.addf %35, %40 : vector<10x32xf32>
    %42 = math.rsqrt %41 : vector<10x32xf32>
    %43 = arith.mulf %29, %42 : vector<10x32xf32>
    %cst_28 = arith.constant 0.353553385 : f32
    %44 = vector.broadcast %cst_28 : f32 to vector<10x128xf32>
    %45 = arith.mulf %39, %44 : vector<10x128xf32>
    %c0_29 = arith.constant 0 : index
    %c0_30 = arith.constant 0 : index
    %c0_31 = arith.constant 0 : index
    %c0_32 = arith.constant 0 : index
    %46 = vector.load %arg11[%c0_29, %c0_30, %c0_31, %c0_32] : memref<1x1x10x10xf32, #tpu.memory_space<vmem>>, vector<1x1x10x10xf32>
    %47 = vector.shape_cast %46 : vector<1x1x10x10xf32> to vector<10x10xf32>
    %c0_33 = arith.constant 0 : index
    %c0_34 = arith.constant 0 : index
    %48 = vector.load %arg6[%c0_33, %c0_34] : memref<128x128xf32, #tpu.memory_space<vmem>>, vector<128x128xf32>
    %cst_35 = arith.constant 0.000000e+00 : f32
    %49 = vector.broadcast %cst_35 : f32 to vector<10x128xf32>
    %50 = vector.extract_strided_slice %45 {offsets = [0, 0], sizes = [10, 8], strides = [1, 1]} : vector<10x128xf32> to vector<10x8xf32>
    %51 = vector.extract_strided_slice %43 {offsets = [0, 0], sizes = [10, 8], strides = [1, 1]} : vector<10x32xf32> to vector<10x8xf32>
    %52 = vector.extract_strided_slice %13 {offsets = [0, 0], sizes = [10, 8], strides = [1, 1]} : vector<10x32xf32> to vector<10x8xf32>
    %cst_36 = arith.constant dense<0.000000e+00> : vector<10x10xf32>
    %53 = tpu.matmul %50, %51, %cst_36 {dimension_numbers = #tpu.dot_dimension_numbers<[1], [1], [0], [0], [0, 0, 1, 0], [], []>} : vector<10x8xf32>, vector<10x8xf32>, vector<10x10xf32> -> vector<10x10xf32>
    %54 = arith.addf %53, %47 : vector<10x10xf32>
    %cst_37 = arith.constant dense<0xFF800000> : vector<10xf32>
    %55 = vector.multi_reduction <maximumf>, %54, %cst_37 [1] : vector<10x10xf32> to vector<10xf32>
    %56 = vector.shape_cast %55 : vector<10xf32> to vector<10x1xf32>
    %57 = vector.broadcast %56 : vector<10x1xf32> to vector<10x10xf32>
    %58 = arith.subf %54, %57 : vector<10x10xf32>
    %59 = math.exp %58 : vector<10x10xf32>
    %cst_38 = arith.constant dense<0.000000e+00> : vector<10xf32>
    %60 = vector.multi_reduction <add>, %59, %cst_38 [1] : vector<10x10xf32> to vector<10xf32>
    %61 = vector.shape_cast %60 : vector<10xf32> to vector<10x1xf32>
    %62 = tpu.reciprocal %61 {approx = true} : vector<10x1xf32> -> vector<10x1xf32>
    %63 = vector.broadcast %62 : vector<10x1xf32> to vector<10x10xf32>
    %64 = arith.mulf %59, %63 : vector<10x10xf32>
    %c0_39 = arith.constant 0 : index
    %c0_40 = arith.constant 0 : index
    %c0_41 = arith.constant 0 : index
    %c0_42 = arith.constant 0 : index
    %65 = vector.load %arg13[%c0_39, %c0_40, %c0_41, %c0_42] : memref<1x16x10x10xf32, #tpu.memory_space<vmem>>, vector<1x1x10x10xf32>
    %66 = vector.shape_cast %65 : vector<1x1x10x10xf32> to vector<10x10xf32>
    %67 = vector.shape_cast %64 : vector<10x10xf32> to vector<1x1x10x10xf32>
    tpu.vector_store %arg13[%c0_39, %c0_40, %c0_41, %c0_42], %67 {strides = array<i32>} : memref<1x16x10x10xf32, #tpu.memory_space<vmem>>, vector<1x1x10x10xf32>,
    %cst_43 = arith.constant dense<0.000000e+00> : vector<10x8xf32>
    %68 = tpu.matmul %64, %52, %cst_43 {dimension_numbers = #tpu.dot_dimension_numbers<[1], [0], [0], [1], [0, 0, 1, 1], [], []>} : vector<10x10xf32>, vector<10x8xf32>, vector<10x8xf32> -> vector<10x8xf32>
    %69 = vector.extract_strided_slice %48 {offsets = [0, 0], sizes = [8, 128], strides = [1, 1]} : vector<128x128xf32> to vector<8x128xf32>
    %cst_44 = arith.constant dense<0.000000e+00> : vector<10x128xf32>
    %70 = tpu.matmul %68, %69, %cst_44 {dimension_numbers = #tpu.dot_dimension_numbers<[1], [0], [0], [1], [0, 0, 1, 1], [], []>} : vector<10x8xf32>, vector<8x128xf32>, vector<10x128xf32> -> vector<10x128xf32>
    %71 = arith.addf %49, %70 : vector<10x128xf32>
    %72 = vector.extract_strided_slice %45 {offsets = [0, 8], sizes = [10, 8], strides = [1, 1]} : vector<10x128xf32> to vector<10x8xf32>
    %73 = vector.extract_strided_slice %43 {offsets = [0, 0], sizes = [10, 8], strides = [1, 1]} : vector<10x32xf32> to vector<10x8xf32>
    %74 = vector.extract_strided_slice %13 {offsets = [0, 0], sizes = [10, 8], strides = [1, 1]} : vector<10x32xf32> to vector<10x8xf32>
    %cst_45 = arith.constant dense<0.000000e+00> : vector<10x10xf32>
    %75 = tpu.matmul %72, %73, %cst_45 {dimension_numbers = #tpu.dot_dimension_numbers<[1], [1], [0], [0], [0, 0, 1, 0], [], []>} : vector<10x8xf32>, vector<10x8xf32>, vector<10x10xf32> -> vector<10x10xf32>
    %76 = arith.addf %75, %47 : vector<10x10xf32>
    %cst_46 = arith.constant dense<0xFF800000> : vector<10xf32>
    %77 = vector.multi_reduction <maximumf>, %76, %cst_46 [1] : vector<10x10xf32> to vector<10xf32>
    %78 = vector.shape_cast %77 : vector<10xf32> to vector<10x1xf32>
    %79 = vector.broadcast %78 : vector<10x1xf32> to vector<10x10xf32>
    %80 = arith.subf %76, %79 : vector<10x10xf32>
    %81 = math.exp %80 : vector<10x10xf32>
    %cst_47 = arith.constant dense<0.000000e+00> : vector<10xf32>
    %82 = vector.multi_reduction <add>, %81, %cst_47 [1] : vector<10x10xf32> to vector<10xf32>
    %83 = vector.shape_cast %82 : vector<10xf32> to vector<10x1xf32>
    %84 = tpu.reciprocal %83 {approx = true} : vector<10x1xf32> -> vector<10x1xf32>
    %85 = vector.broadcast %84 : vector<10x1xf32> to vector<10x10xf32>
    %86 = arith.mulf %81, %85 : vector<10x10xf32>
    %c0_48 = arith.constant 0 : index
    %c1 = arith.constant 1 : index
    %c0_49 = arith.constant 0 : index
    %c0_50 = arith.constant 0 : index
    %87 = vector.load %arg13[%c0_48, %c1, %c0_49, %c0_50] : memref<1x16x10x10xf32, #tpu.memory_space<vmem>>, vector<1x1x10x10xf32>
    %88 = vector.shape_cast %87 : vector<1x1x10x10xf32> to vector<10x10xf32>
    %89 = vector.shape_cast %86 : vector<10x10xf32> to vector<1x1x10x10xf32>
    tpu.vector_store %arg13[%c0_48, %c1, %c0_49, %c0_50], %89 {strides = array<i32>} : memref<1x16x10x10xf32, #tpu.memory_space<vmem>>, vector<1x1x10x10xf32>,
    %cst_51 = arith.constant dense<0.000000e+00> : vector<10x8xf32>
    %90 = tpu.matmul %86, %74, %cst_51 {dimension_numbers = #tpu.dot_dimension_numbers<[1], [0], [0], [1], [0, 0, 1, 1], [], []>} : vector<10x10xf32>, vector<10x8xf32>, vector<10x8xf32> -> vector<10x8xf32>
    %91 = vector.extract_strided_slice %48 {offsets = [8, 0], sizes = [8, 128], strides = [1, 1]} : vector<128x128xf32> to vector<8x128xf32>
    %cst_52 = arith.constant dense<0.000000e+00> : vector<10x128xf32>
    %92 = tpu.matmul %90, %91, %cst_52 {dimension_numbers = #tpu.dot_dimension_numbers<[1], [0], [0], [1], [0, 0, 1, 1], [], []>} : vector<10x8xf32>, vector<8x128xf32>, vector<10x128xf32> -> vector<10x128xf32>
    %93 = arith.addf %71, %92 : vector<10x128xf32>
    %94 = vector.extract_strided_slice %45 {offsets = [0, 16], sizes = [10, 8], strides = [1, 1]} : vector<10x128xf32> to vector<10x8xf32>
    %95 = vector.extract_strided_slice %43 {offsets = [0, 0], sizes = [10, 8], strides = [1, 1]} : vector<10x32xf32> to vector<10x8xf32>
    %96 = vector.extract_strided_slice %13 {offsets = [0, 0], sizes = [10, 8], strides = [1, 1]} : vector<10x32xf32> to vector<10x8xf32>
    %cst_53 = arith.constant dense<0.000000e+00> : vector<10x10xf32>
    %97 = tpu.matmul %94, %95, %cst_53 {dimension_numbers = #tpu.dot_dimension_numbers<[1], [1], [0], [0], [0, 0, 1, 0], [], []>} : vector<10x8xf32>, vector<10x8xf32>, vector<10x10xf32> -> vector<10x10xf32>
    %98 = arith.addf %97, %47 : vector<10x10xf32>
    %cst_54 = arith.constant dense<0xFF800000> : vector<10xf32>
    %99 = vector.multi_reduction <maximumf>, %98, %cst_54 [1] : vector<10x10xf32> to vector<10xf32>
    %100 = vector.shape_cast %99 : vector<10xf32> to vector<10x1xf32>
    %101 = vector.broadcast %100 : vector<10x1xf32> to vector<10x10xf32>
    %102 = arith.subf %98, %101 : vector<10x10xf32>
    %103 = math.exp %102 : vector<10x10xf32>
    %cst_55 = arith.constant dense<0.000000e+00> : vector<10xf32>
    %104 = vector.multi_reduction <add>, %103, %cst_55 [1] : vector<10x10xf32> to vector<10xf32>
    %105 = vector.shape_cast %104 : vector<10xf32> to vector<10x1xf32>
    %106 = tpu.reciprocal %105 {approx = true} : vector<10x1xf32> -> vector<10x1xf32>
    %107 = vector.broadcast %106 : vector<10x1xf32> to vector<10x10xf32>
    %108 = arith.mulf %103, %107 : vector<10x10xf32>
    %c0_56 = arith.constant 0 : index
    %c2 = arith.constant 2 : index
    %c0_57 = arith.constant 0 : index
    %c0_58 = arith.constant 0 : index
    %109 = vector.load %arg13[%c0_56, %c2, %c0_57, %c0_58] : memref<1x16x10x10xf32, #tpu.memory_space<vmem>>, vector<1x1x10x10xf32>
    %110 = vector.shape_cast %109 : vector<1x1x10x10xf32> to vector<10x10xf32>
    %111 = vector.shape_cast %108 : vector<10x10xf32> to vector<1x1x10x10xf32>
    tpu.vector_store %arg13[%c0_56, %c2, %c0_57, %c0_58], %111 {strides = array<i32>} : memref<1x16x10x10xf32, #tpu.memory_space<vmem>>, vector<1x1x10x10xf32>,
    %cst_59 = arith.constant dense<0.000000e+00> : vector<10x8xf32>
    %112 = tpu.matmul %108, %96, %cst_59 {dimension_numbers = #tpu.dot_dimension_numbers<[1], [0], [0], [1], [0, 0, 1, 1], [], []>} : vector<10x10xf32>, vector<10x8xf32>, vector<10x8xf32> -> vector<10x8xf32>
    %113 = vector.extract_strided_slice %48 {offsets = [16, 0], sizes = [8, 128], strides = [1, 1]} : vector<128x128xf32> to vector<8x128xf32>
    %cst_60 = arith.constant dense<0.000000e+00> : vector<10x128xf32>
    %114 = tpu.matmul %112, %113, %cst_60 {dimension_numbers = #tpu.dot_dimension_numbers<[1], [0], [0], [1], [0, 0, 1, 1], [], []>} : vector<10x8xf32>, vector<8x128xf32>, vector<10x128xf32> -> vector<10x128xf32>
    %115 = arith.addf %93, %114 : vector<10x128xf32>
    %116 = vector.extract_strided_slice %45 {offsets = [0, 24], sizes = [10, 8], strides = [1, 1]} : vector<10x128xf32> to vector<10x8xf32>
    %117 = vector.extract_strided_slice %43 {offsets = [0, 0], sizes = [10, 8], strides = [1, 1]} : vector<10x32xf32> to vector<10x8xf32>
    %118 = vector.extract_strided_slice %13 {offsets = [0, 0], sizes = [10, 8], strides = [1, 1]} : vector<10x32xf32> to vector<10x8xf32>
    %cst_61 = arith.constant dense<0.000000e+00> : vector<10x10xf32>
    %119 = tpu.matmul %116, %117, %cst_61 {dimension_numbers = #tpu.dot_dimension_numbers<[1], [1], [0], [0], [0, 0, 1, 0], [], []>} : vector<10x8xf32>, vector<10x8xf32>, vector<10x10xf32> -> vector<10x10xf32>
    %120 = arith.addf %119, %47 : vector<10x10xf32>
    %cst_62 = arith.constant dense<0xFF800000> : vector<10xf32>
    %121 = vector.multi_reduction <maximumf>, %120, %cst_62 [1] : vector<10x10xf32> to vector<10xf32>
    %122 = vector.shape_cast %121 : vector<10xf32> to vector<10x1xf32>
    %123 = vector.broadcast %122 : vector<10x1xf32> to vector<10x10xf32>
    %124 = arith.subf %120, %123 : vector<10x10xf32>
    %125 = math.exp %124 : vector<10x10xf32>
    %cst_63 = arith.constant dense<0.000000e+00> : vector<10xf32>
    %126 = vector.multi_reduction <add>, %125, %cst_63 [1] : vector<10x10xf32> to vector<10xf32>
    %127 = vector.shape_cast %126 : vector<10xf32> to vector<10x1xf32>
    %128 = tpu.reciprocal %127 {approx = true} : vector<10x1xf32> -> vector<10x1xf32>
    %129 = vector.broadcast %128 : vector<10x1xf32> to vector<10x10xf32>
    %130 = arith.mulf %125, %129 : vector<10x10xf32>
    %c0_64 = arith.constant 0 : index
    %c3 = arith.constant 3 : index
    %c0_65 = arith.constant 0 : index
    %c0_66 = arith.constant 0 : index
    %131 = vector.load %arg13[%c0_64, %c3, %c0_65, %c0_66] : memref<1x16x10x10xf32, #tpu.memory_space<vmem>>, vector<1x1x10x10xf32>
    %132 = vector.shape_cast %131 : vector<1x1x10x10xf32> to vector<10x10xf32>
    %133 = vector.shape_cast %130 : vector<10x10xf32> to vector<1x1x10x10xf32>
    tpu.vector_store %arg13[%c0_64, %c3, %c0_65, %c0_66], %133 {strides = array<i32>} : memref<1x16x10x10xf32, #tpu.memory_space<vmem>>, vector<1x1x10x10xf32>,
    %cst_67 = arith.constant dense<0.000000e+00> : vector<10x8xf32>
    %134 = tpu.matmul %130, %118, %cst_67 {dimension_numbers = #tpu.dot_dimension_numbers<[1], [0], [0], [1], [0, 0, 1, 1], [], []>} : vector<10x10xf32>, vector<10x8xf32>, vector<10x8xf32> -> vector<10x8xf32>
    %135 = vector.extract_strided_slice %48 {offsets = [24, 0], sizes = [8, 128], strides = [1, 1]} : vector<128x128xf32> to vector<8x128xf32>
    %cst_68 = arith.constant dense<0.000000e+00> : vector<10x128xf32>
    %136 = tpu.matmul %134, %135, %cst_68 {dimension_numbers = #tpu.dot_dimension_numbers<[1], [0], [0], [1], [0, 0, 1, 1], [], []>} : vector<10x8xf32>, vector<8x128xf32>, vector<10x128xf32> -> vector<10x128xf32>
    %137 = arith.addf %115, %136 : vector<10x128xf32>
    %138 = vector.extract_strided_slice %45 {offsets = [0, 32], sizes = [10, 8], strides = [1, 1]} : vector<10x128xf32> to vector<10x8xf32>
    %139 = vector.extract_strided_slice %43 {offsets = [0, 8], sizes = [10, 8], strides = [1, 1]} : vector<10x32xf32> to vector<10x8xf32>
    %140 = vector.extract_strided_slice %13 {offsets = [0, 8], sizes = [10, 8], strides = [1, 1]} : vector<10x32xf32> to vector<10x8xf32>
    %cst_69 = arith.constant dense<0.000000e+00> : vector<10x10xf32>
    %141 = tpu.matmul %138, %139, %cst_69 {dimension_numbers = #tpu.dot_dimension_numbers<[1], [1], [0], [0], [0, 0, 1, 0], [], []>} : vector<10x8xf32>, vector<10x8xf32>, vector<10x10xf32> -> vector<10x10xf32>
    %142 = arith.addf %141, %47 : vector<10x10xf32>
    %cst_70 = arith.constant dense<0xFF800000> : vector<10xf32>
    %143 = vector.multi_reduction <maximumf>, %142, %cst_70 [1] : vector<10x10xf32> to vector<10xf32>
    %144 = vector.shape_cast %143 : vector<10xf32> to vector<10x1xf32>
    %145 = vector.broadcast %144 : vector<10x1xf32> to vector<10x10xf32>
    %146 = arith.subf %142, %145 : vector<10x10xf32>
    %147 = math.exp %146 : vector<10x10xf32>
    %cst_71 = arith.constant dense<0.000000e+00> : vector<10xf32>
    %148 = vector.multi_reduction <add>, %147, %cst_71 [1] : vector<10x10xf32> to vector<10xf32>
    %149 = vector.shape_cast %148 : vector<10xf32> to vector<10x1xf32>
    %150 = tpu.reciprocal %149 {approx = true} : vector<10x1xf32> -> vector<10x1xf32>
    %151 = vector.broadcast %150 : vector<10x1xf32> to vector<10x10xf32>
    %152 = arith.mulf %147, %151 : vector<10x10xf32>
    %c0_72 = arith.constant 0 : index
    %c4 = arith.constant 4 : index
    %c0_73 = arith.constant 0 : index
    %c0_74 = arith.constant 0 : index
    %153 = vector.load %arg13[%c0_72, %c4, %c0_73, %c0_74] : memref<1x16x10x10xf32, #tpu.memory_space<vmem>>, vector<1x1x10x10xf32>
    %154 = vector.shape_cast %153 : vector<1x1x10x10xf32> to vector<10x10xf32>
    %155 = vector.shape_cast %152 : vector<10x10xf32> to vector<1x1x10x10xf32>
    tpu.vector_store %arg13[%c0_72, %c4, %c0_73, %c0_74], %155 {strides = array<i32>} : memref<1x16x10x10xf32, #tpu.memory_space<vmem>>, vector<1x1x10x10xf32>,
    %cst_75 = arith.constant dense<0.000000e+00> : vector<10x8xf32>
    %156 = tpu.matmul %152, %140, %cst_75 {dimension_numbers = #tpu.dot_dimension_numbers<[1], [0], [0], [1], [0, 0, 1, 1], [], []>} : vector<10x10xf32>, vector<10x8xf32>, vector<10x8xf32> -> vector<10x8xf32>
    %157 = vector.extract_strided_slice %48 {offsets = [32, 0], sizes = [8, 128], strides = [1, 1]} : vector<128x128xf32> to vector<8x128xf32>
    %cst_76 = arith.constant dense<0.000000e+00> : vector<10x128xf32>
    %158 = tpu.matmul %156, %157, %cst_76 {dimension_numbers = #tpu.dot_dimension_numbers<[1], [0], [0], [1], [0, 0, 1, 1], [], []>} : vector<10x8xf32>, vector<8x128xf32>, vector<10x128xf32> -> vector<10x128xf32>
    %159 = arith.addf %137, %158 : vector<10x128xf32>
    %160 = vector.extract_strided_slice %45 {offsets = [0, 40], sizes = [10, 8], strides = [1, 1]} : vector<10x128xf32> to vector<10x8xf32>
    %161 = vector.extract_strided_slice %43 {offsets = [0, 8], sizes = [10, 8], strides = [1, 1]} : vector<10x32xf32> to vector<10x8xf32>
    %162 = vector.extract_strided_slice %13 {offsets = [0, 8], sizes = [10, 8], strides = [1, 1]} : vector<10x32xf32> to vector<10x8xf32>
    %cst_77 = arith.constant dense<0.000000e+00> : vector<10x10xf32>
    %163 = tpu.matmul %160, %161, %cst_77 {dimension_numbers = #tpu.dot_dimension_numbers<[1], [1], [0], [0], [0, 0, 1, 0], [], []>} : vector<10x8xf32>, vector<10x8xf32>, vector<10x10xf32> -> vector<10x10xf32>
    %164 = arith.addf %163, %47 : vector<10x10xf32>
    %cst_78 = arith.constant dense<0xFF800000> : vector<10xf32>
    %165 = vector.multi_reduction <maximumf>, %164, %cst_78 [1] : vector<10x10xf32> to vector<10xf32>
    %166 = vector.shape_cast %165 : vector<10xf32> to vector<10x1xf32>
    %167 = vector.broadcast %166 : vector<10x1xf32> to vector<10x10xf32>
    %168 = arith.subf %164, %167 : vector<10x10xf32>
    %169 = math.exp %168 : vector<10x10xf32>
    %cst_79 = arith.constant dense<0.000000e+00> : vector<10xf32>
    %170 = vector.multi_reduction <add>, %169, %cst_79 [1] : vector<10x10xf32> to vector<10xf32>
    %171 = vector.shape_cast %170 : vector<10xf32> to vector<10x1xf32>
    %172 = tpu.reciprocal %171 {approx = true} : vector<10x1xf32> -> vector<10x1xf32>
    %173 = vector.broadcast %172 : vector<10x1xf32> to vector<10x10xf32>
    %174 = arith.mulf %169, %173 : vector<10x10xf32>
    %c0_80 = arith.constant 0 : index
    %c5 = arith.constant 5 : index
    %c0_81 = arith.constant 0 : index
    %c0_82 = arith.constant 0 : index
    %175 = vector.load %arg13[%c0_80, %c5, %c0_81, %c0_82] : memref<1x16x10x10xf32, #tpu.memory_space<vmem>>, vector<1x1x10x10xf32>
    %176 = vector.shape_cast %175 : vector<1x1x10x10xf32> to vector<10x10xf32>
    %177 = vector.shape_cast %174 : vector<10x10xf32> to vector<1x1x10x10xf32>
    tpu.vector_store %arg13[%c0_80, %c5, %c0_81, %c0_82], %177 {strides = array<i32>} : memref<1x16x10x10xf32, #tpu.memory_space<vmem>>, vector<1x1x10x10xf32>,
    %cst_83 = arith.constant dense<0.000000e+00> : vector<10x8xf32>
    %178 = tpu.matmul %174, %162, %cst_83 {dimension_numbers = #tpu.dot_dimension_numbers<[1], [0], [0], [1], [0, 0, 1, 1], [], []>} : vector<10x10xf32>, vector<10x8xf32>, vector<10x8xf32> -> vector<10x8xf32>
    %179 = vector.extract_strided_slice %48 {offsets = [40, 0], sizes = [8, 128], strides = [1, 1]} : vector<128x128xf32> to vector<8x128xf32>
    %cst_84 = arith.constant dense<0.000000e+00> : vector<10x128xf32>
    %180 = tpu.matmul %178, %179, %cst_84 {dimension_numbers = #tpu.dot_dimension_numbers<[1], [0], [0], [1], [0, 0, 1, 1], [], []>} : vector<10x8xf32>, vector<8x128xf32>, vector<10x128xf32> -> vector<10x128xf32>
    %181 = arith.addf %159, %180 : vector<10x128xf32>
    %182 = vector.extract_strided_slice %45 {offsets = [0, 48], sizes = [10, 8], strides = [1, 1]} : vector<10x128xf32> to vector<10x8xf32>
    %183 = vector.extract_strided_slice %43 {offsets = [0, 8], sizes = [10, 8], strides = [1, 1]} : vector<10x32xf32> to vector<10x8xf32>
    %184 = vector.extract_strided_slice %13 {offsets = [0, 8], sizes = [10, 8], strides = [1, 1]} : vector<10x32xf32> to vector<10x8xf32>
    %cst_85 = arith.constant dense<0.000000e+00> : vector<10x10xf32>
    %185 = tpu.matmul %182, %183, %cst_85 {dimension_numbers = #tpu.dot_dimension_numbers<[1], [1], [0], [0], [0, 0, 1, 0], [], []>} : vector<10x8xf32>, vector<10x8xf32>, vector<10x10xf32> -> vector<10x10xf32>
    %186 = arith.addf %185, %47 : vector<10x10xf32>
    %cst_86 = arith.constant dense<0xFF800000> : vector<10xf32>
    %187 = vector.multi_reduction <maximumf>, %186, %cst_86 [1] : vector<10x10xf32> to vector<10xf32>
    %188 = vector.shape_cast %187 : vector<10xf32> to vector<10x1xf32>
    %189 = vector.broadcast %188 : vector<10x1xf32> to vector<10x10xf32>
    %190 = arith.subf %186, %189 : vector<10x10xf32>
    %191 = math.exp %190 : vector<10x10xf32>
    %cst_87 = arith.constant dense<0.000000e+00> : vector<10xf32>
    %192 = vector.multi_reduction <add>, %191, %cst_87 [1] : vector<10x10xf32> to vector<10xf32>
    %193 = vector.shape_cast %192 : vector<10xf32> to vector<10x1xf32>
    %194 = tpu.reciprocal %193 {approx = true} : vector<10x1xf32> -> vector<10x1xf32>
    %195 = vector.broadcast %194 : vector<10x1xf32> to vector<10x10xf32>
    %196 = arith.mulf %191, %195 : vector<10x10xf32>
    %c0_88 = arith.constant 0 : index
    %c6 = arith.constant 6 : index
    %c0_89 = arith.constant 0 : index
    %c0_90 = arith.constant 0 : index
    %197 = vector.load %arg13[%c0_88, %c6, %c0_89, %c0_90] : memref<1x16x10x10xf32, #tpu.memory_space<vmem>>, vector<1x1x10x10xf32>
    %198 = vector.shape_cast %197 : vector<1x1x10x10xf32> to vector<10x10xf32>
    %199 = vector.shape_cast %196 : vector<10x10xf32> to vector<1x1x10x10xf32>
    tpu.vector_store %arg13[%c0_88, %c6, %c0_89, %c0_90], %199 {strides = array<i32>} : memref<1x16x10x10xf32, #tpu.memory_space<vmem>>, vector<1x1x10x10xf32>,
    %cst_91 = arith.constant dense<0.000000e+00> : vector<10x8xf32>
    %200 = tpu.matmul %196, %184, %cst_91 {dimension_numbers = #tpu.dot_dimension_numbers<[1], [0], [0], [1], [0, 0, 1, 1], [], []>} : vector<10x10xf32>, vector<10x8xf32>, vector<10x8xf32> -> vector<10x8xf32>
    %201 = vector.extract_strided_slice %48 {offsets = [48, 0], sizes = [8, 128], strides = [1, 1]} : vector<128x128xf32> to vector<8x128xf32>
    %cst_92 = arith.constant dense<0.000000e+00> : vector<10x128xf32>
    %202 = tpu.matmul %200, %201, %cst_92 {dimension_numbers = #tpu.dot_dimension_numbers<[1], [0], [0], [1], [0, 0, 1, 1], [], []>} : vector<10x8xf32>, vector<8x128xf32>, vector<10x128xf32> -> vector<10x128xf32>
    %203 = arith.addf %181, %202 : vector<10x128xf32>
    %204 = vector.extract_strided_slice %45 {offsets = [0, 56], sizes = [10, 8], strides = [1, 1]} : vector<10x128xf32> to vector<10x8xf32>
    %205 = vector.extract_strided_slice %43 {offsets = [0, 8], sizes = [10, 8], strides = [1, 1]} : vector<10x32xf32> to vector<10x8xf32>
    %206 = vector.extract_strided_slice %13 {offsets = [0, 8], sizes = [10, 8], strides = [1, 1]} : vector<10x32xf32> to vector<10x8xf32>
    %cst_93 = arith.constant dense<0.000000e+00> : vector<10x10xf32>
    %207 = tpu.matmul %204, %205, %cst_93 {dimension_numbers = #tpu.dot_dimension_numbers<[1], [1], [0], [0], [0, 0, 1, 0], [], []>} : vector<10x8xf32>, vector<10x8xf32>, vector<10x10xf32> -> vector<10x10xf32>
    %208 = arith.addf %207, %47 : vector<10x10xf32>
    %cst_94 = arith.constant dense<0xFF800000> : vector<10xf32>
    %209 = vector.multi_reduction <maximumf>, %208, %cst_94 [1] : vector<10x10xf32> to vector<10xf32>
    %210 = vector.shape_cast %209 : vector<10xf32> to vector<10x1xf32>
    %211 = vector.broadcast %210 : vector<10x1xf32> to vector<10x10xf32>
    %212 = arith.subf %208, %211 : vector<10x10xf32>
    %213 = math.exp %212 : vector<10x10xf32>
    %cst_95 = arith.constant dense<0.000000e+00> : vector<10xf32>
    %214 = vector.multi_reduction <add>, %213, %cst_95 [1] : vector<10x10xf32> to vector<10xf32>
    %215 = vector.shape_cast %214 : vector<10xf32> to vector<10x1xf32>
    %216 = tpu.reciprocal %215 {approx = true} : vector<10x1xf32> -> vector<10x1xf32>
    %217 = vector.broadcast %216 : vector<10x1xf32> to vector<10x10xf32>
    %218 = arith.mulf %213, %217 : vector<10x10xf32>
    %c0_96 = arith.constant 0 : index
    %c7 = arith.constant 7 : index
    %c0_97 = arith.constant 0 : index
    %c0_98 = arith.constant 0 : index
    %219 = vector.load %arg13[%c0_96, %c7, %c0_97, %c0_98] : memref<1x16x10x10xf32, #tpu.memory_space<vmem>>, vector<1x1x10x10xf32>
    %220 = vector.shape_cast %219 : vector<1x1x10x10xf32> to vector<10x10xf32>
    %221 = vector.shape_cast %218 : vector<10x10xf32> to vector<1x1x10x10xf32>
    tpu.vector_store %arg13[%c0_96, %c7, %c0_97, %c0_98], %221 {strides = array<i32>} : memref<1x16x10x10xf32, #tpu.memory_space<vmem>>, vector<1x1x10x10xf32>,
    %cst_99 = arith.constant dense<0.000000e+00> : vector<10x8xf32>
    %222 = tpu.matmul %218, %206, %cst_99 {dimension_numbers = #tpu.dot_dimension_numbers<[1], [0], [0], [1], [0, 0, 1, 1], [], []>} : vector<10x10xf32>, vector<10x8xf32>, vector<10x8xf32> -> vector<10x8xf32>
    %223 = vector.extract_strided_slice %48 {offsets = [56, 0], sizes = [8, 128], strides = [1, 1]} : vector<128x128xf32> to vector<8x128xf32>
    %cst_100 = arith.constant dense<0.000000e+00> : vector<10x128xf32>
    %224 = tpu.matmul %222, %223, %cst_100 {dimension_numbers = #tpu.dot_dimension_numbers<[1], [0], [0], [1], [0, 0, 1, 1], [], []>} : vector<10x8xf32>, vector<8x128xf32>, vector<10x128xf32> -> vector<10x128xf32>
    %225 = arith.addf %203, %224 : vector<10x128xf32>
    %226 = vector.extract_strided_slice %45 {offsets = [0, 64], sizes = [10, 8], strides = [1, 1]} : vector<10x128xf32> to vector<10x8xf32>
    %227 = vector.extract_strided_slice %43 {offsets = [0, 16], sizes = [10, 8], strides = [1, 1]} : vector<10x32xf32> to vector<10x8xf32>
    %228 = vector.extract_strided_slice %13 {offsets = [0, 16], sizes = [10, 8], strides = [1, 1]} : vector<10x32xf32> to vector<10x8xf32>
    %cst_101 = arith.constant dense<0.000000e+00> : vector<10x10xf32>
    %229 = tpu.matmul %226, %227, %cst_101 {dimension_numbers = #tpu.dot_dimension_numbers<[1], [1], [0], [0], [0, 0, 1, 0], [], []>} : vector<10x8xf32>, vector<10x8xf32>, vector<10x10xf32> -> vector<10x10xf32>
    %230 = arith.addf %229, %47 : vector<10x10xf32>
    %cst_102 = arith.constant dense<0xFF800000> : vector<10xf32>
    %231 = vector.multi_reduction <maximumf>, %230, %cst_102 [1] : vector<10x10xf32> to vector<10xf32>
    %232 = vector.shape_cast %231 : vector<10xf32> to vector<10x1xf32>
    %233 = vector.broadcast %232 : vector<10x1xf32> to vector<10x10xf32>
    %234 = arith.subf %230, %233 : vector<10x10xf32>
    %235 = math.exp %234 : vector<10x10xf32>
    %cst_103 = arith.constant dense<0.000000e+00> : vector<10xf32>
    %236 = vector.multi_reduction <add>, %235, %cst_103 [1] : vector<10x10xf32> to vector<10xf32>
    %237 = vector.shape_cast %236 : vector<10xf32> to vector<10x1xf32>
    %238 = tpu.reciprocal %237 {approx = true} : vector<10x1xf32> -> vector<10x1xf32>
    %239 = vector.broadcast %238 : vector<10x1xf32> to vector<10x10xf32>
    %240 = arith.mulf %235, %239 : vector<10x10xf32>
    %c0_104 = arith.constant 0 : index
    %c8 = arith.constant 8 : index
    %c0_105 = arith.constant 0 : index
    %c0_106 = arith.constant 0 : index
    %241 = vector.load %arg13[%c0_104, %c8, %c0_105, %c0_106] : memref<1x16x10x10xf32, #tpu.memory_space<vmem>>, vector<1x1x10x10xf32>
    %242 = vector.shape_cast %241 : vector<1x1x10x10xf32> to vector<10x10xf32>
    %243 = vector.shape_cast %240 : vector<10x10xf32> to vector<1x1x10x10xf32>
    tpu.vector_store %arg13[%c0_104, %c8, %c0_105, %c0_106], %243 {strides = array<i32>} : memref<1x16x10x10xf32, #tpu.memory_space<vmem>>, vector<1x1x10x10xf32>,
    %cst_107 = arith.constant dense<0.000000e+00> : vector<10x8xf32>
    %244 = tpu.matmul %240, %228, %cst_107 {dimension_numbers = #tpu.dot_dimension_numbers<[1], [0], [0], [1], [0, 0, 1, 1], [], []>} : vector<10x10xf32>, vector<10x8xf32>, vector<10x8xf32> -> vector<10x8xf32>
    %245 = vector.extract_strided_slice %48 {offsets = [64, 0], sizes = [8, 128], strides = [1, 1]} : vector<128x128xf32> to vector<8x128xf32>
    %cst_108 = arith.constant dense<0.000000e+00> : vector<10x128xf32>
    %246 = tpu.matmul %244, %245, %cst_108 {dimension_numbers = #tpu.dot_dimension_numbers<[1], [0], [0], [1], [0, 0, 1, 1], [], []>} : vector<10x8xf32>, vector<8x128xf32>, vector<10x128xf32> -> vector<10x128xf32>
    %247 = arith.addf %225, %246 : vector<10x128xf32>
    %248 = vector.extract_strided_slice %45 {offsets = [0, 72], sizes = [10, 8], strides = [1, 1]} : vector<10x128xf32> to vector<10x8xf32>
    %249 = vector.extract_strided_slice %43 {offsets = [0, 16], sizes = [10, 8], strides = [1, 1]} : vector<10x32xf32> to vector<10x8xf32>
    %250 = vector.extract_strided_slice %13 {offsets = [0, 16], sizes = [10, 8], strides = [1, 1]} : vector<10x32xf32> to vector<10x8xf32>
    %cst_109 = arith.constant dense<0.000000e+00> : vector<10x10xf32>
    %251 = tpu.matmul %248, %249, %cst_109 {dimension_numbers = #tpu.dot_dimension_numbers<[1], [1], [0], [0], [0, 0, 1, 0], [], []>} : vector<10x8xf32>, vector<10x8xf32>, vector<10x10xf32> -> vector<10x10xf32>
    %252 = arith.addf %251, %47 : vector<10x10xf32>
    %cst_110 = arith.constant dense<0xFF800000> : vector<10xf32>
    %253 = vector.multi_reduction <maximumf>, %252, %cst_110 [1] : vector<10x10xf32> to vector<10xf32>
    %254 = vector.shape_cast %253 : vector<10xf32> to vector<10x1xf32>
    %255 = vector.broadcast %254 : vector<10x1xf32> to vector<10x10xf32>
    %256 = arith.subf %252, %255 : vector<10x10xf32>
    %257 = math.exp %256 : vector<10x10xf32>
    %cst_111 = arith.constant dense<0.000000e+00> : vector<10xf32>
    %258 = vector.multi_reduction <add>, %257, %cst_111 [1] : vector<10x10xf32> to vector<10xf32>
    %259 = vector.shape_cast %258 : vector<10xf32> to vector<10x1xf32>
    %260 = tpu.reciprocal %259 {approx = true} : vector<10x1xf32> -> vector<10x1xf32>
    %261 = vector.broadcast %260 : vector<10x1xf32> to vector<10x10xf32>
    %262 = arith.mulf %257, %261 : vector<10x10xf32>
    %c0_112 = arith.constant 0 : index
    %c9 = arith.constant 9 : index
    %c0_113 = arith.constant 0 : index
    %c0_114 = arith.constant 0 : index
    %263 = vector.load %arg13[%c0_112, %c9, %c0_113, %c0_114] : memref<1x16x10x10xf32, #tpu.memory_space<vmem>>, vector<1x1x10x10xf32>
    %264 = vector.shape_cast %263 : vector<1x1x10x10xf32> to vector<10x10xf32>
    %265 = vector.shape_cast %262 : vector<10x10xf32> to vector<1x1x10x10xf32>
    tpu.vector_store %arg13[%c0_112, %c9, %c0_113, %c0_114], %265 {strides = array<i32>} : memref<1x16x10x10xf32, #tpu.memory_space<vmem>>, vector<1x1x10x10xf32>,
    %cst_115 = arith.constant dense<0.000000e+00> : vector<10x8xf32>
    %266 = tpu.matmul %262, %250, %cst_115 {dimension_numbers = #tpu.dot_dimension_numbers<[1], [0], [0], [1], [0, 0, 1, 1], [], []>} : vector<10x10xf32>, vector<10x8xf32>, vector<10x8xf32> -> vector<10x8xf32>
    %267 = vector.extract_strided_slice %48 {offsets = [72, 0], sizes = [8, 128], strides = [1, 1]} : vector<128x128xf32> to vector<8x128xf32>
    %cst_116 = arith.constant dense<0.000000e+00> : vector<10x128xf32>
    %268 = tpu.matmul %266, %267, %cst_116 {dimension_numbers = #tpu.dot_dimension_numbers<[1], [0], [0], [1], [0, 0, 1, 1], [], []>} : vector<10x8xf32>, vector<8x128xf32>, vector<10x128xf32> -> vector<10x128xf32>
    %269 = arith.addf %247, %268 : vector<10x128xf32>
    %270 = vector.extract_strided_slice %45 {offsets = [0, 80], sizes = [10, 8], strides = [1, 1]} : vector<10x128xf32> to vector<10x8xf32>
    %271 = vector.extract_strided_slice %43 {offsets = [0, 16], sizes = [10, 8], strides = [1, 1]} : vector<10x32xf32> to vector<10x8xf32>
    %272 = vector.extract_strided_slice %13 {offsets = [0, 16], sizes = [10, 8], strides = [1, 1]} : vector<10x32xf32> to vector<10x8xf32>
    %cst_117 = arith.constant dense<0.000000e+00> : vector<10x10xf32>
    %273 = tpu.matmul %270, %271, %cst_117 {dimension_numbers = #tpu.dot_dimension_numbers<[1], [1], [0], [0], [0, 0, 1, 0], [], []>} : vector<10x8xf32>, vector<10x8xf32>, vector<10x10xf32> -> vector<10x10xf32>
    %274 = arith.addf %273, %47 : vector<10x10xf32>
    %cst_118 = arith.constant dense<0xFF800000> : vector<10xf32>
    %275 = vector.multi_reduction <maximumf>, %274, %cst_118 [1] : vector<10x10xf32> to vector<10xf32>
    %276 = vector.shape_cast %275 : vector<10xf32> to vector<10x1xf32>
    %277 = vector.broadcast %276 : vector<10x1xf32> to vector<10x10xf32>
    %278 = arith.subf %274, %277 : vector<10x10xf32>
    %279 = math.exp %278 : vector<10x10xf32>
    %cst_119 = arith.constant dense<0.000000e+00> : vector<10xf32>
    %280 = vector.multi_reduction <add>, %279, %cst_119 [1] : vector<10x10xf32> to vector<10xf32>
    %281 = vector.shape_cast %280 : vector<10xf32> to vector<10x1xf32>
    %282 = tpu.reciprocal %281 {approx = true} : vector<10x1xf32> -> vector<10x1xf32>
    %283 = vector.broadcast %282 : vector<10x1xf32> to vector<10x10xf32>
    %284 = arith.mulf %279, %283 : vector<10x10xf32>
    %c0_120 = arith.constant 0 : index
    %c10 = arith.constant 10 : index
    %c0_121 = arith.constant 0 : index
    %c0_122 = arith.constant 0 : index
    %285 = vector.load %arg13[%c0_120, %c10, %c0_121, %c0_122] : memref<1x16x10x10xf32, #tpu.memory_space<vmem>>, vector<1x1x10x10xf32>
    %286 = vector.shape_cast %285 : vector<1x1x10x10xf32> to vector<10x10xf32>
    %287 = vector.shape_cast %284 : vector<10x10xf32> to vector<1x1x10x10xf32>
    tpu.vector_store %arg13[%c0_120, %c10, %c0_121, %c0_122], %287 {strides = array<i32>} : memref<1x16x10x10xf32, #tpu.memory_space<vmem>>, vector<1x1x10x10xf32>,
    %cst_123 = arith.constant dense<0.000000e+00> : vector<10x8xf32>
    %288 = tpu.matmul %284, %272, %cst_123 {dimension_numbers = #tpu.dot_dimension_numbers<[1], [0], [0], [1], [0, 0, 1, 1], [], []>} : vector<10x10xf32>, vector<10x8xf32>, vector<10x8xf32> -> vector<10x8xf32>
    %289 = vector.extract_strided_slice %48 {offsets = [80, 0], sizes = [8, 128], strides = [1, 1]} : vector<128x128xf32> to vector<8x128xf32>
    %cst_124 = arith.constant dense<0.000000e+00> : vector<10x128xf32>
    %290 = tpu.matmul %288, %289, %cst_124 {dimension_numbers = #tpu.dot_dimension_numbers<[1], [0], [0], [1], [0, 0, 1, 1], [], []>} : vector<10x8xf32>, vector<8x128xf32>, vector<10x128xf32> -> vector<10x128xf32>
    %291 = arith.addf %269, %290 : vector<10x128xf32>
    %292 = vector.extract_strided_slice %45 {offsets = [0, 88], sizes = [10, 8], strides = [1, 1]} : vector<10x128xf32> to vector<10x8xf32>
    %293 = vector.extract_strided_slice %43 {offsets = [0, 16], sizes = [10, 8], strides = [1, 1]} : vector<10x32xf32> to vector<10x8xf32>
    %294 = vector.extract_strided_slice %13 {offsets = [0, 16], sizes = [10, 8], strides = [1, 1]} : vector<10x32xf32> to vector<10x8xf32>
    %cst_125 = arith.constant dense<0.000000e+00> : vector<10x10xf32>
    %295 = tpu.matmul %292, %293, %cst_125 {dimension_numbers = #tpu.dot_dimension_numbers<[1], [1], [0], [0], [0, 0, 1, 0], [], []>} : vector<10x8xf32>, vector<10x8xf32>, vector<10x10xf32> -> vector<10x10xf32>
    %296 = arith.addf %295, %47 : vector<10x10xf32>
    %cst_126 = arith.constant dense<0xFF800000> : vector<10xf32>
    %297 = vector.multi_reduction <maximumf>, %296, %cst_126 [1] : vector<10x10xf32> to vector<10xf32>
    %298 = vector.shape_cast %297 : vector<10xf32> to vector<10x1xf32>
    %299 = vector.broadcast %298 : vector<10x1xf32> to vector<10x10xf32>
    %300 = arith.subf %296, %299 : vector<10x10xf32>
    %301 = math.exp %300 : vector<10x10xf32>
    %cst_127 = arith.constant dense<0.000000e+00> : vector<10xf32>
    %302 = vector.multi_reduction <add>, %301, %cst_127 [1] : vector<10x10xf32> to vector<10xf32>
    %303 = vector.shape_cast %302 : vector<10xf32> to vector<10x1xf32>
    %304 = tpu.reciprocal %303 {approx = true} : vector<10x1xf32> -> vector<10x1xf32>
    %305 = vector.broadcast %304 : vector<10x1xf32> to vector<10x10xf32>
    %306 = arith.mulf %301, %305 : vector<10x10xf32>
    %c0_128 = arith.constant 0 : index
    %c11 = arith.constant 11 : index
    %c0_129 = arith.constant 0 : index
    %c0_130 = arith.constant 0 : index
    %307 = vector.load %arg13[%c0_128, %c11, %c0_129, %c0_130] : memref<1x16x10x10xf32, #tpu.memory_space<vmem>>, vector<1x1x10x10xf32>
    %308 = vector.shape_cast %307 : vector<1x1x10x10xf32> to vector<10x10xf32>
    %309 = vector.shape_cast %306 : vector<10x10xf32> to vector<1x1x10x10xf32>
    tpu.vector_store %arg13[%c0_128, %c11, %c0_129, %c0_130], %309 {strides = array<i32>} : memref<1x16x10x10xf32, #tpu.memory_space<vmem>>, vector<1x1x10x10xf32>,
    %cst_131 = arith.constant dense<0.000000e+00> : vector<10x8xf32>
    %310 = tpu.matmul %306, %294, %cst_131 {dimension_numbers = #tpu.dot_dimension_numbers<[1], [0], [0], [1], [0, 0, 1, 1], [], []>} : vector<10x10xf32>, vector<10x8xf32>, vector<10x8xf32> -> vector<10x8xf32>
    %311 = vector.extract_strided_slice %48 {offsets = [88, 0], sizes = [8, 128], strides = [1, 1]} : vector<128x128xf32> to vector<8x128xf32>
    %cst_132 = arith.constant dense<0.000000e+00> : vector<10x128xf32>
    %312 = tpu.matmul %310, %311, %cst_132 {dimension_numbers = #tpu.dot_dimension_numbers<[1], [0], [0], [1], [0, 0, 1, 1], [], []>} : vector<10x8xf32>, vector<8x128xf32>, vector<10x128xf32> -> vector<10x128xf32>
    %313 = arith.addf %291, %312 : vector<10x128xf32>
    %314 = vector.extract_strided_slice %45 {offsets = [0, 96], sizes = [10, 8], strides = [1, 1]} : vector<10x128xf32> to vector<10x8xf32>
    %315 = vector.extract_strided_slice %43 {offsets = [0, 24], sizes = [10, 8], strides = [1, 1]} : vector<10x32xf32> to vector<10x8xf32>
    %316 = vector.extract_strided_slice %13 {offsets = [0, 24], sizes = [10, 8], strides = [1, 1]} : vector<10x32xf32> to vector<10x8xf32>
    %cst_133 = arith.constant dense<0.000000e+00> : vector<10x10xf32>
    %317 = tpu.matmul %314, %315, %cst_133 {dimension_numbers = #tpu.dot_dimension_numbers<[1], [1], [0], [0], [0, 0, 1, 0], [], []>} : vector<10x8xf32>, vector<10x8xf32>, vector<10x10xf32> -> vector<10x10xf32>
    %318 = arith.addf %317, %47 : vector<10x10xf32>
    %cst_134 = arith.constant dense<0xFF800000> : vector<10xf32>
    %319 = vector.multi_reduction <maximumf>, %318, %cst_134 [1] : vector<10x10xf32> to vector<10xf32>
    %320 = vector.shape_cast %319 : vector<10xf32> to vector<10x1xf32>
    %321 = vector.broadcast %320 : vector<10x1xf32> to vector<10x10xf32>
    %322 = arith.subf %318, %321 : vector<10x10xf32>
    %323 = math.exp %322 : vector<10x10xf32>
    %cst_135 = arith.constant dense<0.000000e+00> : vector<10xf32>
    %324 = vector.multi_reduction <add>, %323, %cst_135 [1] : vector<10x10xf32> to vector<10xf32>
    %325 = vector.shape_cast %324 : vector<10xf32> to vector<10x1xf32>
    %326 = tpu.reciprocal %325 {approx = true} : vector<10x1xf32> -> vector<10x1xf32>
    %327 = vector.broadcast %326 : vector<10x1xf32> to vector<10x10xf32>
    %328 = arith.mulf %323, %327 : vector<10x10xf32>
    %c0_136 = arith.constant 0 : index
    %c12 = arith.constant 12 : index
    %c0_137 = arith.constant 0 : index
    %c0_138 = arith.constant 0 : index
    %329 = vector.load %arg13[%c0_136, %c12, %c0_137, %c0_138] : memref<1x16x10x10xf32, #tpu.memory_space<vmem>>, vector<1x1x10x10xf32>
    %330 = vector.shape_cast %329 : vector<1x1x10x10xf32> to vector<10x10xf32>
    %331 = vector.shape_cast %328 : vector<10x10xf32> to vector<1x1x10x10xf32>
    tpu.vector_store %arg13[%c0_136, %c12, %c0_137, %c0_138], %331 {strides = array<i32>} : memref<1x16x10x10xf32, #tpu.memory_space<vmem>>, vector<1x1x10x10xf32>,
    %cst_139 = arith.constant dense<0.000000e+00> : vector<10x8xf32>
    %332 = tpu.matmul %328, %316, %cst_139 {dimension_numbers = #tpu.dot_dimension_numbers<[1], [0], [0], [1], [0, 0, 1, 1], [], []>} : vector<10x10xf32>, vector<10x8xf32>, vector<10x8xf32> -> vector<10x8xf32>
    %333 = vector.extract_strided_slice %48 {offsets = [96, 0], sizes = [8, 128], strides = [1, 1]} : vector<128x128xf32> to vector<8x128xf32>
    %cst_140 = arith.constant dense<0.000000e+00> : vector<10x128xf32>
    %334 = tpu.matmul %332, %333, %cst_140 {dimension_numbers = #tpu.dot_dimension_numbers<[1], [0], [0], [1], [0, 0, 1, 1], [], []>} : vector<10x8xf32>, vector<8x128xf32>, vector<10x128xf32> -> vector<10x128xf32>
    %335 = arith.addf %313, %334 : vector<10x128xf32>
    %336 = vector.extract_strided_slice %45 {offsets = [0, 104], sizes = [10, 8], strides = [1, 1]} : vector<10x128xf32> to vector<10x8xf32>
    %337 = vector.extract_strided_slice %43 {offsets = [0, 24], sizes = [10, 8], strides = [1, 1]} : vector<10x32xf32> to vector<10x8xf32>
    %338 = vector.extract_strided_slice %13 {offsets = [0, 24], sizes = [10, 8], strides = [1, 1]} : vector<10x32xf32> to vector<10x8xf32>
    %cst_141 = arith.constant dense<0.000000e+00> : vector<10x10xf32>
    %339 = tpu.matmul %336, %337, %cst_141 {dimension_numbers = #tpu.dot_dimension_numbers<[1], [1], [0], [0], [0, 0, 1, 0], [], []>} : vector<10x8xf32>, vector<10x8xf32>, vector<10x10xf32> -> vector<10x10xf32>
    %340 = arith.addf %339, %47 : vector<10x10xf32>
    %cst_142 = arith.constant dense<0xFF800000> : vector<10xf32>
    %341 = vector.multi_reduction <maximumf>, %340, %cst_142 [1] : vector<10x10xf32> to vector<10xf32>
    %342 = vector.shape_cast %341 : vector<10xf32> to vector<10x1xf32>
    %343 = vector.broadcast %342 : vector<10x1xf32> to vector<10x10xf32>
    %344 = arith.subf %340, %343 : vector<10x10xf32>
    %345 = math.exp %344 : vector<10x10xf32>
    %cst_143 = arith.constant dense<0.000000e+00> : vector<10xf32>
    %346 = vector.multi_reduction <add>, %345, %cst_143 [1] : vector<10x10xf32> to vector<10xf32>
    %347 = vector.shape_cast %346 : vector<10xf32> to vector<10x1xf32>
    %348 = tpu.reciprocal %347 {approx = true} : vector<10x1xf32> -> vector<10x1xf32>
    %349 = vector.broadcast %348 : vector<10x1xf32> to vector<10x10xf32>
    %350 = arith.mulf %345, %349 : vector<10x10xf32>
    %c0_144 = arith.constant 0 : index
    %c13 = arith.constant 13 : index
    %c0_145 = arith.constant 0 : index
    %c0_146 = arith.constant 0 : index
    %351 = vector.load %arg13[%c0_144, %c13, %c0_145, %c0_146] : memref<1x16x10x10xf32, #tpu.memory_space<vmem>>, vector<1x1x10x10xf32>
    %352 = vector.shape_cast %351 : vector<1x1x10x10xf32> to vector<10x10xf32>
    %353 = vector.shape_cast %350 : vector<10x10xf32> to vector<1x1x10x10xf32>
    tpu.vector_store %arg13[%c0_144, %c13, %c0_145, %c0_146], %353 {strides = array<i32>} : memref<1x16x10x10xf32, #tpu.memory_space<vmem>>, vector<1x1x10x10xf32>,
    %cst_147 = arith.constant dense<0.000000e+00> : vector<10x8xf32>
    %354 = tpu.matmul %350, %338, %cst_147 {dimension_numbers = #tpu.dot_dimension_numbers<[1], [0], [0], [1], [0, 0, 1, 1], [], []>} : vector<10x10xf32>, vector<10x8xf32>, vector<10x8xf32> -> vector<10x8xf32>
    %355 = vector.extract_strided_slice %48 {offsets = [104, 0], sizes = [8, 128], strides = [1, 1]} : vector<128x128xf32> to vector<8x128xf32>
    %cst_148 = arith.constant dense<0.000000e+00> : vector<10x128xf32>
    %356 = tpu.matmul %354, %355, %cst_148 {dimension_numbers = #tpu.dot_dimension_numbers<[1], [0], [0], [1], [0, 0, 1, 1], [], []>} : vector<10x8xf32>, vector<8x128xf32>, vector<10x128xf32> -> vector<10x128xf32>
    %357 = arith.addf %335, %356 : vector<10x128xf32>
    %358 = vector.extract_strided_slice %45 {offsets = [0, 112], sizes = [10, 8], strides = [1, 1]} : vector<10x128xf32> to vector<10x8xf32>
    %359 = vector.extract_strided_slice %43 {offsets = [0, 24], sizes = [10, 8], strides = [1, 1]} : vector<10x32xf32> to vector<10x8xf32>
    %360 = vector.extract_strided_slice %13 {offsets = [0, 24], sizes = [10, 8], strides = [1, 1]} : vector<10x32xf32> to vector<10x8xf32>
    %cst_149 = arith.constant dense<0.000000e+00> : vector<10x10xf32>
    %361 = tpu.matmul %358, %359, %cst_149 {dimension_numbers = #tpu.dot_dimension_numbers<[1], [1], [0], [0], [0, 0, 1, 0], [], []>} : vector<10x8xf32>, vector<10x8xf32>, vector<10x10xf32> -> vector<10x10xf32>
    %362 = arith.addf %361, %47 : vector<10x10xf32>
    %cst_150 = arith.constant dense<0xFF800000> : vector<10xf32>
    %363 = vector.multi_reduction <maximumf>, %362, %cst_150 [1] : vector<10x10xf32> to vector<10xf32>
    %364 = vector.shape_cast %363 : vector<10xf32> to vector<10x1xf32>
    %365 = vector.broadcast %364 : vector<10x1xf32> to vector<10x10xf32>
    %366 = arith.subf %362, %365 : vector<10x10xf32>
    %367 = math.exp %366 : vector<10x10xf32>
    %cst_151 = arith.constant dense<0.000000e+00> : vector<10xf32>
    %368 = vector.multi_reduction <add>, %367, %cst_151 [1] : vector<10x10xf32> to vector<10xf32>
    %369 = vector.shape_cast %368 : vector<10xf32> to vector<10x1xf32>
    %370 = tpu.reciprocal %369 {approx = true} : vector<10x1xf32> -> vector<10x1xf32>
    %371 = vector.broadcast %370 : vector<10x1xf32> to vector<10x10xf32>
    %372 = arith.mulf %367, %371 : vector<10x10xf32>
    %c0_152 = arith.constant 0 : index
    %c14 = arith.constant 14 : index
    %c0_153 = arith.constant 0 : index
    %c0_154 = arith.constant 0 : index
    %373 = vector.load %arg13[%c0_152, %c14, %c0_153, %c0_154] : memref<1x16x10x10xf32, #tpu.memory_space<vmem>>, vector<1x1x10x10xf32>
    %374 = vector.shape_cast %373 : vector<1x1x10x10xf32> to vector<10x10xf32>
    %375 = vector.shape_cast %372 : vector<10x10xf32> to vector<1x1x10x10xf32>
    tpu.vector_store %arg13[%c0_152, %c14, %c0_153, %c0_154], %375 {strides = array<i32>} : memref<1x16x10x10xf32, #tpu.memory_space<vmem>>, vector<1x1x10x10xf32>,
    %cst_155 = arith.constant dense<0.000000e+00> : vector<10x8xf32>
    %376 = tpu.matmul %372, %360, %cst_155 {dimension_numbers = #tpu.dot_dimension_numbers<[1], [0], [0], [1], [0, 0, 1, 1], [], []>} : vector<10x10xf32>, vector<10x8xf32>, vector<10x8xf32> -> vector<10x8xf32>
    %377 = vector.extract_strided_slice %48 {offsets = [112, 0], sizes = [8, 128], strides = [1, 1]} : vector<128x128xf32> to vector<8x128xf32>
    %cst_156 = arith.constant dense<0.000000e+00> : vector<10x128xf32>
    %378 = tpu.matmul %376, %377, %cst_156 {dimension_numbers = #tpu.dot_dimension_numbers<[1], [0], [0], [1], [0, 0, 1, 1], [], []>} : vector<10x8xf32>, vector<8x128xf32>, vector<10x128xf32> -> vector<10x128xf32>
    %379 = arith.addf %357, %378 : vector<10x128xf32>
    %380 = vector.extract_strided_slice %45 {offsets = [0, 120], sizes = [10, 8], strides = [1, 1]} : vector<10x128xf32> to vector<10x8xf32>
    %381 = vector.extract_strided_slice %43 {offsets = [0, 24], sizes = [10, 8], strides = [1, 1]} : vector<10x32xf32> to vector<10x8xf32>
    %382 = vector.extract_strided_slice %13 {offsets = [0, 24], sizes = [10, 8], strides = [1, 1]} : vector<10x32xf32> to vector<10x8xf32>
    %cst_157 = arith.constant dense<0.000000e+00> : vector<10x10xf32>
    %383 = tpu.matmul %380, %381, %cst_157 {dimension_numbers = #tpu.dot_dimension_numbers<[1], [1], [0], [0], [0, 0, 1, 0], [], []>} : vector<10x8xf32>, vector<10x8xf32>, vector<10x10xf32> -> vector<10x10xf32>
    %384 = arith.addf %383, %47 : vector<10x10xf32>
    %cst_158 = arith.constant dense<0xFF800000> : vector<10xf32>
    %385 = vector.multi_reduction <maximumf>, %384, %cst_158 [1] : vector<10x10xf32> to vector<10xf32>
    %386 = vector.shape_cast %385 : vector<10xf32> to vector<10x1xf32>
    %387 = vector.broadcast %386 : vector<10x1xf32> to vector<10x10xf32>
    %388 = arith.subf %384, %387 : vector<10x10xf32>
    %389 = math.exp %388 : vector<10x10xf32>
    %cst_159 = arith.constant dense<0.000000e+00> : vector<10xf32>
    %390 = vector.multi_reduction <add>, %389, %cst_159 [1] : vector<10x10xf32> to vector<10xf32>
    %391 = vector.shape_cast %390 : vector<10xf32> to vector<10x1xf32>
    %392 = tpu.reciprocal %391 {approx = true} : vector<10x1xf32> -> vector<10x1xf32>
    %393 = vector.broadcast %392 : vector<10x1xf32> to vector<10x10xf32>
    %394 = arith.mulf %389, %393 : vector<10x10xf32>
    %c0_160 = arith.constant 0 : index
    %c15 = arith.constant 15 : index
    %c0_161 = arith.constant 0 : index
    %c0_162 = arith.constant 0 : index
    %395 = vector.load %arg13[%c0_160, %c15, %c0_161, %c0_162] : memref<1x16x10x10xf32, #tpu.memory_space<vmem>>, vector<1x1x10x10xf32>
    %396 = vector.shape_cast %395 : vector<1x1x10x10xf32> to vector<10x10xf32>
    %397 = vector.shape_cast %394 : vector<10x10xf32> to vector<1x1x10x10xf32>
    tpu.vector_store %arg13[%c0_160, %c15, %c0_161, %c0_162], %397 {strides = array<i32>} : memref<1x16x10x10xf32, #tpu.memory_space<vmem>>, vector<1x1x10x10xf32>,
    %cst_163 = arith.constant dense<0.000000e+00> : vector<10x8xf32>
    %398 = tpu.matmul %394, %382, %cst_163 {dimension_numbers = #tpu.dot_dimension_numbers<[1], [0], [0], [1], [0, 0, 1, 1], [], []>} : vector<10x10xf32>, vector<10x8xf32>, vector<10x8xf32> -> vector<10x8xf32>
    %399 = vector.extract_strided_slice %48 {offsets = [120, 0], sizes = [8, 128], strides = [1, 1]} : vector<128x128xf32> to vector<8x128xf32>
    %cst_164 = arith.constant dense<0.000000e+00> : vector<10x128xf32>
    %400 = tpu.matmul %398, %399, %cst_164 {dimension_numbers = #tpu.dot_dimension_numbers<[1], [0], [0], [1], [0, 0, 1, 1], [], []>} : vector<10x8xf32>, vector<8x128xf32>, vector<10x128xf32> -> vector<10x128xf32>
    %401 = arith.addf %379, %400 : vector<10x128xf32>
    %c0_165 = arith.constant 0 : index
    %c0_166 = arith.constant 0 : index
    %c0_167 = arith.constant 0 : index
    %402 = vector.load %arg12[%c0_165, %c0_166, %c0_167] : memref<1x10x128xf32, #tpu.memory_space<vmem>>, vector<1x10x128xf32>
    %403 = vector.shape_cast %402 : vector<1x10x128xf32> to vector<10x128xf32>
    %404 = vector.shape_cast %401 : vector<10x128xf32> to vector<1x10x128xf32>
    tpu.vector_store %arg12[%c0_165, %c0_166, %c0_167], %404 {strides = array<i32>} : memref<1x10x128xf32, #tpu.memory_space<vmem>>, vector<1x10x128xf32>,
    return
  }
  func.func @transform_0(%arg0: i32) -> (i32, i32, i32) {
    %c0_i32 = arith.constant 0 : i32
    %c0_i32_0 = arith.constant 0 : i32
    %c0_i32_1 = arith.constant 0 : i32
    return %arg0, %c0_i32, %c0_i32_0 : i32, i32, i32
  }
  func.func @transform_1(%arg0: i32) -> (i32, i32) {
    %c0_i32 = arith.constant 0 : i32
    %c0_i32_0 = arith.constant 0 : i32
    %c0_i32_1 = arith.constant 0 : i32
    return %c0_i32, %c0_i32_0 : i32, i32
  }
  func.func @transform_2(%arg0: i32) -> (i32, i32) {
    %c0_i32 = arith.constant 0 : i32
    %c0_i32_0 = arith.constant 0 : i32
    %c0_i32_1 = arith.constant 0 : i32
    return %c0_i32, %c0_i32_0 : i32, i32
  }
  func.func @transform_3(%arg0: i32) -> (i32, i32) {
    %c0_i32 = arith.constant 0 : i32
    %c0_i32_0 = arith.constant 0 : i32
    %c0_i32_1 = arith.constant 0 : i32
    return %c0_i32, %c0_i32_0 : i32, i32
  }
  func.func @transform_4(%arg0: i32) -> (i32, i32) {
    %c0_i32 = arith.constant 0 : i32
    %c0_i32_0 = arith.constant 0 : i32
    %c0_i32_1 = arith.constant 0 : i32
    return %c0_i32, %c0_i32_0 : i32, i32
  }
  func.func @transform_5(%arg0: i32) -> (i32, i32) {
    %c0_i32 = arith.constant 0 : i32
    %c0_i32_0 = arith.constant 0 : i32
    %c0_i32_1 = arith.constant 0 : i32
    return %c0_i32, %c0_i32_0 : i32, i32
  }
  func.func @transform_6(%arg0: i32) -> (i32, i32, i32) {
    %c0_i32 = arith.constant 0 : i32
    %c0_i32_0 = arith.constant 0 : i32
    %c0_i32_1 = arith.constant 0 : i32
    return %arg0, %c0_i32, %c0_i32_0 : i32, i32, i32
  }
  func.func @transform_7(%arg0: i32) -> (i32, i32, i32) {
    %c0_i32 = arith.constant 0 : i32
    %c0_i32_0 = arith.constant 0 : i32
    %c0_i32_1 = arith.constant 0 : i32
    return %arg0, %c0_i32, %c0_i32_0 : i32, i32, i32
  }
  func.func @transform_8(%arg0: i32) -> (i32, i32) {
    %c0_i32 = arith.constant 0 : i32
    %c0_i32_0 = arith.constant 0 : i32
    %c0_i32_1 = arith.constant 0 : i32
    return %c0_i32, %c0_i32_0 : i32, i32
  }
  func.func @transform_9(%arg0: i32) -> (i32, i32) {
    %c0_i32 = arith.constant 0 : i32
    %c0_i32_0 = arith.constant 0 : i32
    %c0_i32_1 = arith.constant 0 : i32
    return %c0_i32, %c0_i32_0 : i32, i32
  }
  func.func @transform_10(%arg0: i32) -> (i32, i32, i32, i32) {
    %c0_i32 = arith.constant 0 : i32
    %c0_i32_0 = arith.constant 0 : i32
    %c0_i32_1 = arith.constant 0 : i32
    %c0_i32_2 = arith.constant 0 : i32
    return %arg0, %c0_i32, %c0_i32_0, %c0_i32_1 : i32, i32, i32, i32
  }
  func.func @transform_11(%arg0: i32) -> (i32, i32, i32) {
    %c0_i32 = arith.constant 0 : i32
    %c0_i32_0 = arith.constant 0 : i32
    %c0_i32_1 = arith.constant 0 : i32
    return %arg0, %c0_i32, %c0_i32_0 : i32, i32, i32
  }
  func.func @transform_12(%arg0: i32) -> (i32, i32, i32, i32) {
    %c0_i32 = arith.constant 0 : i32
    %c0_i32_0 = arith.constant 0 : i32
    %c0_i32_1 = arith.constant 0 : i32
    %c0_i32_2 = arith.constant 0 : i32
    return %arg0, %c0_i32, %c0_i32_0, %c0_i32_1 : i32, i32, i32, i32
  }
}

</mosaic_0001>

<bundles_post_ra>
// kernel: tpu_custom_call.1
= control target key start
LH: loop header
LB: loop body
LE: loop exit
PB: predicated region body
PF: predicated region fallthrough
CT: control target
= control target key end

     0   :  { %s6838_s21 = smov 0   ;;  %s7839_s0 = inlined_call_operand.vmem [shape: f32[2,10,128], index: 0, kind: input, shape index: {}]   ;;  %s7840_s1 = inlined_call_operand.vmem [shape: f32[128,128], index: 1, kind: input, shape index: {}]   ;;  %s7841_s2 = inlined_call_operand.vmem [shape: f32[128,32], index: 2, kind: input, shape index: {}]   ;;  %s7842_s3 = inlined_call_operand.vmem [shape: f32[128,32], index: 3, kind: input, shape index: {}]   ;;  %s7843_s4 = inlined_call_operand.vmem [shape: f32[128,32], index: 4, kind: input, shape index: {}]   ;;  %s7844_s5 = inlined_call_operand.vmem [shape: f32[128,128], index: 5, kind: input, shape index: {}]   ;;  %s7845_s6 = inlined_call_operand.vmem [shape: f32[2,10,128], index: 6, kind: input, shape index: {}]   ;;  %s7846_s7 = inlined_call_operand.vmem [shape: f32[2,10,128], index: 7, kind: input, shape index: {}]   ;;  %s7847_s8 = inlined_call_operand.vmem [shape: f32[128,128], index: 8, kind: input, shape index: {}]   ;;  %s7848_s9 = inlined_call_operand.vmem [shape: f32[32,32], index: 9, kind: input, shape index: {}]   ;;  %s7849_s10 = inlined_call_operand.vmem [shape: f32[2,1,10,10], index: 10, kind: input, shape index: {}]   ;;  %s7850_s11 = inlined_call_operand.vmem [shape: f32[2,10,128], index: 11, kind: output, shape index: {0}]   ;;  %s7851_s12 = inlined_call_operand.vmem [shape: f32[2,16,10,10], index: 12, kind: output, shape index: {1}]  }
   0x1 LB: > { %s5622_s22 = sadd.s32 4294967295, %s6754_s21   ;;  %p5626_p0 = scmp.ge.s32.totalorder %s6754_s21, 1  ;;  %s6754_s21 = sphi %s6838_s21, %s23_s21  }
   0x2   : > { %p395_p1 = scmp.lt.s32.totalorder %s6754_s21, 3 }
   0x4   : > { %p396_p2 = pnand %p5626_p0, %p395_p1 }
   0x5   : > { %p457_p3 = scmp.lt.s32.totalorder (!%p396_p2), %s5622_s22, 1  ;;  %s6756_s18 = smov (!%p396_p2), 127  }
   0x6   : > { %399 = sbr.rel (%p396_p2) target bundleno = 5961 (0x1749), region = 64  ;;  %s6757_s19 = smov (!%p396_p2), 1  }
   0x7   : > { %s6758_s30 = smov (!%p396_p2), 120   ;;  %s6761_s23 = smov (!%p396_p2), 96  }
   0x8   : > { %s6766_s26 = smov (!%p396_p2), 56   ;;  %s6771_s27 = smov (!%p396_p2), 16  }
   0xb   : > { %v508_v0 = vld [vmem:[%s7840_s1 + $0x78] sm:$0xff]  ;;  %v507_v1 = vld [vmem:[%s7840_s1 + $0x70] sm:$0xff]  ;;  %v506_v2 = vld [vmem:[%s7840_s1 + $0x68] sm:$0xff]  ;;  %s7853_s22 = smov (!%p457_p3, %s5622_s22), 1  ;;  %vm986_vm0 = vcmask 261120   ;;  %vm1092_vm2 = vcmask 64512  }
   0xc   : > { %6095 = vmatprep.subr.mxu0 %v508_v0  ;;  %v505_v3 = vld [vmem:[%s7840_s1 + $0x60] sm:$0xff]  ;;  %s6861_s13 = sshll.u32 %s7853_s22, 4  ;;  %v599_v4 = vld [vmem:[%s7841_s2 + $0x78] sm:$0xff]  ;;  %v598_v7 = vld [vmem:[%s7841_s2 + $0x70] sm:$0xff]  ;;  %vm1212_vm3 = vcmask 1041408   ;;  %vm1184_vm4 = vcmask 74752  }
   0xd   : > { %6096 = vmatpush3.msra.mxu0 %v508_v0  ;;  %s6867_s16 = scalar_lea.vmem %s7839_s0, %s6861_s13  ;;  %v504_v5 = vld [vmem:[%s7840_s1 + $0x58] sm:$0xff]  ;;  %6130 = vmatprep.subr.mxu1 %v599_v4  ;;  %v503_v8 = vld [vmem:[%s7840_s1 + $0x50] sm:$0xff]  ;;  %v597_v9 = vld [vmem:[%s7841_s2 + $0x68] sm:$0xff]  ;;  %s466_s28 = scalar_lea.vmem %s7845_s6, %s6861_s13  ;;  %vm1180_vm5 = vcmask 80896  }
   0xe   : > { %6097 = vmatprep.subr.mxu0 %v507_v1  ;;  %v6876_v6 = vld [vmem:[%s6867_s16] sm:$0xff]  ;;  %6131 = vmatpush3.msra.mxu1 %v599_v4  ;;  %v502_v10 = vld [vmem:[%s7840_s1 + $0x48] sm:$0xff]  ;;  %v595_v13 = vld [vmem:[%s7841_s2 + $0x58] sm:$0xff]  ;;  %s471_s24 = scalar_lea.vmem %s7846_s7, %s6861_s13  ;;  %s7172_s29 = scalar_lea.vmem %s7849_s10, %s6861_s13 }
   0xf   : > { %6098 = vmatpush3.msra.mxu0 %v507_v1  ;;  %6127 = vmatprep.mubr.f32.mxu0 %v6876_v6  ;;  %v596_v11 = vld [vmem:[%s7841_s2 + $0x60] sm:$0xff]  ;;  %v500_v14 = vld [vmem:[%s7840_s1 + $0x38] sm:$0xff]  ;;  %v594_v15 = vld [vmem:[%s7841_s2 + $0x50] sm:$0xff]  ;;  %s5822_s14 = sshll.u32 %s7853_s22, 8  ;;  %s6759_s22 = smov 112  }
  0x10   : > { %6099 = vmatprep.subr.mxu0 %v506_v2  ;;  %6132 = vmatprep.subr.mxu1 %v598_v7  ;;  %v501_v12 = vld [vmem:[%s7840_s1 + $0x40] sm:$0xff]  ;;  %v499_v16 = vld [vmem:[%s7840_s1 + $0x30] sm:$0xff]  ;;  %v593_v17 = vld [vmem:[%s7841_s2 + $0x48] sm:$0xff]  ;;  %s7194_s17 = scalar_lea.vmem %s7851_s12, %s5822_s14  ;;  %s6763_s14 = smov 80  }
  0x11   : > { %6100 = vmatpush3.msra.mxu0 %v506_v2  ;;  %6133 = vmatpush3.msra.mxu1 %v598_v7  ;;  %v498_v18 = vld [vmem:[%s7840_s1 + $0x28] sm:$0xff]  ;;  %v592_v19 = vld [vmem:[%s7841_s2 + $0x40] sm:$0xff]  ;;  %v591_v21 = vld [vmem:[%s7841_s2 + $0x38] sm:$0xff] }
  0x12   : > { %6101 = vmatprep.subr.mxu0 %v505_v3  ;;  %6134 = vmatprep.subr.mxu1 %v597_v9  ;;  %v497_v20 = vld [vmem:[%s7840_s1 + $0x20] sm:$0xff]  ;;  %v496_v22 = vld [vmem:[%s7840_s1 + $0x18] sm:$0xff]  ;;  %v590_v23 = vld [vmem:[%s7841_s2 + $0x30] sm:$0xff] }
  0x13   : > { %6102 = vmatpush3.msra.mxu0 %v505_v3  ;;  %6135 = vmatpush3.msra.mxu1 %v597_v9  ;;  %v495_v24 = vld [vmem:[%s7840_s1 + $0x10] sm:$0xff]  ;;  %v589_v25 = vld [vmem:[%s7841_s2 + $0x28] sm:$0xff]  ;;  %v588_v27 = vld [vmem:[%s7841_s2 + $0x20] sm:$0xff] }
  0x14   : > { %6103 = vmatprep.subr.mxu0 %v504_v5  ;;  %6136 = vmatprep.subr.mxu1 %v596_v11  ;;  %v494_v26 = vld [vmem:[%s7840_s1 + $0x8] sm:$0xff]  ;;  %v493_v28 = vld [vmem:[%s7840_s1] sm:$0xff]  ;;  %v587_v29 = vld [vmem:[%s7841_s2 + $0x18] sm:$0xff] }
  0x15   : > { %6104 = vmatpush3.msra.mxu0 %v504_v5  ;;  %6137 = vmatpush3.msra.mxu1 %v596_v11  ;;  %v6949_v30 = vld [vmem:[%s6867_s16 + $0x8] sm:$0x3]  ;;  %v690_v31 = vld [vmem:[%s7842_s3 + $0x78] sm:$0xff]  ;;  %v586_v32 = vld [vmem:[%s7841_s2 + $0x10] sm:$0xff] }
  0x16   : > { %6105 = vmatprep.subr.mxu0 %v503_v8  ;;  %6138 = vmatprep.subr.mxu1 %v595_v13  ;;  %v689_v33 = vld [vmem:[%s7842_s3 + $0x70] sm:$0xff]  ;;  %v585_v34 = vld [vmem:[%s7841_s2 + $0x8] sm:$0xff]  ;;  %v584_v36 = vld [vmem:[%s7841_s2] sm:$0xff] }
  0x17   : > { %6106 = vmatpush3.msra.mxu0 %v503_v8  ;;  %6139 = vmatpush3.msra.mxu1 %v595_v13  ;;  %v688_v35 = vld [vmem:[%s7842_s3 + $0x68] sm:$0xff]  ;;  %v687_v37 = vld [vmem:[%s7842_s3 + $0x60] sm:$0xff]  ;;  %v686_v38 = vld [vmem:[%s7842_s3 + $0x58] sm:$0xff] }
  0x18   : > { %6107 = vmatprep.subr.mxu0 %v502_v10  ;;  %6140 = vmatprep.subr.mxu1 %v594_v15  ;;  %v685_v39 = vld [vmem:[%s7842_s3 + $0x50] sm:$0xff]  ;;  %v684_v40 = vld [vmem:[%s7842_s3 + $0x48] sm:$0xff]  ;;  %v683_v41 = vld [vmem:[%s7842_s3 + $0x40] sm:$0xff] }
  0x19   : > { %6108 = vmatpush3.msra.mxu0 %v502_v10  ;;  %6141 = vmatpush3.msra.mxu1 %v594_v15  ;;  %v682_v42 = vld [vmem:[%s7842_s3 + $0x38] sm:$0xff]  ;;  %v681_v43 = vld [vmem:[%s7842_s3 + $0x30] sm:$0xff]  ;;  %v680_v44 = vld [vmem:[%s7842_s3 + $0x28] sm:$0xff] }
  0x1a   : > { %6109 = vmatprep.subr.mxu0 %v501_v12  ;;  %6142 = vmatprep.subr.mxu1 %v593_v17  ;;  %v679_v45 = vld [vmem:[%s7842_s3 + $0x20] sm:$0xff]  ;;  %v678_v46 = vld [vmem:[%s7842_s3 + $0x18] sm:$0xff]  ;;  %v677_v47 = vld [vmem:[%s7842_s3 + $0x10] sm:$0xff] }
  0x1b   : > { %6110 = vmatpush3.msra.mxu0 %v501_v12  ;;  %6143 = vmatpush3.msra.mxu1 %v593_v17  ;;  %v676_v48 = vld [vmem:[%s7842_s3 + $0x8] sm:$0xff]  ;;  %v675_v49 = vld [vmem:[%s7842_s3] sm:$0xff]  ;;  %v781_v50 = vld [vmem:[%s7843_s4 + $0x78] sm:$0xff] }
  0x1c   : > { %6111 = vmatprep.subr.mxu0 %v500_v14  ;;  %6144 = vmatprep.subr.mxu1 %v592_v19  ;;  %v780_v51 = vld [vmem:[%s7843_s4 + $0x70] sm:$0xff]  ;;  %v779_v52 = vld [vmem:[%s7843_s4 + $0x68] sm:$0xff]  ;;  %v778_v53 = vld [vmem:[%s7843_s4 + $0x60] sm:$0xff] }
  0x1d   : > { %6112 = vmatpush3.msra.mxu0 %v500_v14  ;;  %6145 = vmatpush3.msra.mxu1 %v592_v19  ;;  %v777_v54 = vld [vmem:[%s7843_s4 + $0x58] sm:$0xff]  ;;  %v776_v55 = vld [vmem:[%s7843_s4 + $0x50] sm:$0xff]  ;;  %v775_v56 = vld [vmem:[%s7843_s4 + $0x48] sm:$0xff] }
  0x1e   : > { %6113 = vmatprep.subr.mxu0 %v499_v16  ;;  %6146 = vmatprep.subr.mxu1 %v591_v21  ;;  %v774_v57 = vld [vmem:[%s7843_s4 + $0x40] sm:$0xff]  ;;  %v773_v58 = vld [vmem:[%s7843_s4 + $0x38] sm:$0xff]  ;;  %v772_v59 = vld [vmem:[%s7843_s4 + $0x30] sm:$0xff] }
  0x1f   : > { %6114 = vmatpush3.msra.mxu0 %v499_v16  ;;  %6147 = vmatpush3.msra.mxu1 %v591_v21  ;;  %v771_v60 = vld [vmem:[%s7843_s4 + $0x28] sm:$0xff]  ;;  %v770_v61 = vld [vmem:[%s7843_s4 + $0x20] sm:$0xff]  ;;  %v769_v62 = vld [vmem:[%s7843_s4 + $0x18] sm:$0xff] }
  0x20   : > { %6115 = vmatprep.subr.mxu0 %v498_v18  ;;  %6148 = vmatprep.subr.mxu1 %v590_v23  ;;  %v768_v63 = vld [vmem:[%s7843_s4 + $0x10] sm:$0xff]  ;;  %v767_v0 = vld [vmem:[%s7843_s4 + $0x8] sm:$0xff]  ;;  %v766_v1 = vld [vmem:[%s7843_s4] sm:$0xff] }
  0x21   : > { %6116 = vmatpush3.msra.mxu0 %v498_v18  ;;  %6149 = vmatpush3.msra.mxu1 %v590_v23  ;;  %v906_v2 = vld [vmem:[%s7848_s9 + $0x18] sm:$0xff]  ;;  %v905_v3 = vld [vmem:[%s7848_s9 + $0x10] sm:$0xff]  ;;  %v904_v4 = vld [vmem:[%s7848_s9 + $0x8] sm:$0xff] }
  0x22   : > { %6117 = vmatprep.subr.mxu0 %v497_v20  ;;  %6150 = vmatprep.subr.mxu1 %v589_v25  ;;  %v903_v5 = vld [vmem:[%s7848_s9] sm:$0xff]  ;;  %v899_v7 = vld [vmem:[%s7847_s8 + $0x70] sm:$0xff]  ;;  %v898_v8 = vld [vmem:[%s7847_s8 + $0x68] sm:$0xff] }
  0x23   : > { %6118 = vmatpush3.msra.mxu0 %v497_v20  ;;  %6151 = vmatpush3.msra.mxu1 %v589_v25  ;;  %v897_v9 = vld [vmem:[%s7847_s8 + $0x60] sm:$0xff]  ;;  %v896_v10 = vld [vmem:[%s7847_s8 + $0x58] sm:$0xff]  ;;  %v895_v11 = vld [vmem:[%s7847_s8 + $0x50] sm:$0xff] }
  0x24   : > { %6119 = vmatprep.subr.mxu0 %v496_v22  ;;  %6152 = vmatprep.subr.mxu1 %v588_v27  ;;  %v894_v12 = vld [vmem:[%s7847_s8 + $0x48] sm:$0xff]  ;;  %v893_v13 = vld [vmem:[%s7847_s8 + $0x40] sm:$0xff]  ;;  %v892_v14 = vld [vmem:[%s7847_s8 + $0x38] sm:$0xff] }
  0x25   : > { %6120 = vmatpush3.msra.mxu0 %v496_v22  ;;  %6153 = vmatpush3.msra.mxu1 %v588_v27  ;;  %v891_v15 = vld [vmem:[%s7847_s8 + $0x30] sm:$0xff]  ;;  %v890_v16 = vld [vmem:[%s7847_s8 + $0x28] sm:$0xff]  ;;  %v889_v17 = vld [vmem:[%s7847_s8 + $0x20] sm:$0xff] }
  0x26   : > { %6121 = vmatprep.subr.mxu0 %v495_v24  ;;  %6154 = vmatprep.subr.mxu1 %v587_v29  ;;  %v888_v18 = vld [vmem:[%s7847_s8 + $0x18] sm:$0xff]  ;;  %v887_v19 = vld [vmem:[%s7847_s8 + $0x10] sm:$0xff]  ;;  %v886_v20 = vld [vmem:[%s7847_s8 + $0x8] sm:$0xff] }
  0x27   : > { %6122 = vmatpush3.msra.mxu0 %v495_v24  ;;  %6155 = vmatpush3.msra.mxu1 %v587_v29  ;;  %v885_v21 = vld [vmem:[%s7847_s8] sm:$0xff]  ;;  %v490_v22 = vld [vmem:[%s466_s28 + $0x8] sm:$0x3] }
  0x28   : > { %6123 = vmatprep.subr.mxu0 %v494_v26  ;;  %6156 = vmatprep.subr.mxu1 %v586_v32  ;;  %v489_v24 = vld [vmem:[%s466_s28] sm:$0xff]  ;;  %v492_v29 = vld [vmem:[%s471_s24 + $0x8] sm:$0x3] }
  0x29   : > { %6124 = vmatpush3.msra.mxu0 %v494_v26  ;;  %6157 = vmatpush3.msra.mxu1 %v586_v32 }
  0x2a   : > { %6125 = vmatprep.subr.mxu0 %v493_v28  ;;  %6158 = vmatprep.subr.mxu1 %v585_v34 }
  0x2b   : > { %6126 = vmatpush3.msra.mxu0 %v493_v28  ;;  %6159 = vmatpush3.msra.mxu1 %v585_v34 }
  0x2c   : > { %6128 = vmatmul.mubr.f32.vlgmr.msra.gmra.mxu0 %v6949_v30  ;;  %6165 = vmatprep.subr.mxu0 %v690_v31 }
  0x2d   : > { %6166 = vmatpush3.msra.mxu0 %v690_v31  ;;  %6160 = vmatprep.subr.mxu1 %v584_v36 }
  0x2e   : > { %6167 = vmatprep.subr.mxu0 %v689_v33  ;;  %6161 = vmatpush3.msra.mxu1 %v584_v36 }
  0x2f   : > { %6168 = vmatpush3.msra.mxu0 %v689_v33  ;;  %6162 = vmatprep.mubr.f32.mxu1 %v6876_v6  ;;  %v491_v33 = vld [vmem:[%s471_s24] sm:$0xff]  ;;  %s6762_s24 = smov 88  }
  0x30   : > { %6169 = vmatprep.subr.mxu0 %v688_v35  ;;  %6197 = vmatprep.mubr.f32.mxu0 %v6876_v6 }
  0x31   : > { %6170 = vmatpush3.msra.mxu0 %v688_v35  ;;  %6163 = vmatmul.mubr.f32.vlgmr.msra.gmra.mxu1 %v6949_v30 }
  0x32   : > { %6171 = vmatprep.subr.mxu0 %v687_v37  ;;  %6232 = vmatprep.mubr.f32.mxu1 %v6876_v6  ;;  %v900_v6 = vld [vmem:[%s7847_s8 + $0x78] sm:$0xff] }
  0x33   : > { %6172 = vmatpush3.msra.mxu0 %v687_v37  ;;  %6200 = vmatprep.subr.mxu1 %v781_v50 }
  0x34   : > { %6173 = vmatprep.subr.mxu0 %v686_v38  ;;  %6201 = vmatpush3.msra.mxu1 %v781_v50 }
  0x35   : > { %6174 = vmatpush3.msra.mxu0 %v686_v38  ;;  %6202 = vmatprep.subr.mxu1 %v780_v51 }
  0x36   : > { %6175 = vmatprep.subr.mxu0 %v685_v39  ;;  %6203 = vmatpush3.msra.mxu1 %v780_v51 }
  0x37   : > { %6176 = vmatpush3.msra.mxu0 %v685_v39  ;;  %6204 = vmatprep.subr.mxu1 %v779_v52 }
  0x38   : > { %6177 = vmatprep.subr.mxu0 %v684_v40  ;;  %6205 = vmatpush3.msra.mxu1 %v779_v52  ;;  %v1077_v52 = vld [vmem:[%s7844_s5 + $0x8] sm:$0xff] }
  0x39   : > { %6178 = vmatpush3.msra.mxu0 %v684_v40  ;;  %6206 = vmatprep.subr.mxu1 %v778_v53 }
  0x3a   : > { %6179 = vmatprep.subr.mxu0 %v683_v41  ;;  %6207 = vmatpush3.msra.mxu1 %v778_v53 }
  0x3b   : > { %6180 = vmatpush3.msra.mxu0 %v683_v41  ;;  %6208 = vmatprep.subr.mxu1 %v777_v54 }
  0x3c   : > { %6181 = vmatprep.subr.mxu0 %v682_v42  ;;  %6209 = vmatpush3.msra.mxu1 %v777_v54 }
  0x3d   : > { %6182 = vmatpush3.msra.mxu0 %v682_v42  ;;  %6210 = vmatprep.subr.mxu1 %v776_v55  ;;  %v857_v42 = vlaneseq }
  0x3e   : > { %6183 = vmatprep.subr.mxu0 %v681_v43  ;;  %6211 = vmatpush3.msra.mxu1 %v776_v55 }
  0x3f   : > { %6184 = vmatpush3.msra.mxu0 %v681_v43  ;;  %6212 = vmatprep.subr.mxu1 %v775_v56  ;;  %v858_v43 = vand.u32 127, %v857_v42 }
  0x40   : > { %6185 = vmatprep.subr.mxu0 %v680_v44  ;;  %6213 = vmatpush3.msra.mxu1 %v775_v56 }
  0x41   : > { %6186 = vmatpush3.msra.mxu0 %v680_v44  ;;  %6214 = vmatprep.subr.mxu1 %v774_v57  ;;  %v859_v44 = vand.u32 1, %v858_v43 }
  0x42   : > { %6187 = vmatprep.subr.mxu0 %v679_v45  ;;  %6215 = vmatpush3.msra.mxu1 %v774_v57 }
  0x43   : > { %6188 = vmatpush3.msra.mxu0 %v679_v45  ;;  %6216 = vmatprep.subr.mxu1 %v773_v58  ;;  %vm860_vm1 = vcmp.eq.s32.totalorder %v859_v44, 0 }
  0x44   : > { %6189 = vmatprep.subr.mxu0 %v678_v46  ;;  %6217 = vmatpush3.msra.mxu1 %v773_v58 }
  0x45   : > { %6190 = vmatpush3.msra.mxu0 %v678_v46  ;;  %6218 = vmatprep.subr.mxu1 %v772_v59 }
  0x46   : > { %6191 = vmatprep.subr.mxu0 %v677_v47  ;;  %6219 = vmatpush3.msra.mxu1 %v772_v59 }
  0x47   : > { %6192 = vmatpush3.msra.mxu0 %v677_v47  ;;  %6220 = vmatprep.subr.mxu1 %v771_v60 }
  0x48   : > { %6193 = vmatprep.subr.mxu0 %v676_v48  ;;  %6221 = vmatpush3.msra.mxu1 %v771_v60 }
  0x49   : > { %6194 = vmatpush3.msra.mxu0 %v676_v48  ;;  %6222 = vmatprep.subr.mxu1 %v770_v61 }
  0x4a   : > { %6195 = vmatprep.subr.mxu0 %v675_v49  ;;  %6223 = vmatpush3.msra.mxu1 %v770_v61 }
  0x4b   : > { %6196 = vmatpush3.msra.mxu0 %v675_v49  ;;  %6224 = vmatprep.subr.mxu1 %v769_v62 }
  0x4c   : > { %6198 = vmatmul.mubr.f32.vlgmr.msra.gmra.mxu0 %v6949_v30  ;;  %6225 = vmatpush3.msra.mxu1 %v769_v62 }
  0x4d   : > { %6226 = vmatprep.subr.mxu1 %v768_v63  ;;  %6235 = vmatprep.subr.mxu0 %v900_v6 }
  0x4e   : > { %6227 = vmatpush3.msra.mxu1 %v768_v63  ;;  %6236 = vmatpush3.msra.mxu0 %v900_v6 }
  0x4f   : > { %6228 = vmatprep.subr.mxu1 %v767_v0  ;;  %6237 = vmatprep.subr.mxu0 %v899_v7 }
  0x50   : > { %6229 = vmatpush3.msra.mxu1 %v767_v0  ;;  %6238 = vmatpush3.msra.mxu0 %v899_v7 }
  0x51   : > { %6230 = vmatprep.subr.mxu1 %v766_v1  ;;  %6239 = vmatprep.subr.mxu0 %v898_v8 }
  0x52   : > { %6231 = vmatpush3.msra.mxu1 %v766_v1  ;;  %6240 = vmatpush3.msra.mxu0 %v898_v8 }
  0x53   : > { %6270 = vmatprep.subr.mxu1 %v906_v2  ;;  %6233 = vmatmul.mubr.f32.vlgmr.msra.gmra.mxu1 %v6949_v30 }
  0x54   : > { %6271 = vmatpush3.msra.mxu1 %v906_v2  ;;  %6241 = vmatprep.subr.mxu0 %v897_v9 }
  0x55   : > { %6272 = vmatprep.subr.mxu1 %v905_v3  ;;  %6242 = vmatpush3.msra.mxu0 %v897_v9 }
  0x56   : > { %6273 = vmatpush3.msra.mxu1 %v905_v3  ;;  %6243 = vmatprep.subr.mxu0 %v896_v10 }
  0x57   : > { %6274 = vmatprep.subr.mxu1 %v904_v4  ;;  %6244 = vmatpush3.msra.mxu0 %v896_v10 }
  0x58   : > { %6275 = vmatpush3.msra.mxu1 %v904_v4  ;;  %6245 = vmatprep.subr.mxu0 %v895_v11 }
  0x59   : > { %6276 = vmatprep.subr.mxu1 %v903_v5  ;;  %6246 = vmatpush3.msra.mxu0 %v895_v11 }
  0x5a   : > { %6277 = vmatpush3.msra.mxu1 %v903_v5  ;;  %6247 = vmatprep.subr.mxu0 %v894_v12 }
  0x5b   : > { %6248 = vmatpush3.msra.mxu0 %v894_v12 }
  0x5c   : > { %6249 = vmatprep.subr.mxu0 %v893_v13 }
  0x5d   : > { %6250 = vmatpush3.msra.mxu0 %v893_v13 }
  0x5e   : > { %6251 = vmatprep.subr.mxu0 %v892_v14 }
  0x5f   : > { %6252 = vmatpush3.msra.mxu0 %v892_v14  ;;  %v7175_v14 = vld [vmem:[%s7172_s29 + $0x8] sm:$0x3] }
  0x60   : > { %6253 = vmatprep.subr.mxu0 %v891_v15 }
  0x61   : > { %6254 = vmatpush3.msra.mxu0 %v891_v15  ;;  %v7178_v15 = vld [vmem:[%s7172_s29] sm:$0xff] }
  0x62   : > { %6255 = vmatprep.subr.mxu0 %v890_v16 }
  0x63   : > { %6256 = vmatpush3.msra.mxu0 %v890_v16 }
  0x64   : > { %6257 = vmatprep.subr.mxu0 %v889_v17 }
  0x65   : > { %6258 = vmatpush3.msra.mxu0 %v889_v17 }
  0x66   : > { %6259 = vmatprep.subr.mxu0 %v888_v18 }
  0x67   : > { %6260 = vmatpush3.msra.mxu0 %v888_v18 }
  0x68   : > { %6261 = vmatprep.subr.mxu0 %v887_v19 }
  0x69   : > { %6262 = vmatpush3.msra.mxu0 %v887_v19 }
  0x6a   : > { %6263 = vmatprep.subr.mxu0 %v886_v20 }
  0x6b   : > { %6264 = vmatpush3.msra.mxu0 %v886_v20 }
  0x6c   : > { %6265 = vmatprep.subr.mxu0 %v885_v21 }
  0x6d   : > { %6266 = vmatpush3.msra.mxu0 %v885_v21 }
  0x6e   : > { %6309 = vmatprep.subr.mxu0 %v1077_v52 }
  0xec   : > { %v6129_v23 = vpop.f32.mrf.mxu0 }
  0xed   : > { %863 = vrot.lane.b32.xlu1 %v6129_v23, %s6756_s18  ;;  %v872_v25 = vmul.f32 %v6129_v23, %v490_v22 }
  0xee   : > { %v575_v26 = vpop.f32.mrf.mxu0 }
  0xef   : > { %861 = vrot.lane.b32.xlu0 %v575_v26, %s6756_s18  ;;  %v871_v27 = vmul.f32 %v575_v26, %v489_v24  ;;  %s6760_s18 = smov 104  }
  0xf1   : > { %867 = vrot.lane.b32.xlu1 %v6129_v23, %s6757_s19  ;;  %v6164_v28 = vpop.f32.mrf.mxu1 }
  0xf2   : > { %v878_v31 = vmul.f32 %v6164_v28, %v490_v22 }
  0xf3   : > { %865 = vrot.lane.b32.xlu0 %v575_v26, %s6757_s19  ;;  %v666_v30 = vpop.f32.mrf.mxu1  ;;  %s6769_s19 = smov 32  }
  0xf4   : > { %v877_v35 = vmul.f32 %v666_v30, %v489_v24 }
 0x10c   : > { %v6199_v32 = vpop.f32.mrf.mxu0 }
 0x10d   : > { %v880_v34 = vmul.f32 %v6199_v32, %v492_v29 }
 0x10e   : > { %v757_v36 = vpop.f32.mrf.mxu0 }
 0x10f   : > { %v882_v37 = vadd.f32 %v880_v34, %v878_v31  ;;  %v879_v38 = vmul.f32 %v757_v36, %v491_v33 }
 0x111   : > { %v881_v39 = vadd.f32 %v879_v38, %v877_v35  ;;  %v902_v40 = vmul.f32 %v882_v37, %v882_v37 }
 0x113   : > { %v901_v41 = vmul.f32 %v881_v39, %v881_v39  ;;  %v7134_v58 = vpop.f32.mrf.mxu1 }
 0x115   : > { %6278 = vmatprep.mubr.msk.f32.mxu1 %vm986_vm0, %v901_v41  ;;  %v7136_v59 = vpop.f32.mrf.mxu1 }
 0x116   : > { %6279 = vmatmul.mubr.msk.f32.vlgmr.msra.gmra.mxu1 %vm986_vm0, %v902_v40 }
 0x15f   : > { %v864_v45 = vpop.permute.xlu1 %863 }
 0x161   : > { %v862_v46 = vpop.permute.xlu0 %861 }
 0x163   : > { %v868_v47 = vpop.permute.xlu1 %867 }
 0x164   : > { %v870_v48 = vsel %vm860_vm1, %v864_v45, %v868_v47 }
 0x165   : > { %v874_v49 = vmul.f32 %v870_v48, %v492_v29  ;;  %v866_v50 = vpop.permute.xlu0 %865 }
 0x166   : > { %v869_v51 = vsel %vm860_vm1, %v862_v46, %v866_v50 }
 0x167   : > { %v873_v53 = vmul.f32 %v869_v51, %v491_v33  ;;  %v876_v54 = vadd.f32 %v874_v49, %v872_v25 }
 0x169   : > { %v875_v55 = vadd.f32 %v873_v53, %v871_v27  ;;  %v884_v57 = vmul.f32 %v876_v54, %v876_v54 }
 0x16b   : > { %v883_v56 = vmul.f32 %v875_v55, %v875_v55 }
 0x16d   : > { %6267 = vmatprep.mubr.f32.mxu0 %v883_v56 }
 0x16e   : > { %6268 = vmatmul.mubr.f32.vlgmr.msra.gmra.mxu0 %v884_v57 }
 0x16f   : > { %6310 = vmatpush3.msra.mxu0 %v1077_v52 }
 0x1d6   : > { %v6280_v60 = vpop.f32.mrf.mxu1 }
 0x1d7   : > { %v1065_v61 = vadd.f32 1e-06, %v6280_v60  ;;  %v1076_v60 = vld [vmem:[%s7844_s5] sm:$0xff] }
 0x1d8   : > { %v1059_v62 = vpop.f32.mrf.mxu1 }
 0x1d9   : > { %6610 = vrsqrt.f32 %v1065_v61  ;;  %v1060_v63 = vadd.f32 1e-06, %v1059_v62 }
 0x1db   : > { %6612 = vrsqrt.f32 %v1060_v63 }
 0x1e6   : > { %v6611_v0 = vpop.eup %6610 }
 0x1e7   : > { %v7138_v1 = vmul.f32 %v6611_v0, %v882_v37 }
 0x1e8   : > { %v6613_v2 = vpop.eup %6612 }
 0x1e9   : > { %v7140_v3 = vmul.f32 %v6613_v2, %v881_v39  ;;  %6281 = vmatprep.subr.msk.mxu1 %vm1092_vm2, %v7138_v1  ;;  %6319 = vmatprep.subr.msk.mxu0 %vm1092_vm2, %v7138_v1 }
 0x1ea   : > { %6282 = vmatpush3.xpose.msk.msra.mxu1 %vm1092_vm2, %v7138_v1 }
 0x1eb   : > { %6283 = vmatprep.subr.msk.mxu1 %vm1092_vm2, %v7140_v3 }
 0x1ee   : > { %6284 = vmatpush3.xpose.msk.msra.mxu1 %vm1092_vm2, %v7140_v3 }
 0x1ef   : > { %6288 = vmatprep.subr.msk.mxu1 %vm1212_vm3, %v7134_v58 }
 0x22e   : > { %v6269_v4 = vpop.f32.mrf.mxu0 }
 0x22f   : > { %v979_v5 = vadd.f32 1e-06, %v6269_v4 }
 0x230   : > { %v973_v6 = vpop.f32.mrf.mxu0 }
 0x231   : > { %6614 = vrsqrt.f32 %v979_v5  ;;  %v974_v7 = vadd.f32 1e-06, %v973_v6 }
 0x233   : > { %6616 = vrsqrt.f32 %v974_v7 }
 0x23e   : > { %v6615_v8 = vpop.eup %6614 }
 0x23f   : > { %v985_v10 = vmul.f32 %v6615_v8, %v876_v54 }
 0x240   : > { %v6617_v9 = vpop.eup %6616 }
 0x241   : > { %v984_v11 = vmul.f32 %v6617_v9, %v875_v55  ;;  %v7156_v13 = vmul.f32 0.35355338, %v985_v10 }
 0x243   : > { %v7154_v12 = vmul.f32 0.35355338, %v984_v11 }
 0x245   : > { %6285 = vmatprep.mubr.msk.f32.mxu1 %vm1092_vm2, %v7154_v12 }
 0x246   : > { %6286 = vmatmul.mubr.msk.f32.vlgmr.msra.gmra.mxu1 %vm1092_vm2, %v7156_v13 }
 0x247   : > { %6289 = vmatpush3.msk.msra.mxu1 %vm1212_vm3, %v7134_v58 }
 0x248   : > { %6290 = vmatprep.subr.mxu1 %v7136_v59 }
 0x249   : > { %6291 = vmatpush3.msra.mxu1 %v7136_v59 }
 0x24a   : > { %6295 = vmatprep.subr.msk.mxu1 %vm1092_vm2, %v7138_v1 }
 0x306   : > { %v6287_v16 = vpop.f32.mrf.mxu1 }
 0x307   : > { %v1177_v17 = vadd.f32 %v6287_v16, %v7175_v14 }
 0x308   : > { %v1171_v18 = vpop.f32.mrf.mxu1 }
 0x309   : > { %v1172_v19 = vadd.f32 %v1171_v18, %v7178_v15  ;;  %v1185_v20 = vsel %vm1184_vm4, %v1177_v17, -inf }
 0x30a   : > { %1186 = vmax.xlane.f32.xlu1 %v1185_v20 }
 0x30b   : > { %v1181_v21 = vsel %vm1180_vm5, %v1172_v19, -inf }
 0x30c   : > { %1182 = vmax.xlane.f32.xlu0 %v1181_v21 }
 0x31b   : > { %1291 = vrot.lane.b32.xlu1 %v7154_v12, %s6758_s30 }
 0x393   : > { %v1187_v22 = vpop.xlane.xlu1 %1186 }
 0x394   : > { %v1189_v23 = vsub.f32 %v1177_v17, %v1187_v22 }
 0x395   : > { %v1183_v24 = vpop.xlane.xlu0 %1182 }
 0x396   : > { %v1188_v25 = vsub.f32 %v1172_v19, %v1183_v24  ;;  %v1192_v26 = vmul.f32 1.442695, %v1189_v23 }
 0x397   : > { %v1292_v38 = vpop.permute.xlu1 %1291 }
 0x398   : > { %v1190_v27 = vmul.f32 1.442695, %v1188_v25 }
 0x39a   : > { %6618 = vpow2.f32 %v1190_v27 }
 0x39b   : > { %6620 = vpow2.f32 %v1192_v26 }
 0x3a7   : > { %v6619_v28 = vpop.eup %6618 }
 0x3a8   : > { %v1194_v29 = vsel %vm1180_vm5, %v6619_v28, 0.0  ;;  %v6621_v30 = vpop.eup %6620 }
 0x3a9   : > { %1195 = vadd.xlane.f32.xlu0 %v1194_v29  ;;  %v1197_v31 = vsel %vm1184_vm4, %v6621_v30, 0.0 }
 0x3ad   : > { %1198 = vadd.xlane.f32.xlu0 %v1197_v31 }
 0x3c3   : > { %1293 = vrot.lane.b32.xlu0 %v7156_v13, %s6758_s30 }
 0x432   : > { %v1196_v32 = vpop.xlane.xlu0 %1195 }
 0x433   : > { %6622 = vrcp.f32 %v1196_v32 }
 0x436   : > { %v1199_v33 = vpop.xlane.xlu0 %1198 }
 0x437   : > { %6624 = vrcp.f32 %v1199_v33 }
 0x43a   : > { %v1294_v39 = vpop.permute.xlu0 %1293 }
 0x440   : > { %v6623_v34 = vpop.eup %6622 }
 0x441   : > { %v1202_v35 = vmul.f32 %v6623_v34, %v6619_v28 }
 0x443   : > { %1204 = vst.msk [vmem:[%s7194_s17] sm:$0xff] %vm1180_vm5, %v1202_v35  ;;  %6292 = vmatprep.mubr.msk.f32.mxu1 %vm1180_vm5, %v1202_v35 }
 0x444   : > { %v6625_v36 = vpop.eup %6624 }
 0x445   : > { %v1203_v37 = vmul.f32 %v6625_v36, %v6621_v30 }
 0x447   : > { %1205 = vst.msk [vmem:[%s7194_s17 + $0x8] sm:$0x3] %vm1184_vm4, %v1203_v37  ;;  %6293 = vmatmul.mubr.msk.f32.vlgmr.msra.gmra.mxu1 %vm1180_vm5, %v1203_v37 }
 0x448   : > { %6296 = vmatpush3.xpose.msk.msra.mxu1 %vm1092_vm2, %v7138_v1  ;;  %6299 = vmatprep.mubr.msk.f32.mxu1 %vm1092_vm2, %v1292_v38  ;;  %v1078_v38 = vld [vmem:[%s7844_s5 + $0x10] sm:$0xff] }
 0x449   : > { %6297 = vmatprep.subr.msk.mxu1 %vm1092_vm2, %v7140_v3 }
 0x44c   : > { %6298 = vmatpush3.xpose.msk.msra.mxu1 %vm1092_vm2, %v7140_v3 }
 0x44d   : > { %6302 = vmatprep.subr.msk.mxu1 %vm1212_vm3, %v7134_v58 }
 0x44f   : > { %6300 = vmatmul.mubr.msk.f32.vlgmr.msra.gmra.mxu1 %vm1092_vm2, %v1294_v39 }
 0x450   : > { %6303 = vmatpush3.msk.msra.mxu1 %vm1212_vm3, %v7134_v58 }
 0x451   : > { %6304 = vmatprep.subr.mxu1 %v7136_v59 }
 0x452   : > { %6305 = vmatpush3.msra.mxu1 %v7136_v59 }
 0x453   : > { %6314 = vmatprep.subr.mxu1 %v1076_v60 }
 0x507   : > { %v6294_v40 = vpop.f32.mrf.mxu1 }
 0x509   : > { %v1282_v41 = vpop.f32.mrf.mxu1 }
 0x50f   : > { %v6301_v42 = vpop.f32.mrf.mxu1 }
 0x510   : > { %v1371_v43 = vadd.f32 %v6301_v42, %v7175_v14 }
 0x511   : > { %v1365_v44 = vpop.f32.mrf.mxu1 }
 0x512   : > { %v1366_v45 = vadd.f32 %v1365_v44, %v7178_v15  ;;  %v1377_v46 = vsel %vm1184_vm4, %v1371_v43, -inf }
 0x513   : > { %1378 = vmax.xlane.f32.xlu0 %v1377_v46 }
 0x514   : > { %v1374_v47 = vsel %vm1180_vm5, %v1366_v45, -inf }
 0x515   : > { %1375 = vmax.xlane.f32.xlu1 %v1374_v47 }
 0x59c   : > { %v1379_v48 = vpop.xlane.xlu0 %1378 }
 0x59d   : > { %v1381_v49 = vsub.f32 %v1371_v43, %v1379_v48 }
 0x59e   : > { %v1376_v50 = vpop.xlane.xlu1 %1375 }
 0x59f   : > { %v1384_v51 = vmul.f32 1.442695, %v1381_v49  ;;  %v1380_v52 = vsub.f32 %v1366_v45, %v1376_v50 }
 0x5a1   : > { %6626 = vpow2.f32 %v1384_v51  ;;  %v1382_v53 = vmul.f32 1.442695, %v1380_v52 }
 0x5a3   : > { %6628 = vpow2.f32 %v1382_v53 }
 0x5ae   : > { %v6627_v54 = vpop.eup %6626 }
 0x5af   : > { %v1389_v55 = vsel %vm1184_vm4, %v6627_v54, 0.0 }
 0x5b0   : > { %v6629_v56 = vpop.eup %6628  ;;  %1390 = vadd.xlane.f32.xlu0 %v1389_v55 }
 0x5b1   : > { %v1386_v57 = vsel %vm1180_vm5, %v6629_v56, 0.0 }
 0x5b2   : > { %1387 = vadd.xlane.f32.xlu1 %v1386_v57 }
 0x5c3   : > { %1642 = vrot.lane.b32.xlu1 %v7154_v12, %s6759_s22 }
 0x5c6   : > { %1644 = vrot.lane.b32.xlu0 %v7156_v13, %s6759_s22 }
 0x5c7   : > { %1914 = vrot.lane.b32.xlu1 %v7154_v12, %s6760_s18 }
 0x5cb   : > { %1916 = vrot.lane.b32.xlu1 %v7156_v13, %s6760_s18 }
 0x639   : > { %v1391_v61 = vpop.xlane.xlu0 %1390 }
 0x63a   : > { %6630 = vrcp.f32 %v1391_v61 }
 0x63b   : > { %v1388_v62 = vpop.xlane.xlu1 %1387 }
 0x63c   : > { %6632 = vrcp.f32 %v1388_v62 }
 0x63d   : > { %v1645_v8 = vpop.permute.xlu0 %1644 }
 0x63f   : > { %v1643_v7 = vpop.permute.xlu1 %1642 }
 0x643   : > { %v1915_v9 = vpop.permute.xlu1 %1914 }
 0x647   : > { %v6631_v63 = vpop.eup %6630  ;;  %v1917_v10 = vpop.permute.xlu1 %1916 }
 0x648   : > { %v1395_v0 = vmul.f32 %v6631_v63, %v6627_v54 }
 0x649   : > { %v6633_v2 = vpop.eup %6632 }
 0x64a   : > { %v1394_v4 = vmul.f32 %v6633_v2, %v6629_v56  ;;  %5653 = vst.msk [vmem:[%s7194_s17 + $0x18] sm:$0x3] %vm1184_vm4, %v1395_v0 }
 0x64c   : > { %5652 = vst.msk [vmem:[%s7194_s17 + $0x10] sm:$0xff] %vm1180_vm5, %v1394_v4  ;;  %6306 = vmatprep.mubr.msk.f32.mxu1 %vm1180_vm5, %v1394_v4 }
 0x64d   : > { %6307 = vmatmul.mubr.msk.f32.vlgmr.msra.gmra.mxu1 %vm1180_vm5, %v1395_v0 }
 0x64e   : > { %6315 = vmatpush3.msra.mxu1 %v1076_v60  ;;  %6316 = vmatprep.mubr.msk.f32.mxu1 %vm1092_vm2, %v1282_v41 }
 0x64f   : > { %6326 = vmatprep.subr.msk.mxu1 %vm1212_vm3, %v7134_v58 }
 0x651   : > { %6317 = vmatmul.mubr.msk.f32.vlgmr.msra.gmra.mxu1 %vm1092_vm2, %v6294_v40 }
 0x652   : > { %6327 = vmatpush3.msk.msra.mxu1 %vm1212_vm3, %v7134_v58 }
 0x653   : > { %6328 = vmatprep.subr.mxu1 %v7136_v59 }
 0x654   : > { %6329 = vmatpush3.msra.mxu1 %v7136_v59 }
 0x655   : > { %6333 = vmatprep.subr.mxu1 %v1078_v38 }
 0x70d   : > { %v6308_v5 = vpop.f32.mrf.mxu1 }
 0x70f   : > { %v1471_v6 = vpop.f32.mrf.mxu1 }
 0x710   : > { %6311 = vmatprep.mubr.msk.f32.mxu0 %vm1092_vm2, %v1471_v6 }
 0x711   : > { %6312 = vmatmul.mubr.msk.f32.vlgmr.msra.gmra.mxu0 %vm1092_vm2, %v6308_v5  ;;  %v6318_v2 = vpop.f32.mrf.mxu1 }
 0x712   : > { %6320 = vmatpush3.xpose.msk.msra.mxu0 %vm1092_vm2, %v7138_v1  ;;  %6323 = vmatprep.mubr.msk.f32.mxu0 %vm1092_vm2, %v1643_v7 }
 0x713   : > { %6321 = vmatprep.subr.msk.mxu0 %vm1092_vm2, %v7140_v3 }
 0x716   : > { %6322 = vmatpush3.xpose.msk.msra.mxu0 %vm1092_vm2, %v7140_v3 }
 0x717   : > { %6338 = vmatprep.subr.msk.mxu0 %vm1092_vm2, %v7138_v1 }
 0x719   : > { %6324 = vmatmul.mubr.msk.f32.vlgmr.msra.gmra.mxu0 %vm1092_vm2, %v1645_v8  ;;  %v1633_v8 = vpop.f32.mrf.mxu1 }
 0x71a   : > { %6339 = vmatpush3.xpose.msk.msra.mxu0 %vm1092_vm2, %v7138_v1  ;;  %6342 = vmatprep.mubr.msk.f32.mxu0 %vm1092_vm2, %v1915_v9 }
 0x71b   : > { %6340 = vmatprep.subr.msk.mxu0 %vm1092_vm2, %v7140_v3 }
 0x71e   : > { %6341 = vmatpush3.xpose.msk.msra.mxu0 %vm1092_vm2, %v7140_v3 }
 0x721   : > { %6343 = vmatmul.mubr.msk.f32.vlgmr.msra.gmra.mxu0 %vm1092_vm2, %v1917_v10 }
 0x7d1   : > { %v7267_v11 = vpop.f32.mrf.mxu0 }
 0x7d3   : > { %v7269_v16 = vpop.f32.mrf.mxu0 }
 0x7d9   : > { %v6325_v17 = vpop.f32.mrf.mxu0 }
 0x7da   : > { %v1722_v18 = vadd.f32 %v6325_v17, %v7175_v14 }
 0x7db   : > { %v1716_v19 = vpop.f32.mrf.mxu0 }
 0x7dc   : > { %v1717_v20 = vadd.f32 %v1716_v19, %v7178_v15  ;;  %v1728_v21 = vsel %vm1184_vm4, %v1722_v18, -inf }
 0x7dd   : > { %1729 = vmax.xlane.f32.xlu1 %v1728_v21 }
 0x7de   : > { %v1725_v22 = vsel %vm1180_vm5, %v1717_v20, -inf }
 0x7df   : > { %1726 = vmax.xlane.f32.xlu0 %v1725_v22 }
 0x7e1   : > { %v6344_v23 = vpop.f32.mrf.mxu0 }
 0x7e2   : > { %v1994_v24 = vadd.f32 %v6344_v23, %v7175_v14 }
 0x7e3   : > { %v1988_v39 = vpop.f32.mrf.mxu0 }
 0x7e4   : > { %v2000_v25 = vsel %vm1184_vm4, %v1994_v24, -inf  ;;  %v1989_v40 = vadd.f32 %v1988_v39, %v7178_v15 }
 0x7e6   : > { %v1997_v41 = vsel %vm1180_vm5, %v1989_v40, -inf }
 0x7ee   : > { %2192 = vrot.lane.b32.xlu1 %v7138_v1, %s6758_s30 }
 0x7f2   : > { %2186 = vrot.lane.b32.xlu1 %v7154_v12, %s6761_s23 }
 0x7f6   : > { %2188 = vrot.lane.b32.xlu1 %v7156_v13, %s6761_s23  ;;  %s6765_s23 = smov 64  }
 0x81a   : > { %2001 = vmax.xlane.f32.xlu1 %v2000_v25 }
 0x82b   : > { %2474 = vrot.lane.b32.xlu1 %v7154_v12, %s6762_s24 }
 0x866   : > { %v1730_v26 = vpop.xlane.xlu1 %1729 }
 0x867   : > { %v1732_v27 = vsub.f32 %v1722_v18, %v1730_v26 }
 0x868   : > { %v1727_v28 = vpop.xlane.xlu0 %1726 }
 0x869   : > { %v1731_v29 = vsub.f32 %v1717_v20, %v1727_v28  ;;  %v1735_v31 = vmul.f32 1.442695, %v1732_v27 }
 0x86a   : > { %v7283_v30 = vpop.permute.xlu1 %2192 }
 0x86b   : > { %v1733_v32 = vmul.f32 1.442695, %v1731_v29  ;;  %6357 = vmatprep.subr.msk.mxu0 %vm1092_vm2, %v7283_v30 }
 0x86c   : > { %6358 = vmatpush3.xpose.msk.msra.mxu0 %vm1092_vm2, %v7283_v30 }
 0x86d   : > { %6634 = vpow2.f32 %v1733_v32 }
 0x86e   : > { %v2187_v33 = vpop.permute.xlu1 %2186  ;;  %6636 = vpow2.f32 %v1735_v31 }
 0x86f   : > { %6361 = vmatprep.mubr.msk.f32.mxu0 %vm1092_vm2, %v2187_v33 }
 0x872   : > { %v2189_v43 = vpop.permute.xlu1 %2188 }
 0x87a   : > { %v6635_v34 = vpop.eup %6634 }
 0x87b   : > { %v1737_v35 = vsel %vm1180_vm5, %v6635_v34, 0.0  ;;  %v6637_v36 = vpop.eup %6636 }
 0x87c   : > { %1738 = vadd.xlane.f32.xlu0 %v1737_v35  ;;  %v1740_v37 = vsel %vm1184_vm4, %v6637_v36, 0.0 }
 0x880   : > { %1741 = vadd.xlane.f32.xlu0 %v1740_v37 }
 0x896   : > { %2190 = vrot.lane.b32.xlu0 %v7140_v3, %s6758_s30 }
 0x8a3   : > { %v2002_v45 = vpop.xlane.xlu1 %2001 }
 0x8a4   : > { %v2004_v52 = vsub.f32 %v1994_v24, %v2002_v45  ;;  %v1079_v24 = vld [vmem:[%s7844_s5 + $0x18] sm:$0xff] }
 0x8a6   : > { %v2007_v55 = vmul.f32 1.442695, %v2004_v52 }
 0x8a7   : > { %v2475_v47 = vpop.permute.xlu1 %2474 }
 0x8b5   : > { %1998 = vmax.xlane.f32.xlu0 %v1997_v41 }
 0x905   : > { %v1739_v42 = vpop.xlane.xlu0 %1738 }
 0x906   : > { %6638 = vrcp.f32 %v1739_v42 }
 0x909   : > { %v1742_v44 = vpop.xlane.xlu0 %1741 }
 0x90a   : > { %6640 = vrcp.f32 %v1742_v44 }
 0x90d   : > { %v7299_v46 = vpop.permute.xlu0 %2190 }
 0x90e   : > { %6359 = vmatprep.subr.msk.mxu0 %vm1092_vm2, %v7299_v46 }
 0x90f   : > { %6360 = vmatpush3.xpose.msk.msra.mxu0 %vm1092_vm2, %v7299_v46 }
 0x910   : > { %6376 = vmatprep.subr.msk.mxu0 %vm1092_vm2, %v7283_v30 }
 0x912   : > { %6362 = vmatmul.mubr.msk.f32.vlgmr.msra.gmra.mxu0 %vm1092_vm2, %v2189_v43 }
 0x913   : > { %v6639_v48 = vpop.eup %6638  ;;  %6377 = vmatpush3.xpose.msk.msra.mxu0 %vm1092_vm2, %v7283_v30  ;;  %6380 = vmatprep.mubr.msk.f32.mxu0 %vm1092_vm2, %v2475_v47 }
 0x914   : > { %6378 = vmatprep.subr.msk.mxu0 %vm1092_vm2, %v7299_v46  ;;  %v1745_v49 = vmul.f32 %v6639_v48, %v6635_v34 }
 0x916   : > { %5665 = vst.msk [vmem:[%s7194_s17 + $0x20] sm:$0xff] %vm1180_vm5, %v1745_v49  ;;  %6330 = vmatprep.mubr.msk.f32.mxu1 %vm1180_vm5, %v1745_v49 }
 0x917   : > { %v6641_v50 = vpop.eup %6640  ;;  %6379 = vmatpush3.xpose.msk.msra.mxu0 %vm1092_vm2, %v7299_v46 }
 0x918   : > { %6395 = vmatprep.subr.msk.mxu0 %vm1092_vm2, %v7283_v30  ;;  %v1746_v51 = vmul.f32 %v6641_v50, %v6637_v36  ;;  %v1639_v36 = vadd.f32 %v6318_v2, %v7267_v11 }
 0x91a   : > { %5666 = vst.msk [vmem:[%s7194_s17 + $0x28] sm:$0x3] %vm1184_vm4, %v1746_v51  ;;  %6331 = vmatmul.mubr.msk.f32.vlgmr.msra.gmra.mxu1 %vm1180_vm5, %v1746_v51 }
 0x91b   : > { %6334 = vmatpush3.msra.mxu1 %v1078_v38  ;;  %v1634_v38 = vadd.f32 %v1633_v8, %v7269_v16 }
 0x91c   : > { %6345 = vmatprep.subr.msk.mxu1 %vm1212_vm3, %v7134_v58 }
 0x93e   : > { %v1999_v53 = vpop.xlane.xlu0 %1998 }
 0x93f   : > { %v2003_v54 = vsub.f32 %v1989_v40, %v1999_v53  ;;  %v1080_v53 = vld [vmem:[%s7844_s5 + $0x20] sm:$0xff] }
 0x941   : > { %v2005_v56 = vmul.f32 1.442695, %v2003_v54 }
 0x943   : > { %6642 = vpow2.f32 %v2005_v56 }
 0x944   : > { %6644 = vpow2.f32 %v2007_v55 }
 0x950   : > { %v6643_v57 = vpop.eup %6642 }
 0x951   : > { %v2009_v60 = vsel %vm1180_vm5, %v6643_v57, 0.0  ;;  %v6645_v61 = vpop.eup %6644 }
 0x952   : > { %2010 = vadd.xlane.f32.xlu0 %v2009_v60  ;;  %v2012_v62 = vsel %vm1184_vm4, %v6645_v61, 0.0 }
 0x956   : > { %2013 = vadd.xlane.f32.xlu0 %v2012_v62 }
 0x96c   : > { %2476 = vrot.lane.b32.xlu0 %v7156_v13, %s6762_s24  ;;  %s6770_s24 = smov 24  }
 0x9d2   : > { %v6363_v63 = vpop.f32.mrf.mxu0 }
 0x9d3   : > { %v2274_v0 = vadd.f32 %v6363_v63, %v7175_v14 }
 0x9d4   : > { %v2268_v4 = vpop.f32.mrf.mxu0 }
 0x9d5   : > { %v2269_v5 = vadd.f32 %v2268_v4, %v7178_v15  ;;  %v2280_v6 = vsel %vm1184_vm4, %v2274_v0, -inf }
 0x9d6   : > { %2281 = vmax.xlane.f32.xlu0 %v2280_v6 }
 0x9d7   : > { %v2277_v7 = vsel %vm1180_vm5, %v2269_v5, -inf }
 0x9d8   : > { %2278 = vmax.xlane.f32.xlu1 %v2277_v7 }
 0x9da   : > { %v6332_v9 = vpop.f32.mrf.mxu1 }
 0x9db   : > { %v2011_v10 = vpop.xlane.xlu0 %2010 }
 0x9dc   : > { %6646 = vrcp.f32 %v2011_v10  ;;  %v1822_v17 = vpop.f32.mrf.mxu1 }
 0x9dd   : > { %6335 = vmatprep.mubr.msk.f32.mxu1 %vm1092_vm2, %v1822_v17 }
 0x9de   : > { %6336 = vmatmul.mubr.msk.f32.vlgmr.msra.gmra.mxu1 %vm1092_vm2, %v6332_v9 }
 0x9df   : > { %6346 = vmatpush3.msk.msra.mxu1 %vm1212_vm3, %v7134_v58  ;;  %v2014_v18 = vpop.xlane.xlu0 %2013 }
 0x9e0   : > { %6347 = vmatprep.subr.mxu1 %v7136_v59  ;;  %6648 = vrcp.f32 %v2014_v18 }
 0x9e1   : > { %6348 = vmatpush3.msra.mxu1 %v7136_v59 }
 0x9e2   : > { %6352 = vmatprep.subr.mxu1 %v1079_v24 }
 0x9e3   : > { %v2477_v19 = vpop.permute.xlu0 %2476 }
 0x9e4   : > { %6381 = vmatmul.mubr.msk.f32.vlgmr.msra.gmra.mxu0 %vm1092_vm2, %v2477_v19 }
 0x9e5   : > { %6396 = vmatpush3.xpose.msk.msra.mxu0 %vm1092_vm2, %v7283_v30 }
 0x9e6   : > { %6397 = vmatprep.subr.msk.mxu0 %vm1092_vm2, %v7299_v46 }
 0x9e9   : > { %v6647_v20 = vpop.eup %6646  ;;  %6398 = vmatpush3.xpose.msk.msra.mxu0 %vm1092_vm2, %v7299_v46 }
 0x9ea   : > { %6414 = vmatprep.subr.msk.mxu0 %vm1092_vm2, %v7283_v30  ;;  %v2017_v21 = vmul.f32 %v6647_v20, %v6643_v57 }
 0x9ec   : > { %5676 = vst.msk [vmem:[%s7194_s17 + $0x30] sm:$0xff] %vm1180_vm5, %v2017_v21  ;;  %6349 = vmatprep.mubr.msk.f32.mxu1 %vm1180_vm5, %v2017_v21 }
 0x9ed   : > { %v6649_v22 = vpop.eup %6648 }
 0x9ee   : > { %v2018_v23 = vmul.f32 %v6649_v22, %v6645_v61 }
 0x9f0   : > { %5677 = vst.msk [vmem:[%s7194_s17 + $0x38] sm:$0x3] %vm1184_vm4, %v2018_v23  ;;  %6350 = vmatmul.mubr.msk.f32.vlgmr.msra.gmra.mxu1 %vm1180_vm5, %v2018_v23 }
 0x9f1   : > { %6353 = vmatpush3.msra.mxu1 %v1079_v24 }
 0xa5f   : > { %v2282_v25 = vpop.xlane.xlu0 %2281 }
 0xa60   : > { %v2284_v26 = vsub.f32 %v2274_v0, %v2282_v25 }
 0xa61   : > { %v2279_v27 = vpop.xlane.xlu1 %2278 }
 0xa62   : > { %v2287_v28 = vmul.f32 1.442695, %v2284_v26  ;;  %v2283_v29 = vsub.f32 %v2269_v5, %v2279_v27  ;;  %v1081_v27 = vld [vmem:[%s7844_s5 + $0x28] sm:$0xff] }
 0xa64   : > { %6650 = vpow2.f32 %v2287_v28  ;;  %v2285_v31 = vmul.f32 1.442695, %v2283_v29 }
 0xa66   : > { %6652 = vpow2.f32 %v2285_v31 }
 0xa71   : > { %v6651_v32 = vpop.eup %6650 }
 0xa72   : > { %v2292_v33 = vsel %vm1184_vm4, %v6651_v32, 0.0 }
 0xa73   : > { %v6653_v34 = vpop.eup %6652  ;;  %2293 = vadd.xlane.f32.xlu0 %v2292_v33 }
 0xa74   : > { %v2289_v35 = vsel %vm1180_vm5, %v6653_v34, 0.0 }
 0xa75   : > { %2290 = vadd.xlane.f32.xlu1 %v2289_v35 }
 0xa86   : > { %2305 = vrot.lane.b32.xlu1 %v7134_v58, %s6758_s30 }
 0xa89   : > { %2303 = vrot.lane.b32.xlu0 %v7136_v59, %s6758_s30  ;;  %s6764_s30 = smov 72  }
 0xa8a   : > { %2746 = vrot.lane.b32.xlu1 %v7154_v12, %s6763_s14 }
 0xa8e   : > { %2748 = vrot.lane.b32.xlu1 %v7156_v13, %s6763_s14  ;;  %s6767_s14 = smov 48  }
 0xa9e   : > { %v6337_v37 = vpop.f32.mrf.mxu1 }
 0xa9f   : > { %v7367_v39 = vadd.f32 %v6337_v37, %v1639_v36 }
 0xaa0   : > { %v1903_v40 = vpop.f32.mrf.mxu1 }
 0xaa1   : > { %v7369_v41 = vadd.f32 %v1903_v40, %v1634_v38 }
 0xaa4   : > { %v6382_v42 = vpop.f32.mrf.mxu0 }
 0xaa5   : > { %v2554_v47 = vadd.f32 %v6382_v42, %v7175_v14 }
 0xaa6   : > { %v2548_v43 = vpop.f32.mrf.mxu0 }
 0xaa7   : > { %v2549_v44 = vadd.f32 %v2548_v43, %v7178_v15  ;;  %v2560_v11 = vsel %vm1184_vm4, %v2554_v47, -inf }
 0xaa9   : > { %v2557_v45 = vsel %vm1180_vm5, %v2549_v44, -inf }
 0xaaa   : > { %2558 = vmax.xlane.f32.xlu0 %v2557_v45 }
 0xab0   : > { %v6351_v48 = vpop.f32.mrf.mxu1 }
 0xab2   : > { %v2094_v49 = vpop.f32.mrf.mxu1  ;;  %2561 = vmax.xlane.f32.xlu1 %v2560_v11 }
 0xab3   : > { %6354 = vmatprep.mubr.msk.f32.mxu1 %vm1092_vm2, %v2094_v49 }
 0xab4   : > { %6355 = vmatmul.mubr.msk.f32.vlgmr.msra.gmra.mxu1 %vm1092_vm2, %v6351_v48 }
 0xac3   : > { %3018 = vrot.lane.b32.xlu1 %v7154_v12, %s6764_s30 }
 0xafc   : > { %v2294_v16 = vpop.xlane.xlu0 %2293 }
 0xafd   : > { %6654 = vrcp.f32 %v2294_v16 }
 0xafe   : > { %v2291_v50 = vpop.xlane.xlu1 %2290 }
 0xaff   : > { %6656 = vrcp.f32 %v2291_v50 }
 0xb00   : > { %v7383_v52 = vpop.permute.xlu0 %2303 }
 0xb02   : > { %v7379_v51 = vpop.permute.xlu1 %2305 }
 0xb03   : > { %6364 = vmatprep.subr.msk.mxu1 %vm1212_vm3, %v7379_v51 }
 0xb04   : > { %6365 = vmatpush3.msk.msra.mxu1 %vm1212_vm3, %v7379_v51 }
 0xb05   : > { %6366 = vmatprep.subr.mxu1 %v7383_v52 }
 0xb06   : > { %6367 = vmatpush3.msra.mxu1 %v7383_v52  ;;  %v2747_v54 = vpop.permute.xlu1 %2746 }
 0xb07   : > { %6399 = vmatprep.mubr.msk.f32.mxu0 %vm1092_vm2, %v2747_v54  ;;  %6371 = vmatprep.subr.mxu1 %v1080_v53 }
 0xb0a   : > { %v6655_v55 = vpop.eup %6654  ;;  %v2749_v56 = vpop.permute.xlu1 %2748 }
 0xb0b   : > { %6400 = vmatmul.mubr.msk.f32.vlgmr.msra.gmra.mxu0 %vm1092_vm2, %v2749_v56  ;;  %v2298_v57 = vmul.f32 %v6655_v55, %v6651_v32 }
 0xb0c   : > { %v6657_v60 = vpop.eup %6656  ;;  %6415 = vmatpush3.xpose.msk.msra.mxu0 %vm1092_vm2, %v7283_v30 }
 0xb0d   : > { %6416 = vmatprep.subr.msk.mxu0 %vm1092_vm2, %v7299_v46  ;;  %v2297_v61 = vmul.f32 %v6657_v60, %v6653_v34  ;;  %5688 = vst.msk [vmem:[%s7194_s17 + $0x48] sm:$0x3] %vm1184_vm4, %v2298_v57 }
 0xb0f   : > { %5687 = vst.msk [vmem:[%s7194_s17 + $0x40] sm:$0xff] %vm1180_vm5, %v2297_v61  ;;  %6368 = vmatprep.mubr.msk.f32.mxu1 %vm1180_vm5, %v2297_v61 }
 0xb10   : > { %6417 = vmatpush3.xpose.msk.msra.mxu0 %vm1092_vm2, %v7299_v46  ;;  %6369 = vmatmul.mubr.msk.f32.vlgmr.msra.gmra.mxu1 %vm1180_vm5, %v2298_v57 }
 0xb11   : > { %6372 = vmatpush3.msra.mxu1 %v1080_v53 }
 0xb12   : > { %6383 = vmatprep.subr.msk.mxu1 %vm1212_vm3, %v7379_v51 }
 0xb33   : > { %v2559_v30 = vpop.xlane.xlu0 %2558 }
 0xb34   : > { %v2563_v62 = vsub.f32 %v2549_v44, %v2559_v30 }
 0xb36   : > { %v2565_v63 = vmul.f32 1.442695, %v2563_v62 }
 0xb38   : > { %6658 = vpow2.f32 %v2565_v63 }
 0xb3b   : > { %v2562_v0 = vpop.xlane.xlu1 %2561 }
 0xb3c   : > { %v2564_v2 = vsub.f32 %v2554_v47, %v2562_v0 }
 0xb3e   : > { %v2567_v4 = vmul.f32 1.442695, %v2564_v2 }
 0xb3f   : > { %v3019_v5 = vpop.permute.xlu1 %3018 }
 0xb40   : > { %6660 = vpow2.f32 %v2567_v4  ;;  %6418 = vmatprep.mubr.msk.f32.mxu0 %vm1092_vm2, %v3019_v5 }
 0xb45   : > { %v6659_v6 = vpop.eup %6658 }
 0xb46   : > { %v2569_v46 = vsel %vm1180_vm5, %v6659_v6, 0.0 }
 0xb47   : > { %2570 = vadd.xlane.f32.xlu0 %v2569_v46 }
 0xb4d   : > { %v6661_v7 = vpop.eup %6660 }
 0xb4e   : > { %v2572_v8 = vsel %vm1184_vm4, %v6661_v7, 0.0 }
 0xb4f   : > { %2573 = vadd.xlane.f32.xlu0 %v2572_v8 }
 0xb65   : > { %3020 = vrot.lane.b32.xlu0 %v7156_v13, %s6764_s30 }
 0xb74   : > { %v6356_v9 = vpop.f32.mrf.mxu1 }
 0xb75   : > { %v2185_v10 = vadd.f32 %v6356_v9, %v7367_v39 }
 0xb76   : > { %v2175_v20 = vpop.f32.mrf.mxu1 }
 0xb77   : > { %v2184_v48 = vadd.f32 %v2175_v20, %v7369_v41  ;;  %v1082_v41 = vld [vmem:[%s7844_s5 + $0x30] sm:$0xff] }
 0xbcb   : > { %v6401_v17 = vpop.f32.mrf.mxu0 }
 0xbcc   : > { %v2826_v18 = vadd.f32 %v6401_v17, %v7175_v14 }
 0xbcd   : > { %v2820_v19 = vpop.f32.mrf.mxu0 }
 0xbce   : > { %v2821_v21 = vadd.f32 %v2820_v19, %v7178_v15  ;;  %v2832_v22 = vsel %vm1184_vm4, %v2826_v18, -inf }
 0xbcf   : > { %2833 = vmax.xlane.f32.xlu0 %v2832_v22 }
 0xbd0   : > { %v2571_v23 = vpop.xlane.xlu0 %2570  ;;  %v6370_v24 = vpop.f32.mrf.mxu1  ;;  %v2829_v25 = vsel %vm1180_vm5, %v2821_v21, -inf }
 0xbd1   : > { %6662 = vrcp.f32 %v2571_v23  ;;  %2830 = vmax.xlane.f32.xlu1 %v2829_v25 }
 0xbd2   : > { %v2382_v26 = vpop.f32.mrf.mxu1 }
 0xbd3   : > { %6373 = vmatprep.mubr.msk.f32.mxu1 %vm1092_vm2, %v2382_v26 }
 0xbd4   : > { %6374 = vmatmul.mubr.msk.f32.vlgmr.msra.gmra.mxu1 %vm1092_vm2, %v6370_v24 }
 0xbd5   : > { %6384 = vmatpush3.msk.msra.mxu1 %vm1212_vm3, %v7379_v51 }
 0xbd6   : > { %6385 = vmatprep.subr.mxu1 %v7383_v52 }
 0xbd7   : > { %6386 = vmatpush3.msra.mxu1 %v7383_v52 }
 0xbd8   : > { %v2574_v28 = vpop.xlane.xlu0 %2573  ;;  %6390 = vmatprep.subr.mxu1 %v1081_v27 }
 0xbd9   : > { %6664 = vrcp.f32 %v2574_v28 }
 0xbdc   : > { %v3021_v29 = vpop.permute.xlu0 %3020 }
 0xbdd   : > { %6419 = vmatmul.mubr.msk.f32.vlgmr.msra.gmra.mxu0 %vm1092_vm2, %v3021_v29 }
 0xbde   : > { %v6663_v31 = vpop.eup %6662 }
 0xbdf   : > { %v2577_v32 = vmul.f32 %v6663_v31, %v6659_v6 }
 0xbe1   : > { %5698 = vst.msk [vmem:[%s7194_s17 + $0x50] sm:$0xff] %vm1180_vm5, %v2577_v32  ;;  %6387 = vmatprep.mubr.msk.f32.mxu1 %vm1180_vm5, %v2577_v32 }
 0xbe6   : > { %v6665_v33 = vpop.eup %6664 }
 0xbe7   : > { %v2578_v34 = vmul.f32 %v6665_v33, %v6661_v7 }
 0xbe9   : > { %5699 = vst.msk [vmem:[%s7194_s17 + $0x58] sm:$0x3] %vm1184_vm4, %v2578_v34  ;;  %6388 = vmatmul.mubr.msk.f32.vlgmr.msra.gmra.mxu1 %vm1180_vm5, %v2578_v34 }
 0xbea   : > { %6391 = vmatpush3.msra.mxu1 %v1081_v27 }
 0xbeb   : > { %6402 = vmatprep.subr.msk.mxu1 %vm1212_vm3, %v7379_v51 }
 0xc58   : > { %v2834_v35 = vpop.xlane.xlu0 %2833 }
 0xc59   : > { %v2836_v36 = vsub.f32 %v2826_v18, %v2834_v35 }
 0xc5a   : > { %v2831_v37 = vpop.xlane.xlu1 %2830 }
 0xc5b   : > { %v2839_v38 = vmul.f32 1.442695, %v2836_v36  ;;  %v2835_v39 = vsub.f32 %v2821_v21, %v2831_v37 }
 0xc5d   : > { %6666 = vpow2.f32 %v2839_v38  ;;  %v2837_v40 = vmul.f32 1.442695, %v2835_v39 }
 0xc5f   : > { %6668 = vpow2.f32 %v2837_v40  ;;  %v1083_v40 = vld [vmem:[%s7844_s5 + $0x38] sm:$0xff] }
 0xc6a   : > { %v6667_v42 = vpop.eup %6666 }
 0xc6b   : > { %v2844_v43 = vsel %vm1184_vm4, %v6667_v42, 0.0 }
 0xc6c   : > { %v6669_v44 = vpop.eup %6668  ;;  %2845 = vadd.xlane.f32.xlu0 %v2844_v43 }
 0xc6d   : > { %v2841_v45 = vsel %vm1180_vm5, %v6669_v44, 0.0 }
 0xc6e   : > { %2842 = vadd.xlane.f32.xlu1 %v2841_v45 }
 0xc7f   : > { %3296 = vrot.lane.b32.xlu1 %v7138_v1, %s6759_s22 }
 0xc82   : > { %3294 = vrot.lane.b32.xlu0 %v7140_v3, %s6759_s22 }
 0xc83   : > { %3290 = vrot.lane.b32.xlu1 %v7154_v12, %s6765_s23 }
 0xc87   : > { %3292 = vrot.lane.b32.xlu1 %v7156_v13, %s6765_s23  ;;  %s481_s23 = scalar_lea.vmem %s7850_s11, %s6861_s13 }
 0xc94   : > { %v6375_v47 = vpop.f32.mrf.mxu1 }
 0xc95   : > { %v7445_v11 = vadd.f32 %v6375_v47, %v2185_v10 }
 0xc96   : > { %v2463_v49 = vpop.f32.mrf.mxu1 }
 0xc97   : > { %v7447_v16 = vadd.f32 %v2463_v49, %v2184_v48 }
 0xc9d   : > { %v6420_v50 = vpop.f32.mrf.mxu0 }
 0xc9e   : > { %v3098_v56 = vadd.f32 %v6420_v50, %v7175_v14 }
 0xc9f   : > { %v3092_v53 = vpop.f32.mrf.mxu0 }
 0xca0   : > { %v3093_v54 = vadd.f32 %v3092_v53, %v7178_v15  ;;  %v3104_v60 = vsel %vm1184_vm4, %v3098_v56, -inf }
 0xca2   : > { %v3101_v55 = vsel %vm1180_vm5, %v3093_v54, -inf }
 0xca3   : > { %3102 = vmax.xlane.f32.xlu0 %v3101_v55 }
 0xca9   : > { %v6389_v57 = vpop.f32.mrf.mxu1 }
 0xcab   : > { %v2654_v61 = vpop.f32.mrf.mxu1  ;;  %3105 = vmax.xlane.f32.xlu1 %v3104_v60 }
 0xcac   : > { %6392 = vmatprep.mubr.msk.f32.mxu1 %vm1092_vm2, %v2654_v61 }
 0xcad   : > { %6393 = vmatmul.mubr.msk.f32.vlgmr.msra.gmra.mxu1 %vm1092_vm2, %v6389_v57 }
 0xcae   : > { %6403 = vmatpush3.msk.msra.mxu1 %vm1212_vm3, %v7379_v51 }
 0xcaf   : > { %6404 = vmatprep.subr.mxu1 %v7383_v52 }
 0xcb0   : > { %6405 = vmatpush3.msra.mxu1 %v7383_v52 }
 0xcb1   : > { %6409 = vmatprep.subr.mxu1 %v1082_v41 }
 0xcbc   : > { %3577 = vrot.lane.b32.xlu1 %v7154_v12, %s6766_s26 }
 0xcf5   : > { %v2846_v30 = vpop.xlane.xlu0 %2845 }
 0xcf6   : > { %6670 = vrcp.f32 %v2846_v30  ;;  %v7544_v30 = vld [vmem:[%s7172_s29] sm:$0xff] }
 0xcf7   : > { %v2843_v62 = vpop.xlane.xlu1 %2842 }
 0xcf8   : > { %6672 = vrcp.f32 %v2843_v62 }
 0xcf9   : > { %v7468_v0 = vpop.permute.xlu0 %3294 }
 0xcfb   : > { %v7464_v63 = vpop.permute.xlu1 %3296 }
 0xcfc   : > { %6433 = vmatprep.subr.msk.mxu0 %vm1092_vm2, %v7464_v63 }
 0xcfd   : > { %6434 = vmatpush3.xpose.msk.msra.mxu0 %vm1092_vm2, %v7464_v63 }
 0xcfe   : > { %6435 = vmatprep.subr.msk.mxu0 %vm1092_vm2, %v7468_v0 }
 0xcff   : > { %v3291_v2 = vpop.permute.xlu1 %3290 }
 0xd00   : > { %6437 = vmatprep.mubr.msk.f32.mxu0 %vm1092_vm2, %v3291_v2 }
 0xd01   : > { %6436 = vmatpush3.xpose.msk.msra.mxu0 %vm1092_vm2, %v7468_v0 }
 0xd02   : > { %6452 = vmatprep.subr.msk.mxu0 %vm1092_vm2, %v7464_v63 }
 0xd03   : > { %v6671_v4 = vpop.eup %6670  ;;  %v3293_v5 = vpop.permute.xlu1 %3292 }
 0xd04   : > { %6438 = vmatmul.mubr.msk.f32.vlgmr.msra.gmra.mxu0 %vm1092_vm2, %v3293_v5  ;;  %v2850_v6 = vmul.f32 %v6671_v4, %v6667_v42  ;;  %v7549_v4 = vld [vmem:[%s7172_s29 + $0x8] sm:$0x3] }
 0xd05   : > { %v6673_v46 = vpop.eup %6672  ;;  %6453 = vmatpush3.xpose.msk.msra.mxu0 %vm1092_vm2, %v7464_v63 }
 0xd06   : > { %6454 = vmatprep.subr.msk.mxu0 %vm1092_vm2, %v7468_v0  ;;  %v2849_v7 = vmul.f32 %v6673_v46, %v6669_v44  ;;  %5710 = vst.msk [vmem:[%s7194_s17 + $0x68] sm:$0x3] %vm1184_vm4, %v2850_v6 }
 0xd08   : > { %5709 = vst.msk [vmem:[%s7194_s17 + $0x60] sm:$0xff] %vm1180_vm5, %v2849_v7  ;;  %6406 = vmatprep.mubr.msk.f32.mxu1 %vm1180_vm5, %v2849_v7 }
 0xd09   : > { %6407 = vmatmul.mubr.msk.f32.vlgmr.msra.gmra.mxu1 %vm1180_vm5, %v2850_v6  ;;  %6455 = vmatpush3.xpose.msk.msra.mxu0 %vm1092_vm2, %v7468_v0 }
 0xd0a   : > { %6410 = vmatpush3.msra.mxu1 %v1082_v41  ;;  %6471 = vmatprep.subr.msk.mxu0 %vm1092_vm2, %v7464_v63 }
 0xd0b   : > { %6421 = vmatprep.subr.msk.mxu1 %vm1212_vm3, %v7379_v51 }
 0xd2c   : > { %v3103_v8 = vpop.xlane.xlu0 %3102 }
 0xd2d   : > { %v3107_v9 = vsub.f32 %v3093_v54, %v3103_v8 }
 0xd2f   : > { %v3109_v10 = vmul.f32 1.442695, %v3107_v9 }
 0xd31   : > { %6674 = vpow2.f32 %v3109_v10 }
 0xd34   : > { %v3106_v17 = vpop.xlane.xlu1 %3105 }
 0xd35   : > { %v3108_v18 = vsub.f32 %v3098_v56, %v3106_v17  ;;  %v1084_v17 = vld [vmem:[%s7844_s5 + $0x40] sm:$0xff] }
 0xd37   : > { %v3111_v19 = vmul.f32 1.442695, %v3108_v18 }
 0xd38   : > { %v3578_v20 = vpop.permute.xlu1 %3577 }
 0xd39   : > { %6676 = vpow2.f32 %v3111_v19  ;;  %6456 = vmatprep.mubr.msk.f32.mxu0 %vm1092_vm2, %v3578_v20 }
 0xd3e   : > { %v6675_v21 = vpop.eup %6674 }
 0xd3f   : > { %v3113_v22 = vsel %vm1180_vm5, %v6675_v21, 0.0 }
 0xd40   : > { %3114 = vadd.xlane.f32.xlu0 %v3113_v22 }
 0xd46   : > { %v6677_v23 = vpop.eup %6676 }
 0xd47   : > { %v3116_v24 = vsel %vm1184_vm4, %v6677_v23, 0.0 }
 0xd48   : > { %3117 = vadd.xlane.f32.xlu0 %v3116_v24 }
 0xd5e   : > { %3579 = vrot.lane.b32.xlu0 %v7156_v13, %s6766_s26 }
 0xd6d   : > { %v6394_v25 = vpop.f32.mrf.mxu1 }
 0xd6e   : > { %v2745_v26 = vadd.f32 %v6394_v25, %v7445_v11 }
 0xd6f   : > { %v2735_v31 = vpop.f32.mrf.mxu1 }
 0xd70   : > { %v2744_v55 = vadd.f32 %v2735_v31, %v7447_v16 }
 0xdc4   : > { %v6439_v27 = vpop.f32.mrf.mxu0 }
 0xdc5   : > { %v3378_v28 = vadd.f32 %v6439_v27, %v7175_v14 }
 0xdc6   : > { %v3372_v29 = vpop.f32.mrf.mxu0 }
 0xdc7   : > { %v3373_v32 = vadd.f32 %v3372_v29, %v7178_v15  ;;  %v3384_v33 = vsel %vm1184_vm4, %v3378_v28, -inf }
 0xdc8   : > { %3385 = vmax.xlane.f32.xlu0 %v3384_v33 }
 0xdc9   : > { %v3115_v34 = vpop.xlane.xlu0 %3114  ;;  %v6408_v35 = vpop.f32.mrf.mxu1  ;;  %v3381_v36 = vsel %vm1180_vm5, %v3373_v32, -inf }
 0xdca   : > { %6678 = vrcp.f32 %v3115_v34  ;;  %3382 = vmax.xlane.f32.xlu1 %v3381_v36 }
 0xdcb   : > { %v2926_v37 = vpop.f32.mrf.mxu1 }
 0xdcc   : > { %6411 = vmatprep.mubr.msk.f32.mxu1 %vm1092_vm2, %v2926_v37 }
 0xdcd   : > { %6412 = vmatmul.mubr.msk.f32.vlgmr.msra.gmra.mxu1 %vm1092_vm2, %v6408_v35 }
 0xdce   : > { %6422 = vmatpush3.msk.msra.mxu1 %vm1212_vm3, %v7379_v51 }
 0xdcf   : > { %6423 = vmatprep.subr.mxu1 %v7383_v52 }
 0xdd0   : > { %6424 = vmatpush3.msra.mxu1 %v7383_v52 }
 0xdd1   : > { %v3118_v14 = vpop.xlane.xlu0 %3117  ;;  %6428 = vmatprep.subr.mxu1 %v1083_v40 }
 0xdd2   : > { %6680 = vrcp.f32 %v3118_v14 }
 0xdd5   : > { %v3580_v15 = vpop.permute.xlu0 %3579 }
 0xdd6   : > { %6457 = vmatmul.mubr.msk.f32.vlgmr.msra.gmra.mxu0 %vm1092_vm2, %v3580_v15 }
 0xdd7   : > { %v6679_v38 = vpop.eup %6678  ;;  %6472 = vmatpush3.xpose.msk.msra.mxu0 %vm1092_vm2, %v7464_v63 }
 0xdd8   : > { %6473 = vmatprep.subr.msk.mxu0 %vm1092_vm2, %v7468_v0  ;;  %v3121_v39 = vmul.f32 %v6679_v38, %v6675_v21 }
 0xdda   : > { %5720 = vst.msk [vmem:[%s7194_s17 + $0x70] sm:$0xff] %vm1180_vm5, %v3121_v39  ;;  %6425 = vmatprep.mubr.msk.f32.mxu1 %vm1180_vm5, %v3121_v39 }
 0xddb   : > { %6474 = vmatpush3.xpose.msk.msra.mxu0 %vm1092_vm2, %v7468_v0 }
 0xddc   : > { %6490 = vmatprep.subr.msk.mxu0 %vm1092_vm2, %v7464_v63 }
 0xddf   : > { %v6681_v51 = vpop.eup %6680 }
 0xde0   : > { %v3122_v52 = vmul.f32 %v6681_v51, %v6677_v23 }
 0xde2   : > { %5721 = vst.msk [vmem:[%s7194_s17 + $0x78] sm:$0x3] %vm1184_vm4, %v3122_v52  ;;  %6426 = vmatmul.mubr.msk.f32.vlgmr.msra.gmra.mxu1 %vm1180_vm5, %v3122_v52 }
 0xde3   : > { %6429 = vmatpush3.msra.mxu1 %v1083_v40 }
 0xe51   : > { %v3386_v42 = vpop.xlane.xlu0 %3385 }
 0xe52   : > { %v3388_v43 = vsub.f32 %v3378_v28, %v3386_v42 }
 0xe53   : > { %v3383_v44 = vpop.xlane.xlu1 %3382 }
 0xe54   : > { %v3391_v45 = vmul.f32 1.442695, %v3388_v43  ;;  %v3387_v47 = vsub.f32 %v3373_v32, %v3383_v44  ;;  %v1085_v43 = vld [vmem:[%s7844_s5 + $0x48] sm:$0xff] }
 0xe56   : > { %6682 = vpow2.f32 %v3391_v45  ;;  %v3389_v48 = vmul.f32 1.442695, %v3387_v47 }
 0xe58   : > { %6684 = vpow2.f32 %v3389_v48 }
 0xe63   : > { %v6683_v11 = vpop.eup %6682 }
 0xe64   : > { %v3396_v49 = vsel %vm1184_vm4, %v6683_v11, 0.0 }
 0xe65   : > { %v6685_v50 = vpop.eup %6684  ;;  %3397 = vadd.xlane.f32.xlu0 %v3396_v49 }
 0xe66   : > { %v3393_v53 = vsel %vm1180_vm5, %v6685_v50, 0.0 }
 0xe67   : > { %3394 = vadd.xlane.f32.xlu1 %v3393_v53 }
 0xe78   : > { %3408 = vrot.lane.b32.xlu1 %v7134_v58, %s6759_s22 }
 0xe7b   : > { %3406 = vrot.lane.b32.xlu0 %v7136_v59, %s6759_s22  ;;  %s6768_s22 = smov 40  }
 0xe7c   : > { %3849 = vrot.lane.b32.xlu1 %v7154_v12, %s6767_s14 }
 0xe80   : > { %3851 = vrot.lane.b32.xlu1 %v7156_v13, %s6767_s14 }
 0xe8d   : > { %v6413_v54 = vpop.f32.mrf.mxu1 }
 0xe8e   : > { %v7539_v56 = vadd.f32 %v6413_v54, %v2745_v26 }
 0xe8f   : > { %v3007_v57 = vpop.f32.mrf.mxu1 }
 0xe90   : > { %v7541_v60 = vadd.f32 %v3007_v57, %v2744_v55 }
 0xe96   : > { %v6458_v61 = vpop.f32.mrf.mxu0 }
 0xe97   : > { %v3657_v5 = vadd.f32 %v7549_v4, %v6458_v61 }
 0xe98   : > { %v3651_v41 = vpop.f32.mrf.mxu0 }
 0xe99   : > { %v3652_v62 = vadd.f32 %v7544_v30, %v3651_v41  ;;  %v3663_v16 = vsel %vm1184_vm4, %v3657_v5, -inf }
 0xe9b   : > { %v3660_v2 = vsel %vm1180_vm5, %v3652_v62, -inf }
 0xe9c   : > { %3661 = vmax.xlane.f32.xlu0 %v3660_v2 }
 0xea2   : > { %v6427_v6 = vpop.f32.mrf.mxu1 }
 0xea4   : > { %v3198_v46 = vpop.f32.mrf.mxu1  ;;  %3664 = vmax.xlane.f32.xlu1 %v3663_v16 }
 0xea5   : > { %6430 = vmatprep.mubr.msk.f32.mxu1 %vm1092_vm2, %v3198_v46 }
 0xea6   : > { %6431 = vmatmul.mubr.msk.f32.vlgmr.msra.gmra.mxu1 %vm1092_vm2, %v6427_v6 }
 0xeb5   : > { %4121 = vrot.lane.b32.xlu1 %v7154_v12, %s6768_s22 }
 0xeee   : > { %v3398_v7 = vpop.xlane.xlu0 %3397 }
 0xeef   : > { %6686 = vrcp.f32 %v3398_v7 }
 0xef0   : > { %v3395_v8 = vpop.xlane.xlu1 %3394 }
 0xef1   : > { %6688 = vrcp.f32 %v3395_v8 }
 0xef2   : > { %v7561_v10 = vpop.permute.xlu0 %3406 }
 0xef4   : > { %v7557_v9 = vpop.permute.xlu1 %3408 }
 0xef5   : > { %6440 = vmatprep.subr.msk.mxu1 %vm1212_vm3, %v7557_v9 }
 0xef6   : > { %6441 = vmatpush3.msk.msra.mxu1 %vm1212_vm3, %v7557_v9 }
 0xef7   : > { %6442 = vmatprep.subr.mxu1 %v7561_v10 }
 0xef8   : > { %6443 = vmatpush3.msra.mxu1 %v7561_v10  ;;  %v3850_v18 = vpop.permute.xlu1 %3849 }
 0xef9   : > { %6475 = vmatprep.mubr.msk.f32.mxu0 %vm1092_vm2, %v3850_v18  ;;  %6447 = vmatprep.subr.mxu1 %v1084_v17 }
 0xefc   : > { %v6687_v19 = vpop.eup %6686  ;;  %v3852_v20 = vpop.permute.xlu1 %3851 }
 0xefd   : > { %6476 = vmatmul.mubr.msk.f32.vlgmr.msra.gmra.mxu0 %vm1092_vm2, %v3852_v20  ;;  %v3402_v21 = vmul.f32 %v6687_v19, %v6683_v11 }
 0xefe   : > { %v6689_v22 = vpop.eup %6688  ;;  %6491 = vmatpush3.xpose.msk.msra.mxu0 %vm1092_vm2, %v7464_v63 }
 0xeff   : > { %6492 = vmatprep.subr.msk.mxu0 %vm1092_vm2, %v7468_v0  ;;  %v3401_v23 = vmul.f32 %v6689_v22, %v6685_v50  ;;  %5732 = vst.msk [vmem:[%s7194_s17 + $0x88] sm:$0x3] %vm1184_vm4, %v3402_v21 }
 0xf01   : > { %5731 = vst.msk [vmem:[%s7194_s17 + $0x80] sm:$0xff] %vm1180_vm5, %v3401_v23  ;;  %6444 = vmatprep.mubr.msk.f32.mxu1 %vm1180_vm5, %v3401_v23 }
 0xf02   : > { %6493 = vmatpush3.xpose.msk.msra.mxu0 %vm1092_vm2, %v7468_v0  ;;  %6445 = vmatmul.mubr.msk.f32.vlgmr.msra.gmra.mxu1 %vm1180_vm5, %v3402_v21 }
 0xf03   : > { %6448 = vmatpush3.msra.mxu1 %v1084_v17 }
 0xf04   : > { %6459 = vmatprep.subr.msk.mxu1 %vm1212_vm3, %v7557_v9 }
 0xf25   : > { %v3662_v63 = vpop.xlane.xlu0 %3661 }
 0xf26   : > { %v3666_v24 = vsub.f32 %v3652_v62, %v3662_v63 }
 0xf28   : > { %v3668_v25 = vmul.f32 1.442695, %v3666_v24 }
 0xf2a   : > { %6690 = vpow2.f32 %v3668_v25 }
 0xf2d   : > { %v3665_v26 = vpop.xlane.xlu1 %3664 }
 0xf2e   : > { %v3667_v27 = vsub.f32 %v3657_v5, %v3665_v26 }
 0xf30   : > { %v3670_v28 = vmul.f32 1.442695, %v3667_v27 }
 0xf31   : > { %v4122_v29 = vpop.permute.xlu1 %4121 }
 0xf32   : > { %6692 = vpow2.f32 %v3670_v28  ;;  %6494 = vmatprep.mubr.msk.f32.mxu0 %vm1092_vm2, %v4122_v29 }
 0xf37   : > { %v6691_v31 = vpop.eup %6690 }
 0xf38   : > { %v3672_v0 = vsel %vm1180_vm5, %v6691_v31, 0.0 }
 0xf39   : > { %3673 = vadd.xlane.f32.xlu0 %v3672_v0 }
 0xf3f   : > { %v6693_v32 = vpop.eup %6692 }
 0xf40   : > { %v3675_v33 = vsel %vm1184_vm4, %v6693_v32, 0.0 }
 0xf41   : > { %3676 = vadd.xlane.f32.xlu0 %v3675_v33 }
 0xf57   : > { %4123 = vrot.lane.b32.xlu0 %v7156_v13, %s6768_s22 }
 0xf66   : > { %v6432_v34 = vpop.f32.mrf.mxu1 }
 0xf67   : > { %v3289_v35 = vadd.f32 %v6432_v34, %v7539_v56 }
 0xf68   : > { %v3279_v15 = vpop.f32.mrf.mxu1 }
 0xf69   : > { %v3288_v6 = vadd.f32 %v3279_v15, %v7541_v60  ;;  %v1086_v60 = vld [vmem:[%s7844_s5 + $0x50] sm:$0xff] }
 0xfbd   : > { %v6477_v36 = vpop.f32.mrf.mxu0 }
 0xfbe   : > { %v3929_v37 = vadd.f32 %v7549_v4, %v6477_v36 }
 0xfbf   : > { %v3923_v14 = vpop.f32.mrf.mxu0 }
 0xfc0   : > { %v3924_v38 = vadd.f32 %v7544_v30, %v3923_v14  ;;  %v3935_v39 = vsel %vm1184_vm4, %v3929_v37, -inf }
 0xfc1   : > { %3936 = vmax.xlane.f32.xlu0 %v3935_v39 }
 0xfc2   : > { %v3674_v51 = vpop.xlane.xlu0 %3673  ;;  %v6446_v52 = vpop.f32.mrf.mxu1  ;;  %v3932_v40 = vsel %vm1180_vm5, %v3924_v38, -inf }
 0xfc3   : > { %6694 = vrcp.f32 %v3674_v51  ;;  %3933 = vmax.xlane.f32.xlu1 %v3932_v40 }
 0xfc4   : > { %v3485_v42 = vpop.f32.mrf.mxu1 }
 0xfc5   : > { %6449 = vmatprep.mubr.msk.f32.mxu1 %vm1092_vm2, %v3485_v42 }
 0xfc6   : > { %6450 = vmatmul.mubr.msk.f32.vlgmr.msra.gmra.mxu1 %vm1092_vm2, %v6446_v52 }
 0xfc7   : > { %6460 = vmatpush3.msk.msra.mxu1 %vm1212_vm3, %v7557_v9 }
 0xfc8   : > { %6461 = vmatprep.subr.mxu1 %v7561_v10 }
 0xfc9   : > { %6462 = vmatpush3.msra.mxu1 %v7561_v10 }
 0xfca   : > { %v3677_v44 = vpop.xlane.xlu0 %3676  ;;  %6466 = vmatprep.subr.mxu1 %v1085_v43 }
 0xfcb   : > { %6696 = vrcp.f32 %v3677_v44 }
 0xfce   : > { %v4124_v45 = vpop.permute.xlu0 %4123 }
 0xfcf   : > { %6495 = vmatmul.mubr.msk.f32.vlgmr.msra.gmra.mxu0 %vm1092_vm2, %v4124_v45 }
 0xfd0   : > { %v6695_v47 = vpop.eup %6694 }
 0xfd1   : > { %v3680_v48 = vmul.f32 %v6695_v47, %v6691_v31 }
 0xfd3   : > { %5742 = vst.msk [vmem:[%s7194_s17 + $0x90] sm:$0xff] %vm1180_vm5, %v3680_v48  ;;  %6463 = vmatprep.mubr.msk.f32.mxu1 %vm1180_vm5, %v3680_v48 }
 0xfd8   : > { %v6697_v11 = vpop.eup %6696 }
 0xfd9   : > { %v3681_v49 = vmul.f32 %v6697_v11, %v6693_v32 }
 0xfdb   : > { %5743 = vst.msk [vmem:[%s7194_s17 + $0x98] sm:$0x3] %vm1184_vm4, %v3681_v49  ;;  %6464 = vmatmul.mubr.msk.f32.vlgmr.msra.gmra.mxu1 %vm1180_vm5, %v3681_v49 }
 0xfdc   : > { %6467 = vmatpush3.msra.mxu1 %v1085_v43 }
 0xfdd   : > { %6478 = vmatprep.subr.msk.mxu1 %vm1212_vm3, %v7557_v9 }
0x104a   : > { %v3937_v50 = vpop.xlane.xlu0 %3936 }
0x104b   : > { %v3939_v53 = vsub.f32 %v3929_v37, %v3937_v50 }
0x104c   : > { %v3934_v54 = vpop.xlane.xlu1 %3933 }
0x104d   : > { %v3942_v55 = vmul.f32 1.442695, %v3939_v53  ;;  %v3938_v56 = vsub.f32 %v3924_v38, %v3934_v54 }
0x104f   : > { %6698 = vpow2.f32 %v3942_v55  ;;  %v3940_v57 = vmul.f32 1.442695, %v3938_v56 }
0x1051   : > { %6700 = vpow2.f32 %v3940_v57  ;;  %v1087_v57 = vld [vmem:[%s7844_s5 + $0x58] sm:$0xff] }
0x105c   : > { %v6699_v61 = vpop.eup %6698 }
0x105d   : > { %v3947_v41 = vsel %vm1184_vm4, %v6699_v61, 0.0 }
0x105e   : > { %v6701_v62 = vpop.eup %6700  ;;  %3948 = vadd.xlane.f32.xlu0 %v3947_v41 }
0x105f   : > { %v3944_v2 = vsel %vm1180_vm5, %v6701_v62, 0.0 }
0x1060   : > { %3945 = vadd.xlane.f32.xlu1 %v3944_v2 }
0x1071   : > { %4399 = vrot.lane.b32.xlu1 %v7138_v1, %s6760_s18 }
0x1074   : > { %4397 = vrot.lane.b32.xlu0 %v7140_v3, %s6760_s18 }
0x1075   : > { %4393 = vrot.lane.b32.xlu1 %v7154_v12, %s6769_s19 }
0x1079   : > { %4395 = vrot.lane.b32.xlu1 %v7156_v13, %s6769_s19 }
0x1086   : > { %v6451_v5 = vpop.f32.mrf.mxu1 }
0x1087   : > { %v7623_v16 = vadd.f32 %v6451_v5, %v3289_v35 }
0x1088   : > { %v3566_v46 = vpop.f32.mrf.mxu1 }
0x1089   : > { %v7625_v7 = vadd.f32 %v3566_v46, %v3288_v6 }
0x108f   : > { %v6496_v8 = vpop.f32.mrf.mxu0 }
0x1090   : > { %v4201_v3 = vadd.f32 %v7549_v4, %v6496_v8 }
0x1091   : > { %v4195_v17 = vpop.f32.mrf.mxu0 }
0x1092   : > { %v4196_v1 = vadd.f32 %v7544_v30, %v4195_v17  ;;  %v4207_v20 = vsel %vm1184_vm4, %v4201_v3, -inf }
0x1094   : > { %v4204_v18 = vsel %vm1180_vm5, %v4196_v1, -inf }
0x1095   : > { %4205 = vmax.xlane.f32.xlu0 %v4204_v18 }
0x109b   : > { %v6465_v19 = vpop.f32.mrf.mxu1 }
0x109d   : > { %v3757_v21 = vpop.f32.mrf.mxu1  ;;  %4208 = vmax.xlane.f32.xlu1 %v4207_v20 }
0x109e   : > { %6468 = vmatprep.mubr.msk.f32.mxu1 %vm1092_vm2, %v3757_v21 }
0x109f   : > { %6469 = vmatmul.mubr.msk.f32.vlgmr.msra.gmra.mxu1 %vm1092_vm2, %v6465_v19 }
0x10a0   : > { %6479 = vmatpush3.msk.msra.mxu1 %vm1212_vm3, %v7557_v9 }
0x10a1   : > { %6480 = vmatprep.subr.mxu1 %v7561_v10 }
0x10a2   : > { %6481 = vmatpush3.msra.mxu1 %v7561_v10 }
0x10a3   : > { %6485 = vmatprep.subr.mxu1 %v1086_v60 }
0x10ae   : > { %4680 = vrot.lane.b32.xlu1 %v7154_v12, %s6770_s24 }
0x10e7   : > { %v3949_v22 = vpop.xlane.xlu0 %3948 }
0x10e8   : > { %6702 = vrcp.f32 %v3949_v22 }
0x10e9   : > { %v3946_v23 = vpop.xlane.xlu1 %3945 }
0x10ea   : > { %6704 = vrcp.f32 %v3946_v23 }
0x10eb   : > { %v7646_v24 = vpop.permute.xlu0 %4397 }
0x10ed   : > { %v7642_v63 = vpop.permute.xlu1 %4399 }
0x10ee   : > { %6509 = vmatprep.subr.msk.mxu0 %vm1092_vm2, %v7642_v63 }
0x10ef   : > { %6510 = vmatpush3.xpose.msk.msra.mxu0 %vm1092_vm2, %v7642_v63 }
0x10f0   : > { %6511 = vmatprep.subr.msk.mxu0 %vm1092_vm2, %v7646_v24 }
0x10f1   : > { %v4394_v25 = vpop.permute.xlu1 %4393 }
0x10f2   : > { %6513 = vmatprep.mubr.msk.f32.mxu0 %vm1092_vm2, %v4394_v25 }
0x10f3   : > { %6512 = vmatpush3.xpose.msk.msra.mxu0 %vm1092_vm2, %v7646_v24 }
0x10f4   : > { %6528 = vmatprep.subr.msk.mxu0 %vm1092_vm2, %v7642_v63 }
0x10f5   : > { %v6703_v26 = vpop.eup %6702  ;;  %v4396_v27 = vpop.permute.xlu1 %4395 }
0x10f6   : > { %6514 = vmatmul.mubr.msk.f32.vlgmr.msra.gmra.mxu0 %vm1092_vm2, %v4396_v27  ;;  %v3953_v28 = vmul.f32 %v6703_v26, %v6699_v61 }
0x10f7   : > { %v6705_v29 = vpop.eup %6704  ;;  %6529 = vmatpush3.xpose.msk.msra.mxu0 %vm1092_vm2, %v7642_v63 }
0x10f8   : > { %6530 = vmatprep.subr.msk.mxu0 %vm1092_vm2, %v7646_v24  ;;  %v3952_v31 = vmul.f32 %v6705_v29, %v6701_v62  ;;  %5754 = vst.msk [vmem:[%s7194_s17 + $0xa8] sm:$0x3] %vm1184_vm4, %v3953_v28 }
0x10fa   : > { %5753 = vst.msk [vmem:[%s7194_s17 + $0xa0] sm:$0xff] %vm1180_vm5, %v3952_v31  ;;  %6482 = vmatprep.mubr.msk.f32.mxu1 %vm1180_vm5, %v3952_v31 }
0x10fb   : > { %6483 = vmatmul.mubr.msk.f32.vlgmr.msra.gmra.mxu1 %vm1180_vm5, %v3953_v28  ;;  %6531 = vmatpush3.xpose.msk.msra.mxu0 %vm1092_vm2, %v7646_v24 }
0x10fc   : > { %6486 = vmatpush3.msra.mxu1 %v1086_v60  ;;  %6547 = vmatprep.subr.msk.mxu0 %vm1092_vm2, %v7642_v63 }
0x10fd   : > { %6497 = vmatprep.subr.msk.mxu1 %vm1212_vm3, %v7557_v9 }
0x111e   : > { %v4206_v0 = vpop.xlane.xlu0 %4205 }
0x111f   : > { %v4210_v32 = vsub.f32 %v4196_v1, %v4206_v0 }
0x1121   : > { %v4212_v33 = vmul.f32 1.442695, %v4210_v32 }
0x1123   : > { %6706 = vpow2.f32 %v4212_v33 }
0x1126   : > { %v4209_v34 = vpop.xlane.xlu1 %4208 }
0x1127   : > { %v4211_v35 = vsub.f32 %v4201_v3, %v4209_v34 }
0x1129   : > { %v4214_v36 = vmul.f32 1.442695, %v4211_v35 }
0x112a   : > { %v4681_v37 = vpop.permute.xlu1 %4680 }
0x112b   : > { %6708 = vpow2.f32 %v4214_v36  ;;  %6532 = vmatprep.mubr.msk.f32.mxu0 %vm1092_vm2, %v4681_v37 }
0x1130   : > { %v6707_v14 = vpop.eup %6706 }
0x1131   : > { %v4216_v15 = vsel %vm1180_vm5, %v6707_v14, 0.0 }
0x1132   : > { %4217 = vadd.xlane.f32.xlu0 %v4216_v15 }
0x1138   : > { %v6709_v38 = vpop.eup %6708 }
0x1139   : > { %v4219_v39 = vsel %vm1184_vm4, %v6709_v38, 0.0 }
0x113a   : > { %4220 = vadd.xlane.f32.xlu0 %v4219_v39 }
0x1150   : > { %4682 = vrot.lane.b32.xlu0 %v7156_v13, %s6770_s24 }
0x115f   : > { %v6470_v51 = vpop.f32.mrf.mxu1 }
0x1160   : > { %v3848_v52 = vadd.f32 %v6470_v51, %v7623_v16 }
0x1161   : > { %v3838_v44 = vpop.f32.mrf.mxu1 }
0x1162   : > { %v3847_v18 = vadd.f32 %v3838_v44, %v7625_v7 }
0x11b6   : > { %v6515_v40 = vpop.f32.mrf.mxu0 }
0x11b7   : > { %v4481_v42 = vadd.f32 %v7549_v4, %v6515_v40 }
0x11b8   : > { %v4475_v43 = vpop.f32.mrf.mxu0 }
0x11b9   : > { %v4476_v45 = vadd.f32 %v7544_v30, %v4475_v43  ;;  %v4487_v47 = vsel %vm1184_vm4, %v4481_v42, -inf }
0x11ba   : > { %4488 = vmax.xlane.f32.xlu0 %v4487_v47 }
0x11bb   : > { %v4218_v48 = vpop.xlane.xlu0 %4217  ;;  %v6484_v11 = vpop.f32.mrf.mxu1  ;;  %v4484_v49 = vsel %vm1180_vm5, %v4476_v45, -inf }
0x11bc   : > { %6710 = vrcp.f32 %v4218_v48  ;;  %4485 = vmax.xlane.f32.xlu1 %v4484_v49 }
0x11bd   : > { %v4029_v50 = vpop.f32.mrf.mxu1 }
0x11be   : > { %6487 = vmatprep.mubr.msk.f32.mxu1 %vm1092_vm2, %v4029_v50 }
0x11bf   : > { %6488 = vmatmul.mubr.msk.f32.vlgmr.msra.gmra.mxu1 %vm1092_vm2, %v6484_v11 }
0x11c0   : > { %6498 = vmatpush3.msk.msra.mxu1 %vm1212_vm3, %v7557_v9 }
0x11c1   : > { %6499 = vmatprep.subr.mxu1 %v7561_v10 }
0x11c2   : > { %6500 = vmatpush3.msra.mxu1 %v7561_v10 }
0x11c3   : > { %v4221_v53 = vpop.xlane.xlu0 %4220  ;;  %6504 = vmatprep.subr.mxu1 %v1087_v57 }
0x11c4   : > { %6712 = vrcp.f32 %v4221_v53 }
0x11c7   : > { %v4683_v54 = vpop.permute.xlu0 %4682 }
0x11c8   : > { %6533 = vmatmul.mubr.msk.f32.vlgmr.msra.gmra.mxu0 %vm1092_vm2, %v4683_v54 }
0x11c9   : > { %v6711_v55 = vpop.eup %6710  ;;  %6548 = vmatpush3.xpose.msk.msra.mxu0 %vm1092_vm2, %v7642_v63 }
0x11ca   : > { %6549 = vmatprep.subr.msk.mxu0 %vm1092_vm2, %v7646_v24  ;;  %v4224_v56 = vmul.f32 %v6711_v55, %v6707_v14  ;;  %v1089_v55 = vld [vmem:[%s7844_s5 + $0x68] sm:$0xff] }
0x11cc   : > { %5764 = vst.msk [vmem:[%s7194_s17 + $0xb0] sm:$0xff] %vm1180_vm5, %v4224_v56  ;;  %6501 = vmatprep.mubr.msk.f32.mxu1 %vm1180_vm5, %v4224_v56 }
0x11cd   : > { %6550 = vmatpush3.xpose.msk.msra.mxu0 %vm1092_vm2, %v7646_v24 }
0x11ce   : > { %6566 = vmatprep.subr.msk.mxu0 %vm1092_vm2, %v7642_v63 }
0x11d1   : > { %v6713_v9 = vpop.eup %6712 }
0x11d2   : > { %v4225_v10 = vmul.f32 %v6713_v9, %v6709_v38 }
0x11d4   : > { %5765 = vst.msk [vmem:[%s7194_s17 + $0xb8] sm:$0x3] %vm1184_vm4, %v4225_v10  ;;  %6502 = vmatmul.mubr.msk.f32.vlgmr.msra.gmra.mxu1 %vm1180_vm5, %v4225_v10 }
0x11d5   : > { %6505 = vmatpush3.msra.mxu1 %v1087_v57 }
0x1243   : > { %v4489_v61 = vpop.xlane.xlu0 %4488 }
0x1244   : > { %v4491_v41 = vsub.f32 %v4481_v42, %v4489_v61 }
0x1245   : > { %v4486_v62 = vpop.xlane.xlu1 %4485 }
0x1246   : > { %v4494_v2 = vmul.f32 1.442695, %v4491_v41  ;;  %v4490_v5 = vsub.f32 %v4476_v45, %v4486_v62 }
0x1248   : > { %6714 = vpow2.f32 %v4494_v2  ;;  %v4492_v6 = vmul.f32 1.442695, %v4490_v5 }
0x124a   : > { %6716 = vpow2.f32 %v4492_v6 }
0x1255   : > { %v6715_v16 = vpop.eup %6714 }
0x1256   : > { %v4499_v46 = vsel %vm1184_vm4, %v6715_v16, 0.0 }
0x1257   : > { %v6717_v8 = vpop.eup %6716  ;;  %4500 = vadd.xlane.f32.xlu0 %v4499_v46 }
0x1258   : > { %v4496_v17 = vsel %vm1180_vm5, %v6717_v8, 0.0 }
0x1259   : > { %4497 = vadd.xlane.f32.xlu1 %v4496_v17 }
0x126a   : > { %4511 = vrot.lane.b32.xlu1 %v7134_v58, %s6760_s18 }
0x126d   : > { %4509 = vrot.lane.b32.xlu0 %v7136_v59, %s6760_s18  ;;  %s6772_s18 = smov 8  }
0x126e   : > { %4952 = vrot.lane.b32.xlu1 %v7154_v12, %s6771_s27 }
0x1272   : > { %4954 = vrot.lane.b32.xlu1 %v7156_v13, %s6771_s27 }
0x127f   : > { %v6489_v1 = vpop.f32.mrf.mxu1 }
0x1280   : > { %v7717_v3 = vadd.f32 %v6489_v1, %v3848_v52 }
0x1281   : > { %v4110_v19 = vpop.f32.mrf.mxu1 }
0x1282   : > { %v7719_v20 = vadd.f32 %v4110_v19, %v3847_v18 }
0x1288   : > { %v6534_v21 = vpop.f32.mrf.mxu0 }
0x1289   : > { %v4760_v59 = vadd.f32 %v7549_v4, %v6534_v21 }
0x128a   : > { %v4754_v60 = vpop.f32.mrf.mxu0 }
0x128b   : > { %v4755_v58 = vadd.f32 %v7544_v30, %v4754_v60  ;;  %v4766_v25 = vsel %vm1184_vm4, %v4760_v59, -inf }
0x128d   : > { %v4763_v22 = vsel %vm1180_vm5, %v4755_v58, -inf }
0x128e   : > { %4764 = vmax.xlane.f32.xlu0 %v4763_v22 }
0x1294   : > { %v6503_v23 = vpop.f32.mrf.mxu1 }
0x1296   : > { %v4301_v26 = vpop.f32.mrf.mxu1  ;;  %4767 = vmax.xlane.f32.xlu1 %v4766_v25 }
0x1297   : > { %6506 = vmatprep.mubr.msk.f32.mxu1 %vm1092_vm2, %v4301_v26 }
0x1298   : > { %6507 = vmatmul.mubr.msk.f32.vlgmr.msra.gmra.mxu1 %vm1092_vm2, %v6503_v23 }
0x12a7   : > { %5224 = vrot.lane.b32.xlu1 %v7154_v12, %s6772_s18  ;;  %v1088_v12 = vld [vmem:[%s7844_s5 + $0x60] sm:$0xff] }
0x12e0   : > { %v4501_v7 = vpop.xlane.xlu0 %4500 }
0x12e1   : > { %6718 = vrcp.f32 %v4501_v7 }
0x12e2   : > { %v4498_v27 = vpop.xlane.xlu1 %4497 }
0x12e3   : > { %6720 = vrcp.f32 %v4498_v27 }
0x12e4   : > { %v7733_v29 = vpop.permute.xlu0 %4509 }
0x12e6   : > { %v7729_v28 = vpop.permute.xlu1 %4511 }
0x12e7   : > { %6516 = vmatprep.subr.msk.mxu1 %vm1212_vm3, %v7729_v28 }
0x12e8   : > { %6517 = vmatpush3.msk.msra.mxu1 %vm1212_vm3, %v7729_v28 }
0x12e9   : > { %6518 = vmatprep.subr.mxu1 %v7733_v29 }
0x12ea   : > { %6519 = vmatpush3.msra.mxu1 %v7733_v29  ;;  %v4953_v31 = vpop.permute.xlu1 %4952 }
0x12eb   : > { %6551 = vmatprep.mubr.msk.f32.mxu0 %vm1092_vm2, %v4953_v31  ;;  %6523 = vmatprep.subr.mxu1 %v1088_v12 }
0x12ee   : > { %v6719_v0 = vpop.eup %6718  ;;  %v4955_v32 = vpop.permute.xlu1 %4954 }
0x12ef   : > { %6552 = vmatmul.mubr.msk.f32.vlgmr.msra.gmra.mxu0 %vm1092_vm2, %v4955_v32  ;;  %v4505_v33 = vmul.f32 %v6719_v0, %v6715_v16 }
0x12f0   : > { %v6721_v34 = vpop.eup %6720  ;;  %6567 = vmatpush3.xpose.msk.msra.mxu0 %vm1092_vm2, %v7642_v63 }
0x12f1   : > { %6568 = vmatprep.subr.msk.mxu0 %vm1092_vm2, %v7646_v24  ;;  %v4504_v35 = vmul.f32 %v6721_v34, %v6717_v8  ;;  %5776 = vst.msk [vmem:[%s7194_s17 + $0xc8] sm:$0x3] %vm1184_vm4, %v4505_v33 }
0x12f3   : > { %5775 = vst.msk [vmem:[%s7194_s17 + $0xc0] sm:$0xff] %vm1180_vm5, %v4504_v35  ;;  %6520 = vmatprep.mubr.msk.f32.mxu1 %vm1180_vm5, %v4504_v35 }
0x12f4   : > { %6569 = vmatpush3.xpose.msk.msra.mxu0 %vm1092_vm2, %v7646_v24  ;;  %6521 = vmatmul.mubr.msk.f32.vlgmr.msra.gmra.mxu1 %vm1180_vm5, %v4505_v33 }
0x12f5   : > { %6524 = vmatpush3.msra.mxu1 %v1088_v12 }
0x12f6   : > { %6535 = vmatprep.subr.msk.mxu1 %vm1212_vm3, %v7729_v28 }
0x1317   : > { %v4765_v63 = vpop.xlane.xlu0 %4764 }
0x1318   : > { %v4769_v36 = vsub.f32 %v4755_v58, %v4765_v63 }
0x131a   : > { %v4771_v37 = vmul.f32 1.442695, %v4769_v36 }
0x131c   : > { %6722 = vpow2.f32 %v4771_v37 }
0x131f   : > { %v4768_v14 = vpop.xlane.xlu1 %4767 }
0x1320   : > { %v4770_v15 = vsub.f32 %v4760_v59, %v4768_v14 }
0x1322   : > { %v4773_v38 = vmul.f32 1.442695, %v4770_v15 }
0x1323   : > { %v5225_v39 = vpop.permute.xlu1 %5224 }
0x1324   : > { %6724 = vpow2.f32 %v4773_v38  ;;  %6570 = vmatprep.mubr.msk.f32.mxu0 %vm1092_vm2, %v5225_v39 }
0x1329   : > { %v6723_v51 = vpop.eup %6722 }
0x132a   : > { %v4775_v24 = vsel %vm1180_vm5, %v6723_v51, 0.0 }
0x132b   : > { %4776 = vadd.xlane.f32.xlu0 %v4775_v24 }
0x1331   : > { %v6725_v52 = vpop.eup %6724 }
0x1332   : > { %v4778_v40 = vsel %vm1184_vm4, %v6725_v52, 0.0 }
0x1333   : > { %4779 = vadd.xlane.f32.xlu0 %v4778_v40 }
0x1349   : > { %5226 = vrot.lane.b32.xlu0 %v7156_v13, %s6772_s18 }
0x1358   : > { %v6508_v42 = vpop.f32.mrf.mxu1 }
0x1359   : > { %v4392_v43 = vadd.f32 %v6508_v42, %v7717_v3 }
0x135a   : > { %v4382_v48 = vpop.f32.mrf.mxu1 }
0x135b   : > { %v4391_v19 = vadd.f32 %v4382_v48, %v7719_v20 }
0x13af   : > { %v6553_v44 = vpop.f32.mrf.mxu0 }
0x13b0   : > { %v5032_v45 = vadd.f32 %v7549_v4, %v6553_v44 }
0x13b1   : > { %v5026_v47 = vpop.f32.mrf.mxu0 }
0x13b2   : > { %v5027_v11 = vadd.f32 %v7544_v30, %v5026_v47  ;;  %v5038_v49 = vsel %vm1184_vm4, %v5032_v45, -inf }
0x13b3   : > { %5039 = vmax.xlane.f32.xlu0 %v5038_v49 }
0x13b4   : > { %v4777_v50 = vpop.xlane.xlu0 %4776  ;;  %v6522_v53 = vpop.f32.mrf.mxu1  ;;  %v5035_v54 = vsel %vm1180_vm5, %v5027_v11, -inf }
0x13b5   : > { %6726 = vrcp.f32 %v4777_v50  ;;  %5036 = vmax.xlane.f32.xlu1 %v5035_v54 }
0x13b6   : > { %v4588_v13 = vpop.f32.mrf.mxu1 }
0x13b7   : > { %6525 = vmatprep.mubr.msk.f32.mxu1 %vm1092_vm2, %v4588_v13 }
0x13b8   : > { %6526 = vmatmul.mubr.msk.f32.vlgmr.msra.gmra.mxu1 %vm1092_vm2, %v6522_v53 }
0x13b9   : > { %6536 = vmatpush3.msk.msra.mxu1 %vm1212_vm3, %v7729_v28 }
0x13ba   : > { %6537 = vmatprep.subr.mxu1 %v7733_v29 }
0x13bb   : > { %6538 = vmatpush3.msra.mxu1 %v7733_v29 }
0x13bc   : > { %v4780_v56 = vpop.xlane.xlu0 %4779  ;;  %6542 = vmatprep.subr.mxu1 %v1089_v55 }
0x13bd   : > { %6728 = vrcp.f32 %v4780_v56 }
0x13c0   : > { %v5227_v9 = vpop.permute.xlu0 %5226 }
0x13c1   : > { %6571 = vmatmul.mubr.msk.f32.vlgmr.msra.gmra.mxu0 %vm1092_vm2, %v5227_v9 }
0x13c2   : > { %v6727_v10 = vpop.eup %6726 }
0x13c3   : > { %v4783_v57 = vmul.f32 %v6727_v10, %v6723_v51 }
0x13c5   : > { %5786 = vst.msk [vmem:[%s7194_s17 + $0xd0] sm:$0xff] %vm1180_vm5, %v4783_v57  ;;  %6539 = vmatprep.mubr.msk.f32.mxu1 %vm1180_vm5, %v4783_v57 }
0x13ca   : > { %v6729_v61 = vpop.eup %6728 }
0x13cb   : > { %v4784_v41 = vmul.f32 %v6729_v61, %v6725_v52 }
0x13cd   : > { %5787 = vst.msk [vmem:[%s7194_s17 + $0xd8] sm:$0x3] %vm1184_vm4, %v4784_v41  ;;  %6540 = vmatmul.mubr.msk.f32.vlgmr.msra.gmra.mxu1 %vm1180_vm5, %v4784_v41 }
0x13ce   : > { %6543 = vmatpush3.msra.mxu1 %v1089_v55 }
0x13cf   : > { %6554 = vmatprep.subr.msk.mxu1 %vm1212_vm3, %v7729_v28 }
0x143c   : > { %v5040_v62 = vpop.xlane.xlu0 %5039 }
0x143d   : > { %v5042_v2 = vsub.f32 %v5032_v45, %v5040_v62 }
0x143e   : > { %v5037_v5 = vpop.xlane.xlu1 %5036 }
0x143f   : > { %v5045_v6 = vmul.f32 1.442695, %v5042_v2  ;;  %v5041_v16 = vsub.f32 %v5027_v11, %v5037_v5 }
0x1441   : > { %6730 = vpow2.f32 %v5045_v6  ;;  %v5043_v46 = vmul.f32 1.442695, %v5041_v16 }
0x1443   : > { %6732 = vpow2.f32 %v5043_v46 }
0x144e   : > { %v6731_v8 = vpop.eup %6730 }
0x144f   : > { %v5050_v17 = vsel %vm1184_vm4, %v6731_v8, 0.0 }
0x1450   : > { %v6733_v1 = vpop.eup %6732  ;;  %5051 = vadd.xlane.f32.xlu0 %v5050_v17 }
0x1451   : > { %v5047_v18 = vsel %vm1180_vm5, %v6733_v1, 0.0 }
0x1452   : > { %5048 = vadd.xlane.f32.xlu1 %v5047_v18 }
0x1478   : > { %v6527_v3 = vpop.f32.mrf.mxu1 }
0x1479   : > { %v4679_v21 = vadd.f32 %v6527_v3, %v4392_v43 }
0x147a   : > { %v4669_v60 = vpop.f32.mrf.mxu1 }
0x147b   : > { %v7789_v58 = vadd.f32 %v4669_v60, %v4391_v19 }
0x1481   : > { %v6572_v22 = vpop.f32.mrf.mxu0 }
0x1482   : > { %v5304_v59 = vadd.f32 %v7549_v4, %v6572_v22 }
0x1483   : > { %v5298_v23 = vpop.f32.mrf.mxu0 }
0x1484   : > { %v5299_v25 = vadd.f32 %v7544_v30, %v5298_v23  ;;  %v5310_v26 = vsel %vm1184_vm4, %v5304_v59, -inf  ;;  %v1090_v30 = vld [vmem:[%s7844_s5 + $0x70] sm:$0xff] }
0x1485   : > { %5311 = vmax.xlane.f32.xlu0 %v5310_v26 }
0x1486   : > { %v5307_v7 = vsel %vm1180_vm5, %v5299_v25, -inf }
0x1487   : > { %5308 = vmax.xlane.f32.xlu1 %v5307_v7 }
0x148d   : > { %v6541_v27 = vpop.f32.mrf.mxu1 }
0x148f   : > { %v4860_v12 = vpop.f32.mrf.mxu1 }
0x1490   : > { %6544 = vmatprep.mubr.msk.f32.mxu1 %vm1092_vm2, %v4860_v12 }
0x1491   : > { %6545 = vmatmul.mubr.msk.f32.vlgmr.msra.gmra.mxu1 %vm1092_vm2, %v6541_v27 }
0x1492   : > { %6555 = vmatpush3.msk.msra.mxu1 %vm1212_vm3, %v7729_v28 }
0x1493   : > { %6556 = vmatprep.subr.mxu1 %v7733_v29 }
0x1494   : > { %6557 = vmatpush3.msra.mxu1 %v7733_v29 }
0x1495   : > { %6561 = vmatprep.subr.mxu1 %v1090_v30 }
0x14d9   : > { %v5052_v4 = vpop.xlane.xlu0 %5051 }
0x14da   : > { %6734 = vrcp.f32 %v5052_v4 }
0x14db   : > { %v5049_v20 = vpop.xlane.xlu1 %5048 }
0x14dc   : > { %6736 = vrcp.f32 %v5049_v20 }
0x14e7   : > { %v6735_v31 = vpop.eup %6734 }
0x14e8   : > { %v5056_v0 = vmul.f32 %v6735_v31, %v6731_v8 }
0x14e9   : > { %v6737_v32 = vpop.eup %6736 }
0x14ea   : > { %v5055_v33 = vmul.f32 %v6737_v32, %v6733_v1  ;;  %5798 = vst.msk [vmem:[%s7194_s17 + $0xe8] sm:$0x3] %vm1184_vm4, %v5056_v0 }
0x14ec   : > { %5797 = vst.msk [vmem:[%s7194_s17 + $0xe0] sm:$0xff] %vm1180_vm5, %v5055_v33  ;;  %6558 = vmatprep.mubr.msk.f32.mxu1 %vm1180_vm5, %v5055_v33 }
0x14ed   : > { %6559 = vmatmul.mubr.msk.f32.vlgmr.msra.gmra.mxu1 %vm1180_vm5, %v5056_v0 }
0x14ee   : > { %6562 = vmatpush3.msra.mxu1 %v1090_v30 }
0x14ef   : > { %6573 = vmatprep.subr.msk.mxu1 %vm1212_vm3, %v7729_v28 }
0x150e   : > { %v5312_v34 = vpop.xlane.xlu0 %5311 }
0x150f   : > { %v5314_v35 = vsub.f32 %v5304_v59, %v5312_v34 }
0x1510   : > { %v5309_v63 = vpop.xlane.xlu1 %5308 }
0x1511   : > { %v5317_v36 = vmul.f32 1.442695, %v5314_v35  ;;  %v5313_v37 = vsub.f32 %v5299_v25, %v5309_v63 }
0x1513   : > { %6738 = vpow2.f32 %v5317_v36  ;;  %v5315_v14 = vmul.f32 1.442695, %v5313_v37 }
0x1515   : > { %6740 = vpow2.f32 %v5315_v14 }
0x1520   : > { %v6739_v15 = vpop.eup %6738 }
0x1521   : > { %v5322_v38 = vsel %vm1184_vm4, %v6739_v15, 0.0 }
0x1522   : > { %v6741_v39 = vpop.eup %6740  ;;  %5323 = vadd.xlane.f32.xlu0 %v5322_v38 }
0x1523   : > { %v5319_v51 = vsel %vm1180_vm5, %v6741_v39, 0.0 }
0x1524   : > { %5320 = vadd.xlane.f32.xlu1 %v5319_v51 }
0x1551   : > { %v6546_v24 = vpop.f32.mrf.mxu1 }
0x1552   : > { %v4951_v52 = vadd.f32 %v6546_v24, %v4679_v21 }
0x1553   : > { %v4941_v40 = vpop.f32.mrf.mxu1 }
0x1554   : > { %v4950_v50 = vadd.f32 %v4941_v40, %v7789_v58 }
0x15ab   : > { %v5324_v42 = vpop.xlane.xlu0 %5323 }
0x15ac   : > { %6742 = vrcp.f32 %v5324_v42 }
0x15ad   : > { %v6560_v43 = vpop.f32.mrf.mxu1  ;;  %v5321_v44 = vpop.xlane.xlu1 %5320 }
0x15ae   : > { %6744 = vrcp.f32 %v5321_v44 }
0x15af   : > { %v5132_v45 = vpop.f32.mrf.mxu1 }
0x15b0   : > { %6563 = vmatprep.mubr.msk.f32.mxu1 %vm1092_vm2, %v5132_v45 }
0x15b1   : > { %6564 = vmatmul.mubr.msk.f32.vlgmr.msra.gmra.mxu1 %vm1092_vm2, %v6560_v43 }
0x15b2   : > { %6574 = vmatpush3.msk.msra.mxu1 %vm1212_vm3, %v7729_v28  ;;  %v1091_v28 = vld [vmem:[%s7844_s5 + $0x78] sm:$0xff] }
0x15b3   : > { %6575 = vmatprep.subr.mxu1 %v7733_v29 }
0x15b4   : > { %6576 = vmatpush3.msra.mxu1 %v7733_v29 }
0x15b5   : > { %6580 = vmatprep.subr.mxu1 %v1091_v28 }
0x15b9   : > { %v6743_v47 = vpop.eup %6742 }
0x15ba   : > { %v5328_v48 = vmul.f32 %v6743_v47, %v6739_v15 }
0x15bb   : > { %v6745_v11 = vpop.eup %6744 }
0x15bc   : > { %v5327_v49 = vmul.f32 %v6745_v11, %v6741_v39  ;;  %5809 = vst.msk [vmem:[%s7194_s17 + $0xf8] sm:$0x3] %vm1184_vm4, %v5328_v48 }
0x15be   : > { %5808 = vst.msk [vmem:[%s7194_s17 + $0xf0] sm:$0xff] %vm1180_vm5, %v5327_v49  ;;  %6577 = vmatprep.mubr.msk.f32.mxu1 %vm1180_vm5, %v5327_v49 }
0x15bf   : > { %6578 = vmatmul.mubr.msk.f32.vlgmr.msra.gmra.mxu1 %vm1180_vm5, %v5328_v48 }
0x15c0   : > { %6581 = vmatpush3.msra.mxu1 %v1091_v28 }
0x1671   : > { %v6565_v29 = vpop.f32.mrf.mxu1 }
0x1672   : > { %v5223_v53 = vadd.f32 %v6565_v29, %v4951_v52 }
0x1673   : > { %v5213_v54 = vpop.f32.mrf.mxu1 }
0x1674   : > { %v5222_v13 = vadd.f32 %v5213_v54, %v4950_v50 }
0x167f   : > { %v6579_v55 = vpop.f32.mrf.mxu1 }
0x1681   : > { %v5404_v56 = vpop.f32.mrf.mxu1 }
0x1682   : > { %6582 = vmatprep.mubr.msk.f32.mxu1 %vm1092_vm2, %v5404_v56 }
0x1683   : > { %6583 = vmatmul.mubr.msk.f32.vlgmr.msra.gmra.mxu1 %vm1092_vm2, %v6579_v55 }
0x1743   : > { %v6584_v9 = vpop.f32.mrf.mxu1 }
0x1744   : > { %v5495_v10 = vadd.f32 %v6584_v9, %v5223_v53 }
0x1745   : > { %v5485_v57 = vpop.f32.mrf.mxu1 }
0x1746   : > { %5497 = vst [vmem:[%s481_s23 + $0x8] sm:$0x3] %v5495_v10  ;;  %v5494_v61 = vadd.f32 %v5485_v57, %v5222_v13 }
0x1748   : > { %5496 = vst [vmem:[%s481_s23] sm:$0xff] %v5494_v61 }
0x1749 PF: > { %s23_s21 = sadd.s32 1, %s6754_s21  }
0x174a   : > { %p20_p4 = scmp.ge.s32.totalorder %s23_s21, 4  }
0x174c   :  { %22 = sbr.rel (!%p20_p4) target bundleno = 1 (0x1), region = 130 }

</bundles_post_ra>
